<compile_context>
chip_gen: v6e
topology: v6e:2x2x1
jax: 0.10.0
libtpu: 0.0.40
codegen_flags: <defaults>
</compile_context>

<pallas_src>
import jax
import jax.numpy as jnp
from jax.experimental import pallas as pl
from jax.experimental.pallas import tpu as pltpu


# ----------------------------- Pallas kernels ------------------------------ #
def gcn_layer1_kernel(a_ref, xw_ref, b1_ref, h_ref):
    """One row-tile of  H = elu(A_hat @ XW + b1)  (bf16 MXU, f32 math)."""
    h = jnp.dot(a_ref[...], xw_ref[...], preferred_element_type=jnp.float32)  # [tm, D]
    h = h + b1_ref[...]
    # ELU(alpha=1) in f32; clamp the exp argument so no inf is ever produced.
    h = jnp.where(h > 0, h, jnp.exp(jnp.minimum(h, 0.0)) - 1.0)
    h_ref[...] = h.astype(h_ref.dtype)                                        # bf16 out


def gcn_layer2_kernel(a_ref, h_ref, w2_ref, b2_ref, o_ref):
    """One row-tile of  y = sigmoid((A_hat @ H) @ W2 + b2).

    Re-associated so the N^2 matmul (A_tile @ H) has D output lanes; the
    D->1 contraction with W2 runs on the VPU (no 1-lane MXU matvec).
    """
    ah = jnp.dot(a_ref[...], h_ref[...], preferred_element_type=jnp.float32)  # [tm, D]
    z = jnp.sum(ah * w2_ref[...], axis=-1, keepdims=True)                     # [tm, 1]
    z = z + b2_ref[0, 0]                                                      # SMEM scalar
    o_ref[...] = jax.nn.sigmoid(z)


def gcn_fused_kernel(a_ref, xw_ref, b1_ref, w2_ref, b2_ref, o_ref):
    """Whole forward with A_hat resident in VMEM (read from HBM exactly once).

        H = elu(A @ XW + b1);   y = sigmoid((A @ H) @ W2 + b2)
    """
    a = a_ref[...]                                                            # bf16 [N, N]
    h = jnp.dot(a, xw_ref[...], preferred_element_type=jnp.float32)           # [N, D] f32
    h = h + b1_ref[...]
    h = jnp.where(h > 0, h, jnp.exp(jnp.minimum(h, 0.0)) - 1.0)
    ah = jnp.dot(a, h.astype(jnp.bfloat16), preferred_element_type=jnp.float32)
    z = jnp.sum(ah * w2_ref[...], axis=-1, keepdims=True) + b2_ref[0, 0]
    o_ref[...] = jax.nn.sigmoid(z)


# ------------------------------ sizing helpers ------------------------------ #
def _vmem_capacity_bytes():
    """Physical per-core VMEM; conservative 64 MiB (v7x) if the query fails."""
    try:
        info = pltpu.get_tpu_info()
        cap = getattr(info, "vmem_capacity_bytes", None)
        if cap:
            return int(cap)
    except Exception:
        pass
    return 64 * 1024 * 1024


def _pick_row_tile(n, elem_bytes=2, budget_bytes=32 * 1024 * 1024):
    """Largest A-row tile (multiple of 16, never 8) whose double-buffered bf16
    row slab fits the budget and that leaves >= 4 grid steps (>= 2 per
    TensorCore under megacore 'parallel' sharding)."""
    if n <= 32:
        return n
    for tm in (2048, 1024, 512, 256, 128, 64, 32, 16):
        if 2 * tm * n * elem_bytes <= budget_bytes and pl.cdiv(n, tm) >= 4:
            return tm
    return 16


# ------------------------------ forward ------------------------------------ #
def gcn_soan_forward(a_hat, x, w1, b1, w2, b2, *, force_tiled=False):
    n, _ = x.shape
    d = w1.shape[1]

    # A_hat should be pre-cast to bf16 by the caller (outside jit) so no
    # per-call [N,N] convert pass hits HBM; cast here only as a fallback.
    a_bf = a_hat if a_hat.dtype == jnp.bfloat16 else a_hat.astype(jnp.bfloat16)

    # Hoisted tiny K=F matmul: XW = X @ W1 once in plain JAX, bf16 for the MXU.
    xw_bf = jnp.dot(x, w1).astype(jnp.bfloat16)                # [N, D]
    b1_f32 = b1.reshape(1, d).astype(jnp.float32)
    w2_row = w2.reshape(1, d).astype(jnp.float32)              # [1, D] for VPU reduce
    b2_s = b2.reshape(1, 1).astype(jnp.float32)                # SMEM scalar

    cap = _vmem_capacity_bytes()
    vmem_limit = (cap * 3) // 4                                 # 96 MiB v5e/v6e, 48 MiB v7x

    # ---- fused single-pass path: A streamed from HBM once -----------------
    # Conservative estimate: A counted twice (input buffer + possible value
    # copy) + f32/bf16 activations + slack.
    fused_bytes = 4 * n * n + 24 * n * d + (2 << 20)
    if (not force_tiled) and fused_bytes <= vmem_limit:
        return pl.pallas_call(
            gcn_fused_kernel,
            out_shape=jax.ShapeDtypeStruct((n, 1), jnp.float32),
            in_specs=[
                pl.BlockSpec(memory_space=pltpu.MemorySpace.VMEM),   # A_hat (whole)
                pl.BlockSpec(memory_space=pltpu.MemorySpace.VMEM),   # XW
                pl.BlockSpec(memory_space=pltpu.MemorySpace.VMEM),   # b1
                pl.BlockSpec(memory_space=pltpu.MemorySpace.VMEM),   # W2 row
                pl.BlockSpec(memory_space=pltpu.MemorySpace.SMEM),   # b2 scalar
            ],
            out_specs=pl.BlockSpec(memory_space=pltpu.MemorySpace.VMEM),
            compiler_params=pltpu.CompilerParams(vmem_limit_bytes=vmem_limit),
        )(a_bf, xw_bf, b1_f32, w2_row, b2_s)

    # ---- two-pass row-tiled path (A does not fit VMEM) ---------------------
    tm = _pick_row_tile(n, budget_bytes=cap // 2)
    nt = pl.cdiv(n, tm)                          # masked tail tile if n % tm != 0
    cparams = pltpu.CompilerParams(
        dimension_semantics=("parallel",),       # row tiles are independent
        vmem_limit_bytes=vmem_limit,
    )

    # layer 1: H = elu(A_hat @ XW + b1)
    h = pl.pallas_call(
        gcn_layer1_kernel,
        out_shape=jax.ShapeDtypeStruct((n, d), jnp.bfloat16),
        grid=(nt,),
        in_specs=[
            pl.BlockSpec((tm, n), lambda i: (i, 0)),   # A_hat row slab (pipelined)
            pl.BlockSpec((n, d), lambda i: (0, 0)),    # XW resident
            pl.BlockSpec((1, d), lambda i: (0, 0)),    # b1 resident
        ],
        out_specs=pl.BlockSpec((tm, d), lambda i: (i, 0)),
        compiler_params=cparams,
    )(a_bf, xw_bf, b1_f32)

    # dropout(p=0.0) is the identity -> skipped

    # layer 2: y = sigmoid((A_hat @ H) @ W2 + b2)   (needs the complete H)
    out = pl.pallas_call(
        gcn_layer2_kernel,
        out_shape=jax.ShapeDtypeStruct((n, 1), jnp.float32),
        grid=(nt,),
        in_specs=[
            pl.BlockSpec((tm, n), lambda i: (i, 0)),   # A_hat row slab (pipelined)
            pl.BlockSpec((n, d), lambda i: (0, 0)),    # full H resident
            pl.BlockSpec((1, d), lambda i: (0, 0)),    # W2 row
            pl.BlockSpec(memory_space=pltpu.MemorySpace.SMEM),  # b2 scalar
        ],
        out_specs=pl.BlockSpec((tm, 1), lambda i: (i, 0)),
        compiler_params=cparams,
    )(a_bf, h, w2_row, b2_s)
    return out


# ------------------------------ JAX glue ---------------------------------- #
def build_normalized_adjacency(edge_index, edge_weight, num_nodes):
    """Dense D^{-1/2} (A + I) D^{-1/2} following PyG GCN normalization.

    edge_index[0] = source j, edge_index[1] = target i (aggregation at the
    target), so A[i, j] holds the edge weight.  Self-loops added with weight 1.
    """
    src, dst = edge_index[0], edge_index[1]
    a = jnp.zeros((num_nodes, num_nodes), jnp.float32)
    a = a.at[dst, src].add(edge_weight.astype(jnp.float32))
    a = a + jnp.eye(num_nodes, dtype=jnp.float32)
    deg = a.sum(axis=1)
    dinv = jnp.where(deg > 0, 1.0 / jnp.sqrt(deg), 0.0)
    return dinv[:, None] * a * dinv[None, :]


def init_params(key, num_features, hidden, out_dim):
    """Deterministic Glorot-uniform weights + zero biases (like GCNConv)."""
    k1, k2 = jax.random.split(key)

    def glorot(k, fan_in, fan_out):
        limit = jnp.sqrt(6.0 / (fan_in + fan_out))
        return jax.random.uniform(k, (fan_in, fan_out), jnp.float32, -limit, limit)

    w1 = glorot(k1, num_features, hidden)
    b1 = jnp.zeros((1, hidden), jnp.float32)
    w2 = glorot(k2, hidden, out_dim)
    b2 = jnp.zeros((1, out_dim), jnp.float32)
    return w1, b1, w2, b2


def reference_forward_bf16(a_bf, x, w1, b1, w2, b2):
    """Pure-JAX reference using the same bf16-operand / f32-accumulate math."""
    xw = jnp.dot(x, w1).astype(jnp.bfloat16)
    h = jnp.dot(a_bf, xw, preferred_element_type=jnp.float32) + b1
    h = jnp.where(h > 0, h, jnp.exp(jnp.minimum(h, 0.0)) - 1.0)
    ah = jnp.dot(a_bf, h.astype(jnp.bfloat16), preferred_element_type=jnp.float32)
    z = ah @ w2 + b2
    return jax.nn.sigmoid(z)


def reference_forward_f32(a_hat, x, w1, b1, w2, b2):
    """Full-precision reference of the original module semantics."""
    hp = jax.lax.Precision.HIGHEST
    h = jnp.dot(a_hat, jnp.dot(x, w1, precision=hp), precision=hp) + b1
    h = jnp.where(h > 0, h, jnp.exp(jnp.minimum(h, 0.0)) - 1.0)
    z = jnp.dot(a_hat, jnp.dot(h, w2, precision=hp), precision=hp) + b2
    return jax.nn.sigmoid(z)


# --------------------------------- main ------------------------------------ #
if __name__ == "__main__":
    key = jax.random.PRNGKey(0)
    k_x, k_e, k_w, k_p = jax.random.split(key, 4)

    num_nodes = 512        # small, but large enough to exercise both paths
    num_features = 8
    dimension = 64         # hidden size from the module
    out_dim = 1            # layer == 2 branch -> conv2 output dim is 1
    num_edges = 2048

    # node features
    x = jax.random.normal(k_x, (num_nodes, num_features), jnp.float32)

    # random directed edges with positive weights
    edge_index = jax.random.randint(k_e, (2, num_edges), 0, num_nodes, jnp.int32)
    edge_weight = jax.random.uniform(k_w, (num_edges,), jnp.float32, 0.1, 1.0)

    a_hat_f32 = build_normalized_adjacency(edge_index, edge_weight, num_nodes)
    # bf16 cast hoisted OUT of the jitted forward: done once, reused across calls.
    a_hat_bf = a_hat_f32.astype(jnp.bfloat16)
    w1, b1, w2, b2 = init_params(k_p, num_features, dimension, out_dim)

    fwd = jax.jit(gcn_soan_forward, static_argnames=("force_tiled",))

    # fused single-pass path (auto-selected at this size)
    out_fused = jax.block_until_ready(fwd(a_hat_bf, x, w1, b1, w2, b2))
    # row-tiled two-pass path (forced, to exercise the large-N code path too)
    out_tiled = jax.block_until_ready(
        fwd(a_hat_bf, x, w1, b1, w2, b2, force_tiled=True))

    ref_bf16 = reference_forward_bf16(a_hat_bf, x, w1, b1, w2, b2)
    ref_f32 = reference_forward_f32(a_hat_f32, x, w1, b1, w2, b2)

    for out in (out_fused, out_tiled):
        assert out.shape == (num_nodes, 1)
        assert bool(jnp.all(jnp.isfinite(out)))
        assert jnp.allclose(out, ref_bf16, atol=1e-3, rtol=1e-3), \
            "mismatch vs bf16-matched JAX reference"
        assert jnp.allclose(out, ref_f32, atol=5e-2, rtol=5e-2), \
            "mismatch vs full-f32 JAX reference"
    assert jnp.allclose(out_fused, out_tiled, atol=1e-5, rtol=1e-5), \
        "fused and tiled paths disagree"

    print("KERNEL_OK")
</pallas_src>

<mosaic_0001>
module attributes {stable_mosaic.version = 11 : i64} {
  func.func @gcn_fused_kernel(%arg0: memref<512x512xbf16, #tpu.memory_space<vmem>>, %arg1: memref<512x64xbf16, #tpu.memory_space<vmem>>, %arg2: memref<1x64xf32, #tpu.memory_space<vmem>>, %arg3: memref<1x64xf32, #tpu.memory_space<vmem>>, %arg4: memref<1x1xf32, #tpu.memory_space<smem>>, %arg5: memref<512x1xf32, #tpu.memory_space<vmem>>) attributes {dimension_semantics = [], scalar_prefetch = 0 : i64, scratch_operands = 0 : i64, tpu.core_type = #tpu.core_type<tc>} {
    %c0 = arith.constant 0 : index
    %c0_0 = arith.constant 0 : index
    %0 = vector.load %arg0[%c0, %c0_0] : memref<512x512xbf16, #tpu.memory_space<vmem>>, vector<512x512xbf16>
    %c0_1 = arith.constant 0 : index
    %c0_2 = arith.constant 0 : index
    %1 = vector.load %arg1[%c0_1, %c0_2] : memref<512x64xbf16, #tpu.memory_space<vmem>>, vector<512x64xbf16>
    %cst = arith.constant dense<0.000000e+00> : vector<512x64xf32>
    %2 = tpu.matmul %0, %1, %cst {dimension_numbers = #tpu.dot_dimension_numbers<[1], [0], [0], [1], [0, 0, 1, 1], [], []>} : vector<512x512xbf16>, vector<512x64xbf16>, vector<512x64xf32> -> vector<512x64xf32>
    %c0_3 = arith.constant 0 : index
    %c0_4 = arith.constant 0 : index
    %3 = vector.load %arg2[%c0_3, %c0_4] : memref<1x64xf32, #tpu.memory_space<vmem>>, vector<1x64xf32>
    %4 = vector.broadcast %3 : vector<1x64xf32> to vector<512x64xf32>
    %5 = arith.addf %2, %4 : vector<512x64xf32>
    %cst_5 = arith.constant 0.000000e+00 : f32
    %6 = vector.broadcast %cst_5 : f32 to vector<512x64xf32>
    %7 = arith.cmpf ogt, %5, %6 : vector<512x64xf32>
    %cst_6 = arith.constant 0.000000e+00 : f32
    %8 = vector.broadcast %cst_6 : f32 to vector<512x64xf32>
    %9 = arith.minimumf %5, %8 : vector<512x64xf32>
    %10 = math.exp %9 : vector<512x64xf32>
    %cst_7 = arith.constant 1.000000e+00 : f32
    %11 = vector.broadcast %cst_7 : f32 to vector<512x64xf32>
    %12 = arith.subf %10, %11 : vector<512x64xf32>
    %13 = arith.select %7, %5, %12 : vector<512x64xi1>, vector<512x64xf32>
    %14 = arith.truncf %13 : vector<512x64xf32> to vector<512x64xbf16>
    %cst_8 = arith.constant dense<0.000000e+00> : vector<512x64xf32>
    %15 = tpu.matmul %0, %14, %cst_8 {dimension_numbers = #tpu.dot_dimension_numbers<[1], [0], [0], [1], [0, 0, 1, 1], [], []>} : vector<512x512xbf16>, vector<512x64xbf16>, vector<512x64xf32> -> vector<512x64xf32>
    %c0_9 = arith.constant 0 : index
    %c0_10 = arith.constant 0 : index
    %16 = vector.load %arg3[%c0_9, %c0_10] : memref<1x64xf32, #tpu.memory_space<vmem>>, vector<1x64xf32>
    %17 = vector.broadcast %16 : vector<1x64xf32> to vector<512x64xf32>
    %18 = arith.mulf %15, %17 : vector<512x64xf32>
    %cst_11 = arith.constant dense<0.000000e+00> : vector<512xf32>
    %19 = vector.multi_reduction <add>, %18, %cst_11 [1] : vector<512x64xf32> to vector<512xf32>
    %20 = vector.shape_cast %19 : vector<512xf32> to vector<512x1xf32>
    %c0_12 = arith.constant 0 : index
    %c0_13 = arith.constant 0 : index
    %21 = memref.load %arg4[%c0_12, %c0_13] : memref<1x1xf32, #tpu.memory_space<smem>>
    %22 = vector.broadcast %21 : f32 to vector<512x1xf32>
    %23 = arith.addf %20, %22 : vector<512x1xf32>
    %24 = arith.negf %23 : vector<512x1xf32>
    %25 = math.exp %24 : vector<512x1xf32>
    %cst_14 = arith.constant 1.000000e+00 : f32
    %26 = vector.broadcast %cst_14 : f32 to vector<512x1xf32>
    %27 = arith.addf %26, %25 : vector<512x1xf32>
    %28 = arith.divf %26, %27 : vector<512x1xf32>
    %c0_15 = arith.constant 0 : index
    %c0_16 = arith.constant 0 : index
    %29 = vector.load %arg5[%c0_15, %c0_16] : memref<512x1xf32, #tpu.memory_space<vmem>>, vector<512x1xf32>
    tpu.vector_store %arg5[%c0_15, %c0_16], %28 {strides = array<i32>} : memref<512x1xf32, #tpu.memory_space<vmem>>, vector<512x1xf32>,
    return
  }
}

</mosaic_0001>

<bundles_post_ra>
// kernel: gcn_soan_forward.1
= control target key start
LH: loop header
LB: loop body
LE: loop exit
PB: predicated region body
PF: predicated region fallthrough
CT: control target
= control target key end

     0   :  { %11 = vsyncpa [#allocation4], 0  ;;  %s4477_s18 = smov [#allocation3]   ;;  %s5900_s0 = inlined_call_operand.hbm [shape: bf16[512,512], index: 0, kind: input, shape index: {}]   ;;  %s5901_s1 = inlined_call_operand.vmem [shape: bf16[512,64], index: 1, kind: input, shape index: {}]   ;;  %s5902_s2 = inlined_call_operand.vmem [shape: f32[1,64], index: 2, kind: input, shape index: {}]   ;;  %s5903_s3 = inlined_call_operand.vmem [shape: f32[1,64], index: 3, kind: input, shape index: {}]   ;;  %s5904_s4 = inlined_call_operand.<no memory space> [shape: f32[1,1], index: 4, kind: input, shape index: {}]   ;;  %s5905_s5 = inlined_call_operand.vmem [shape: f32[512,1], index: 5, kind: output, shape index: {}]  }
   0x1   :  { %s17_s19 = sshll.u32 %s4477_s18, 4  ;;  %s18_s19 = int_to_ptr.vmem [resolvable:$true] %s17_s19 }
   0x2   :  { %s4463_s20 = scalar_lea.vmem %s18_s19, 16384  ;;  %p4468_p1 = scmp.lt.s32.totalorder %s18_s19, %s18_s19 }
   0x3   :  { %p4464_p0 = scmp.ne.s32.totalorder %s18_s19, %s4463_s20  ;;  %p4469_p2 = scmp.lt.s32.totalorder %s4463_s20, %s4463_s20 }
   0x5   :  { %p4470_p3 = por %p4469_p2, %p4468_p1 }
   0x7   :  { %p4471_p4 = pnand %p4470_p3, %p4464_p0 }
   0x9   :  { %4474 = shalt.err (!%p4471_p4)
}
   0xa   :  { %s4478_s21 = smov 256   ;;  %s4479_s22 = smov 16  }
   0xb   :  { %23 = dma.hbm_to_vmem [thread:$0]  %s5900_s0, 16384, %s18_s19, [#allocation4], %s4478_s21, %s4478_s21, %s4479_s22  }
   0xc   :  { %4475 = dma.done.wait [#allocation4], 16384  }
   0xd   :  { %4476 = vsyncadd [#allocation4], 4294950912  ;;  %v4480_v0 = vmov 0   ;;  %v3717_v1 = vld [vmem:[%s5901_s1 + $0x38] sm:$0xff]   ;;  %v3719_v3 = vld [vmem:[%s5901_s1 + $0x30] sm:$0xff]  }
   0xe   :  { %1067 = vmatprep.subr.bf16.mxu0 %v4480_v0  ;;  %1356 = vmatprep.subr.bf16.mxu1 %v4480_v0  ;;  %v3718_v2 = vld [vmem:[%s5901_s1 + $0xb8] sm:$0xff]   ;;  %v3720_v4 = vld [vmem:[%s5901_s1 + $0xb0] sm:$0xff]   ;;  %v3721_v5 = vld [vmem:[%s5901_s1 + $0x28] sm:$0xff]  }
   0xf   :  { %1068 = vmatpush1.bf16.msra.mxu0 %v3717_v1  ;;  %1357 = vmatpush1.bf16.msra.mxu1 %v3718_v2  ;;  %v3722_v6 = vld [vmem:[%s5901_s1 + $0xa8] sm:$0xff]   ;;  %v3723_v7 = vld [vmem:[%s5901_s1 + $0x20] sm:$0xff]   ;;  %v3725_v9 = vld [vmem:[%s5901_s1 + $0x18] sm:$0xff]  }
  0x10   :  { %1069 = vmatprep.subr.bf16.mxu0 %v4480_v0  ;;  %1358 = vmatprep.subr.bf16.mxu1 %v4480_v0  ;;  %v3724_v8 = vld [vmem:[%s5901_s1 + $0xa0] sm:$0xff]   ;;  %v3726_v10 = vld [vmem:[%s5901_s1 + $0x98] sm:$0xff]   ;;  %v3727_v11 = vld [vmem:[%s5901_s1 + $0x10] sm:$0xff]  }
  0x11   :  { %v3728_v12 = vld [vmem:[%s5901_s1 + $0x90] sm:$0xff]   ;;  %v3729_v13 = vld [vmem:[%s5901_s1 + $0x8] sm:$0xff]   ;;  %v3731_v15 = vld [vmem:[%s5901_s1] sm:$0xff]  }
  0x12   :  { %v3730_v14 = vld [vmem:[%s5901_s1 + $0x88] sm:$0xff]   ;;  %v3732_v16 = vld [vmem:[%s5901_s1 + $0x80] sm:$0xff]   ;;  %v3733_v17 = vld [vmem:[%s5901_s1 + $0x78] sm:$0xff]  }
  0x13   :  { %1070 = vmatpush1.bf16.msra.mxu0 %v3719_v3  ;;  %1359 = vmatpush1.bf16.msra.mxu1 %v3720_v4  ;;  %v3734_v18 = vld [vmem:[%s5901_s1 + $0xf8] sm:$0xff]   ;;  %v3751_v19 = vld [vmem:[#allocation3 + $0x4] ss:$16 sps:$4 sm:$0xff]   ;;  %v3737_v23 = vld [vmem:[%s5901_s1 + $0x68] sm:$0xff]  }
  0x14   :  { %1071 = vmatprep.subr.bf16.mxu0 %v4480_v0  ;;  %1360 = vmatprep.subr.bf16.mxu1 %v4480_v0  ;;  %v3735_v20 = vld [vmem:[%s5901_s1 + $0x70] sm:$0xff]   ;;  %v3754_v21 = vld [vmem:[#allocation3 + $0xc] ss:$16 sps:$4 sm:$0xff]   ;;  %v3739_v25 = vld [vmem:[%s5901_s1 + $0x60] sm:$0xff]  }
  0x15   :  { %v3736_v22 = vld [vmem:[%s5901_s1 + $0xf0] sm:$0xff]   ;;  %1099 = vmatprep.mubr.bf16.mxu0 %v3751_v19  ;;  %1388 = vmatprep.mubr.bf16.mxu1 %v3754_v21  ;;  %v3738_v24 = vld [vmem:[%s5901_s1 + $0xe8] sm:$0xff]   ;;  %v3740_v26 = vld [vmem:[%s5901_s1 + $0xe0] sm:$0xff]  }
  0x16   :  { %v3741_v27 = vld [vmem:[%s5901_s1 + $0x58] sm:$0xff]   ;;  %v3743_v29 = vld [vmem:[%s5901_s1 + $0x50] sm:$0xff]   ;;  %v3745_v31 = vld [vmem:[%s5901_s1 + $0x48] sm:$0xff]  }
  0x17   :  { %1072 = vmatpush1.bf16.msra.mxu0 %v3721_v5  ;;  %1361 = vmatpush1.bf16.msra.mxu1 %v3722_v6  ;;  %v3742_v28 = vld [vmem:[%s5901_s1 + $0xd8] sm:$0xff]   ;;  %v3744_v30 = vld [vmem:[%s5901_s1 + $0xd0] sm:$0xff]   ;;  %v3746_v32 = vld [vmem:[%s5901_s1 + $0xc8] sm:$0xff]  }
  0x18   :  { %1073 = vmatprep.subr.bf16.mxu0 %v4480_v0  ;;  %1362 = vmatprep.subr.bf16.mxu1 %v4480_v0  ;;  %v3747_v33 = vld [vmem:[%s5901_s1 + $0x40] sm:$0xff]   ;;  %v3752_v36 = vld [vmem:[#allocation3 + $0x8] ss:$16 sps:$4 sm:$0xff]   ;;  %v3757_v38 = vld [vmem:[#allocation3 + $0x2c] ss:$16 sps:$4 sm:$0xff]  }
  0x19   :  { %v3748_v34 = vld [vmem:[%s5901_s1 + $0xc0] sm:$0xff]   ;;  %v3760_v40 = vld [vmem:[#allocation3 + $0x28] ss:$16 sps:$4 sm:$0xff]   ;;  %v3763_v42 = vld [vmem:[#allocation3 + $0x4c] ss:$16 sps:$4 sm:$0xff]  }
  0x1a   :  { %v3749_v35 = vld [vmem:[#allocation3] ss:$16 sps:$4 sm:$0xff]   ;;  %v3755_v37 = vld [vmem:[#allocation3 + $0x24] ss:$16 sps:$4 sm:$0xff]   ;;  %v3766_v44 = vld [vmem:[#allocation3 + $0x48] ss:$16 sps:$4 sm:$0xff]  }
  0x1b   :  { %1074 = vmatpush1.bf16.msra.mxu0 %v3723_v7  ;;  %1363 = vmatpush1.bf16.msra.mxu1 %v3724_v8  ;;  %v3759_v39 = vld [vmem:[#allocation3 + $0x20] ss:$16 sps:$4 sm:$0xff]   ;;  %v3761_v41 = vld [vmem:[#allocation3 + $0x44] ss:$16 sps:$4 sm:$0xff]   ;;  %v3769_v46 = vld [vmem:[#allocation3 + $0x6c] ss:$16 sps:$4 sm:$0xff]  }
  0x1c   :  { %1075 = vmatprep.subr.bf16.mxu0 %v4480_v0  ;;  %1364 = vmatprep.subr.bf16.mxu1 %v4480_v0  ;;  %v3765_v43 = vld [vmem:[#allocation3 + $0x40] ss:$16 sps:$4 sm:$0xff]   ;;  %v3767_v45 = vld [vmem:[#allocation3 + $0x64] ss:$16 sps:$4 sm:$0xff]   ;;  %v3772_v48 = vld [vmem:[#allocation3 + $0x68] ss:$16 sps:$4 sm:$0xff]  }
  0x1d   :  { %v3771_v47 = vld [vmem:[#allocation3 + $0x60] ss:$16 sps:$4 sm:$0xff]   ;;  %v3773_v49 = vld [vmem:[#allocation3 + $0x84] ss:$16 sps:$4 sm:$0xff]   ;;  %v3775_v50 = vld [vmem:[#allocation3 + $0x8c] ss:$16 sps:$4 sm:$0xff]  }
  0x1e   :  { %v3777_v51 = vld [vmem:[#allocation3 + $0x80] ss:$16 sps:$4 sm:$0xff]   ;;  %v3778_v52 = vld [vmem:[#allocation3 + $0x88] ss:$16 sps:$4 sm:$0xff]   ;;  %v3779_v53 = vld [vmem:[#allocation3 + $0xa4] ss:$16 sps:$4 sm:$0xff]  }
  0x1f   :  { %1076 = vmatpush1.bf16.msra.mxu0 %v3725_v9  ;;  %1365 = vmatpush1.bf16.msra.mxu1 %v3726_v10  ;;  %v3781_v54 = vld [vmem:[#allocation3 + $0xac] ss:$16 sps:$4 sm:$0xff]   ;;  %v3783_v55 = vld [vmem:[#allocation3 + $0xa0] ss:$16 sps:$4 sm:$0xff]   ;;  %v3784_v56 = vld [vmem:[#allocation3 + $0xa8] ss:$16 sps:$4 sm:$0xff]  }
  0x20   :  { %1077 = vmatprep.subr.bf16.mxu0 %v4480_v0  ;;  %1366 = vmatprep.subr.bf16.mxu1 %v4480_v0  ;;  %v3785_v57 = vld [vmem:[#allocation3 + $0xc4] ss:$16 sps:$4 sm:$0xff]   ;;  %v3787_v58 = vld [vmem:[#allocation3 + $0xcc] ss:$16 sps:$4 sm:$0xff]   ;;  %v3789_v59 = vld [vmem:[#allocation3 + $0xc0] ss:$16 sps:$4 sm:$0xff]  }
  0x21   :  { %v3790_v60 = vld [vmem:[#allocation3 + $0xc8] ss:$16 sps:$4 sm:$0xff]   ;;  %v3791_v61 = vld [vmem:[#allocation3 + $0xe4] ss:$16 sps:$4 sm:$0xff]   ;;  %v3793_v62 = vld [vmem:[#allocation3 + $0xec] ss:$16 sps:$4 sm:$0xff]  }
  0x22   :  { %v3795_v63 = vld [vmem:[#allocation3 + $0xe0] ss:$16 sps:$4 sm:$0xff]   ;;  %v3796_v1 = vld [vmem:[#allocation3 + $0xe8] ss:$16 sps:$4 sm:$0xff]   ;;  %v3797_v2 = vld [vmem:[#allocation3 + $0x104] ss:$16 sps:$4 sm:$0xff]  }
  0x23   :  { %1078 = vmatpush1.bf16.msra.mxu0 %v3727_v11  ;;  %1367 = vmatpush1.bf16.msra.mxu1 %v3728_v12  ;;  %v3799_v3 = vld [vmem:[#allocation3 + $0x10c] ss:$16 sps:$4 sm:$0xff]   ;;  %v3801_v4 = vld [vmem:[#allocation3 + $0x100] ss:$16 sps:$4 sm:$0xff]   ;;  %v3802_v5 = vld [vmem:[#allocation3 + $0x108] ss:$16 sps:$4 sm:$0xff]  }
  0x24   :  { %1079 = vmatprep.subr.bf16.mxu0 %v4480_v0  ;;  %1368 = vmatprep.subr.bf16.mxu1 %v4480_v0  ;;  %v3803_v6 = vld [vmem:[#allocation3 + $0x124] ss:$16 sps:$4 sm:$0xff]   ;;  %v3805_v7 = vld [vmem:[#allocation3 + $0x12c] ss:$16 sps:$4 sm:$0xff]   ;;  %v3807_v8 = vld [vmem:[#allocation3 + $0x120] ss:$16 sps:$4 sm:$0xff]  }
  0x25   :  { %v3808_v9 = vld [vmem:[#allocation3 + $0x128] ss:$16 sps:$4 sm:$0xff]   ;;  %v3809_v10 = vld [vmem:[#allocation3 + $0x144] ss:$16 sps:$4 sm:$0xff]   ;;  %v3811_v11 = vld [vmem:[#allocation3 + $0x14c] ss:$16 sps:$4 sm:$0xff]  }
  0x26   :  { %v3813_v12 = vld [vmem:[#allocation3 + $0x140] ss:$16 sps:$4 sm:$0xff]   ;;  %v3823_v19 = vld [vmem:[#allocation3 + $0x18c] ss:$16 sps:$4 sm:$0xff]   ;;  %v3826_v21 = vld [vmem:[#allocation3 + $0x188] ss:$16 sps:$4 sm:$0xff]  }
  0x27   :  { %1080 = vmatpush1.bf16.msra.mxu0 %v3729_v13  ;;  %1369 = vmatpush1.bf16.msra.mxu1 %v3730_v14  ;;  %v3814_v13 = vld [vmem:[#allocation3 + $0x148] ss:$16 sps:$4 sm:$0xff]   ;;  %v3815_v14 = vld [vmem:[#allocation3 + $0x164] ss:$16 sps:$4 sm:$0xff]  }
  0x28   :  { %1081 = vmatprep.subr.bf16.mxu0 %v4480_v0  ;;  %1370 = vmatprep.subr.bf16.mxu1 %v4480_v0 }
  0x2b   :  { %1082 = vmatpush1.bf16.msra.mxu0 %v3731_v15  ;;  %1371 = vmatpush1.bf16.msra.mxu1 %v3732_v16  ;;  %v3817_v15 = vld [vmem:[#allocation3 + $0x16c] ss:$16 sps:$4 sm:$0xff]   ;;  %v3819_v16 = vld [vmem:[#allocation3 + $0x160] ss:$16 sps:$4 sm:$0xff]  }
  0x2c   :  { %1083 = vmatprep.subr.bf16.mxu0 %v4480_v0  ;;  %1372 = vmatprep.subr.bf16.mxu1 %v4480_v0 }
  0x2f   :  { %1084 = vmatpush2.bf16.msra.mxu0 %v3733_v17  ;;  %1373 = vmatpush2.bf16.msra.mxu1 %v3734_v18  ;;  %v3820_v17 = vld [vmem:[#allocation3 + $0x168] ss:$16 sps:$4 sm:$0xff]   ;;  %v3821_v18 = vld [vmem:[#allocation3 + $0x184] ss:$16 sps:$4 sm:$0xff]  }
  0x30   :  { %1085 = vmatprep.subr.bf16.mxu0 %v4480_v0  ;;  %1374 = vmatprep.subr.bf16.mxu1 %v4480_v0 }
  0x33   :  { %1086 = vmatpush2.bf16.msra.mxu0 %v3735_v20  ;;  %1375 = vmatpush2.bf16.msra.mxu1 %v3736_v22  ;;  %v3825_v20 = vld [vmem:[#allocation3 + $0x180] ss:$16 sps:$4 sm:$0xff]   ;;  %v3827_v22 = vld [vmem:[#allocation3 + $0x1a4] ss:$16 sps:$4 sm:$0xff]  }
  0x34   :  { %1087 = vmatprep.subr.bf16.mxu0 %v4480_v0  ;;  %1376 = vmatprep.subr.bf16.mxu1 %v4480_v0 }
  0x37   :  { %1088 = vmatpush2.bf16.msra.mxu0 %v3737_v23  ;;  %1377 = vmatpush2.bf16.msra.mxu1 %v3738_v24  ;;  %v3829_v23 = vld [vmem:[#allocation3 + $0x1ac] ss:$16 sps:$4 sm:$0xff]   ;;  %v3831_v24 = vld [vmem:[#allocation3 + $0x1a0] ss:$16 sps:$4 sm:$0xff]  }
  0x38   :  { %1089 = vmatprep.subr.bf16.mxu0 %v4480_v0  ;;  %1378 = vmatprep.subr.bf16.mxu1 %v4480_v0 }
  0x3b   :  { %1090 = vmatpush2.bf16.msra.mxu0 %v3739_v25  ;;  %1379 = vmatpush2.bf16.msra.mxu1 %v3740_v26  ;;  %v3832_v25 = vld [vmem:[#allocation3 + $0x1a8] ss:$16 sps:$4 sm:$0xff]   ;;  %v3833_v26 = vld [vmem:[#allocation3 + $0x1c4] ss:$16 sps:$4 sm:$0xff]  }
  0x3c   :  { %1091 = vmatprep.subr.bf16.mxu0 %v4480_v0  ;;  %1380 = vmatprep.subr.bf16.mxu1 %v4480_v0 }
  0x3f   :  { %1092 = vmatpush2.bf16.msra.mxu0 %v3741_v27  ;;  %1381 = vmatpush2.bf16.msra.mxu1 %v3742_v28  ;;  %v3835_v27 = vld [vmem:[#allocation3 + $0x1cc] ss:$16 sps:$4 sm:$0xff]   ;;  %v3837_v28 = vld [vmem:[#allocation3 + $0x1c0] ss:$16 sps:$4 sm:$0xff]  }
  0x40   :  { %1093 = vmatprep.subr.bf16.mxu0 %v4480_v0  ;;  %1382 = vmatprep.subr.bf16.mxu1 %v4480_v0 }
  0x43   :  { %1094 = vmatpush2.bf16.msra.mxu0 %v3743_v29  ;;  %1383 = vmatpush2.bf16.msra.mxu1 %v3744_v30  ;;  %v3838_v29 = vld [vmem:[#allocation3 + $0x1c8] ss:$16 sps:$4 sm:$0xff]   ;;  %v3839_v30 = vld [vmem:[#allocation3 + $0x1e4] ss:$16 sps:$4 sm:$0xff]  }
  0x44   :  { %1095 = vmatprep.subr.bf16.mxu0 %v4480_v0  ;;  %1384 = vmatprep.subr.bf16.mxu1 %v4480_v0 }
  0x47   :  { %1096 = vmatpush2.bf16.msra.mxu0 %v3745_v31  ;;  %1385 = vmatpush2.bf16.msra.mxu1 %v3746_v32  ;;  %v3841_v31 = vld [vmem:[#allocation3 + $0x1ec] ss:$16 sps:$4 sm:$0xff]   ;;  %v3843_v32 = vld [vmem:[#allocation3 + $0x1e0] ss:$16 sps:$4 sm:$0xff]  }
  0x48   :  { %1097 = vmatprep.subr.bf16.mxu0 %v4480_v0  ;;  %1386 = vmatprep.subr.bf16.mxu1 %v4480_v0 }
  0x4b   :  { %1098 = vmatpush2.bf16.msra.mxu0 %v3747_v33  ;;  %1387 = vmatpush2.bf16.msra.mxu1 %v3748_v34  ;;  %v3844_v33 = vld [vmem:[#allocation3 + $0x1e8] ss:$16 sps:$4 sm:$0xff]   ;;  %v3845_v34 = vld [vmem:[#allocation3 + $0x204] ss:$16 sps:$4 sm:$0xff]  }
  0x4c   :  { %2061 = vmatprep.subr.bf16.mxu0 %v4480_v0  ;;  %2350 = vmatprep.subr.bf16.mxu1 %v4480_v0 }
  0x4e   :  { %1100 = vmatmul.mubr.bf16.vlgmr.msra.gmra.mxu0 %v3749_v35  ;;  %1389 = vmatmul.mubr.bf16.vlgmr.msra.gmra.mxu1 %v3752_v36  ;;  %v3847_v35 = vld [vmem:[#allocation3 + $0x20c] ss:$16 sps:$4 sm:$0xff]   ;;  %v3849_v36 = vld [vmem:[#allocation3 + $0x200] ss:$16 sps:$4 sm:$0xff]  }
  0x4f   :  { %1107 = vmatprep.mubr.bf16.mxu0 %v3755_v37  ;;  %1396 = vmatprep.mubr.bf16.mxu1 %v3757_v38  ;;  %v3850_v37 = vld [vmem:[#allocation3 + $0x208] ss:$16 sps:$4 sm:$0xff]   ;;  %v3851_v38 = vld [vmem:[#allocation3 + $0x224] ss:$16 sps:$4 sm:$0xff]  }
  0x56   :  { %1108 = vmatmul.mubr.bf16.gmra.mxu0 %v3759_v39  ;;  %1397 = vmatmul.mubr.bf16.gmra.mxu1 %v3760_v40  ;;  %v3853_v39 = vld [vmem:[#allocation3 + $0x22c] ss:$16 sps:$4 sm:$0xff]   ;;  %v3855_v40 = vld [vmem:[#allocation3 + $0x220] ss:$16 sps:$4 sm:$0xff]  }
  0x57   :  { %1115 = vmatprep.mubr.bf16.mxu0 %v3761_v41  ;;  %1404 = vmatprep.mubr.bf16.mxu1 %v3763_v42  ;;  %v3856_v41 = vld [vmem:[#allocation3 + $0x228] ss:$16 sps:$4 sm:$0xff]   ;;  %v3857_v42 = vld [vmem:[#allocation3 + $0x244] ss:$16 sps:$4 sm:$0xff]  }
  0x5e   :  { %1116 = vmatmul.mubr.bf16.gmra.mxu0 %v3765_v43  ;;  %1405 = vmatmul.mubr.bf16.gmra.mxu1 %v3766_v44  ;;  %v3859_v43 = vld [vmem:[#allocation3 + $0x24c] ss:$16 sps:$4 sm:$0xff]   ;;  %v3861_v44 = vld [vmem:[#allocation3 + $0x240] ss:$16 sps:$4 sm:$0xff]  }
  0x5f   :  { %1123 = vmatprep.mubr.bf16.mxu0 %v3767_v45  ;;  %1412 = vmatprep.mubr.bf16.mxu1 %v3769_v46  ;;  %v3862_v45 = vld [vmem:[#allocation3 + $0x248] ss:$16 sps:$4 sm:$0xff]   ;;  %v3863_v46 = vld [vmem:[#allocation3 + $0x264] ss:$16 sps:$4 sm:$0xff]  }
  0x66   :  { %1124 = vmatmul.mubr.bf16.gmra.mxu0 %v3771_v47  ;;  %1413 = vmatmul.mubr.bf16.gmra.mxu1 %v3772_v48  ;;  %v3865_v47 = vld [vmem:[#allocation3 + $0x26c] ss:$16 sps:$4 sm:$0xff]   ;;  %v3867_v48 = vld [vmem:[#allocation3 + $0x260] ss:$16 sps:$4 sm:$0xff]  }
  0x67   :  { %1131 = vmatprep.mubr.bf16.mxu0 %v3773_v49  ;;  %1420 = vmatprep.mubr.bf16.mxu1 %v3775_v50  ;;  %v3868_v49 = vld [vmem:[#allocation3 + $0x268] ss:$16 sps:$4 sm:$0xff]   ;;  %v3869_v50 = vld [vmem:[#allocation3 + $0x284] ss:$16 sps:$4 sm:$0xff]  }
  0x6e   :  { %1132 = vmatmul.mubr.bf16.gmra.mxu0 %v3777_v51  ;;  %1421 = vmatmul.mubr.bf16.gmra.mxu1 %v3778_v52  ;;  %v3871_v51 = vld [vmem:[#allocation3 + $0x28c] ss:$16 sps:$4 sm:$0xff]   ;;  %v3873_v52 = vld [vmem:[#allocation3 + $0x280] ss:$16 sps:$4 sm:$0xff]  }
  0x6f   :  { %1139 = vmatprep.mubr.bf16.mxu0 %v3779_v53  ;;  %1428 = vmatprep.mubr.bf16.mxu1 %v3781_v54  ;;  %v3874_v53 = vld [vmem:[#allocation3 + $0x288] ss:$16 sps:$4 sm:$0xff]   ;;  %v3875_v54 = vld [vmem:[#allocation3 + $0x2a4] ss:$16 sps:$4 sm:$0xff]  }
  0x76   :  { %1140 = vmatmul.mubr.bf16.gmra.mxu0 %v3783_v55  ;;  %1429 = vmatmul.mubr.bf16.gmra.mxu1 %v3784_v56  ;;  %v3877_v55 = vld [vmem:[#allocation3 + $0x2ac] ss:$16 sps:$4 sm:$0xff]   ;;  %v3879_v56 = vld [vmem:[#allocation3 + $0x2a0] ss:$16 sps:$4 sm:$0xff]  }
  0x77   :  { %1147 = vmatprep.mubr.bf16.mxu0 %v3785_v57  ;;  %1436 = vmatprep.mubr.bf16.mxu1 %v3787_v58  ;;  %v3880_v57 = vld [vmem:[#allocation3 + $0x2a8] ss:$16 sps:$4 sm:$0xff]   ;;  %v3881_v58 = vld [vmem:[#allocation3 + $0x2c4] ss:$16 sps:$4 sm:$0xff]  }
  0x7e   :  { %1148 = vmatmul.mubr.bf16.gmra.mxu0 %v3789_v59  ;;  %1437 = vmatmul.mubr.bf16.gmra.mxu1 %v3790_v60  ;;  %v3883_v59 = vld [vmem:[#allocation3 + $0x2cc] ss:$16 sps:$4 sm:$0xff]   ;;  %v3885_v60 = vld [vmem:[#allocation3 + $0x2c0] ss:$16 sps:$4 sm:$0xff]  }
  0x7f   :  { %1155 = vmatprep.mubr.bf16.mxu0 %v3791_v61  ;;  %1444 = vmatprep.mubr.bf16.mxu1 %v3793_v62  ;;  %v3886_v61 = vld [vmem:[#allocation3 + $0x2c8] ss:$16 sps:$4 sm:$0xff]   ;;  %v3887_v62 = vld [vmem:[#allocation3 + $0x2e4] ss:$16 sps:$4 sm:$0xff]  }
  0x86   :  { %1156 = vmatmul.mubr.bf16.gmra.mxu0 %v3795_v63  ;;  %1445 = vmatmul.mubr.bf16.gmra.mxu1 %v3796_v1  ;;  %v3889_v63 = vld [vmem:[#allocation3 + $0x2ec] ss:$16 sps:$4 sm:$0xff]   ;;  %v3891_v1 = vld [vmem:[#allocation3 + $0x2e0] ss:$16 sps:$4 sm:$0xff]  }
  0x87   :  { %1163 = vmatprep.mubr.bf16.mxu0 %v3797_v2  ;;  %1452 = vmatprep.mubr.bf16.mxu1 %v3799_v3  ;;  %v3892_v2 = vld [vmem:[#allocation3 + $0x2e8] ss:$16 sps:$4 sm:$0xff]   ;;  %v3893_v3 = vld [vmem:[#allocation3 + $0x304] ss:$16 sps:$4 sm:$0xff]  }
  0x8e   :  { %1164 = vmatmul.mubr.bf16.gmra.mxu0 %v3801_v4  ;;  %1453 = vmatmul.mubr.bf16.gmra.mxu1 %v3802_v5  ;;  %v3896_v4 = vld [vmem:[#allocation3 + $0x30c] ss:$16 sps:$4 sm:$0xff]   ;;  %v3895_v5 = vld [vmem:[#allocation3 + $0x300] ss:$16 sps:$4 sm:$0xff]  }
  0x8f   :  { %1171 = vmatprep.mubr.bf16.mxu0 %v3803_v6  ;;  %1460 = vmatprep.mubr.bf16.mxu1 %v3805_v7  ;;  %v3898_v6 = vld [vmem:[#allocation3 + $0x308] ss:$16 sps:$4 sm:$0xff]   ;;  %v3899_v7 = vld [vmem:[#allocation3 + $0x324] ss:$16 sps:$4 sm:$0xff]  }
  0x96   :  { %1172 = vmatmul.mubr.bf16.gmra.mxu0 %v3807_v8  ;;  %1461 = vmatmul.mubr.bf16.gmra.mxu1 %v3808_v9  ;;  %v4647_v8 = vld [vmem:[%s5902_s2] ss:$0 sm:$0xff]  ;;  %v3902_v9 = vld [vmem:[#allocation3 + $0x32c] ss:$16 sps:$4 sm:$0xff]  }
  0x97   :  { %1179 = vmatprep.mubr.bf16.mxu0 %v3809_v10  ;;  %1468 = vmatprep.mubr.bf16.mxu1 %v3811_v11 }
  0x9e   :  { %1180 = vmatmul.mubr.bf16.gmra.mxu0 %v3813_v12  ;;  %1469 = vmatmul.mubr.bf16.gmra.mxu1 %v3814_v13 }
  0x9f   :  { %1187 = vmatprep.mubr.bf16.mxu0 %v3815_v14  ;;  %1476 = vmatprep.mubr.bf16.mxu1 %v3817_v15 }
  0xa6   :  { %1188 = vmatmul.mubr.bf16.gmra.mxu0 %v3819_v16  ;;  %1477 = vmatmul.mubr.bf16.gmra.mxu1 %v3820_v17  ;;  %v3901_v17 = vld [vmem:[#allocation3 + $0x320] ss:$16 sps:$4 sm:$0xff]  }
  0xa7   :  { %1195 = vmatprep.mubr.bf16.mxu0 %v3821_v18  ;;  %1484 = vmatprep.mubr.bf16.mxu1 %v3823_v19 }
  0xae   :  { %1196 = vmatmul.mubr.bf16.gmra.mxu0 %v3825_v20  ;;  %1485 = vmatmul.mubr.bf16.gmra.mxu1 %v3826_v21  ;;  %v3904_v21 = vld [vmem:[#allocation3 + $0x328] ss:$16 sps:$4 sm:$0xff]  }
  0xaf   :  { %1203 = vmatprep.mubr.bf16.mxu0 %v3827_v22  ;;  %1492 = vmatprep.mubr.bf16.mxu1 %v3829_v23  ;;  %v3905_v22 = vld [vmem:[#allocation3 + $0x344] ss:$16 sps:$4 sm:$0xff]  }
  0xb6   :  { %1204 = vmatmul.mubr.bf16.gmra.mxu0 %v3831_v24  ;;  %1493 = vmatmul.mubr.bf16.gmra.mxu1 %v3832_v25  ;;  %v3908_v24 = vld [vmem:[#allocation3 + $0x34c] ss:$16 sps:$4 sm:$0xff]  }
  0xb7   :  { %1211 = vmatprep.mubr.bf16.mxu0 %v3833_v26  ;;  %1500 = vmatprep.mubr.bf16.mxu1 %v3835_v27 }
  0xbe   :  { %1212 = vmatmul.mubr.bf16.gmra.mxu0 %v3837_v28  ;;  %1501 = vmatmul.mubr.bf16.gmra.mxu1 %v3838_v29 }
  0xbf   :  { %1219 = vmatprep.mubr.bf16.mxu0 %v3839_v30  ;;  %1508 = vmatprep.mubr.bf16.mxu1 %v3841_v31 }
  0xc6   :  { %1220 = vmatmul.mubr.bf16.gmra.mxu0 %v3843_v32  ;;  %1509 = vmatmul.mubr.bf16.gmra.mxu1 %v3844_v33 }
  0xc7   :  { %1227 = vmatprep.mubr.bf16.mxu0 %v3845_v34  ;;  %1516 = vmatprep.mubr.bf16.mxu1 %v3847_v35 }
  0xce   :  { %1228 = vmatmul.mubr.bf16.gmra.mxu0 %v3849_v36  ;;  %1517 = vmatmul.mubr.bf16.gmra.mxu1 %v3850_v37  ;;  %v3907_v37 = vld [vmem:[#allocation3 + $0x340] ss:$16 sps:$4 sm:$0xff]  }
  0xcf   :  { %1235 = vmatprep.mubr.bf16.mxu0 %v3851_v38  ;;  %1524 = vmatprep.mubr.bf16.mxu1 %v3853_v39 }
  0xd6   :  { %1236 = vmatmul.mubr.bf16.gmra.mxu0 %v3855_v40  ;;  %1525 = vmatmul.mubr.bf16.gmra.mxu1 %v3856_v41  ;;  %v3910_v41 = vld [vmem:[#allocation3 + $0x348] ss:$16 sps:$4 sm:$0xff]  }
  0xd7   :  { %1243 = vmatprep.mubr.bf16.mxu0 %v3857_v42  ;;  %1532 = vmatprep.mubr.bf16.mxu1 %v3859_v43  ;;  %v3911_v42 = vld [vmem:[#allocation3 + $0x364] ss:$16 sps:$4 sm:$0xff]  }
  0xde   :  { %1244 = vmatmul.mubr.bf16.gmra.mxu0 %v3861_v44  ;;  %1533 = vmatmul.mubr.bf16.gmra.mxu1 %v3862_v45  ;;  %v3914_v44 = vld [vmem:[#allocation3 + $0x36c] ss:$16 sps:$4 sm:$0xff]  }
  0xdf   :  { %1251 = vmatprep.mubr.bf16.mxu0 %v3863_v46  ;;  %1540 = vmatprep.mubr.bf16.mxu1 %v3865_v47 }
  0xe6   :  { %1252 = vmatmul.mubr.bf16.gmra.mxu0 %v3867_v48  ;;  %1541 = vmatmul.mubr.bf16.gmra.mxu1 %v3868_v49 }
  0xe7   :  { %1259 = vmatprep.mubr.bf16.mxu0 %v3869_v50  ;;  %1548 = vmatprep.mubr.bf16.mxu1 %v3871_v51 }
  0xee   :  { %1260 = vmatmul.mubr.bf16.gmra.mxu0 %v3873_v52  ;;  %1549 = vmatmul.mubr.bf16.gmra.mxu1 %v3874_v53 }
  0xef   :  { %1267 = vmatprep.mubr.bf16.mxu0 %v3875_v54  ;;  %1556 = vmatprep.mubr.bf16.mxu1 %v3877_v55 }
  0xf6   :  { %1268 = vmatmul.mubr.bf16.gmra.mxu0 %v3879_v56  ;;  %1557 = vmatmul.mubr.bf16.gmra.mxu1 %v3880_v57  ;;  %v3913_v57 = vld [vmem:[#allocation3 + $0x360] ss:$16 sps:$4 sm:$0xff]  }
  0xf7   :  { %1275 = vmatprep.mubr.bf16.mxu0 %v3881_v58  ;;  %1564 = vmatprep.mubr.bf16.mxu1 %v3883_v59  ;;  %v3916_v59 = vld [vmem:[#allocation3 + $0x368] ss:$16 sps:$4 sm:$0xff]  }
  0xfe   :  { %1276 = vmatmul.mubr.bf16.gmra.mxu0 %v3885_v60  ;;  %1565 = vmatmul.mubr.bf16.gmra.mxu1 %v3886_v61  ;;  %v3919_v60 = vld [vmem:[#allocation3 + $0x384] ss:$16 sps:$4 sm:$0xff]  }
  0xff   :  { %1283 = vmatprep.mubr.bf16.mxu0 %v3887_v62  ;;  %1572 = vmatprep.mubr.bf16.mxu1 %v3889_v63  ;;  %v3922_v63 = vld [vmem:[#allocation3 + $0x38c] ss:$16 sps:$4 sm:$0xff]  }
 0x106   :  { %1284 = vmatmul.mubr.bf16.gmra.mxu0 %v3891_v1  ;;  %1573 = vmatmul.mubr.bf16.gmra.mxu1 %v3892_v2 }
 0x107   :  { %1291 = vmatprep.mubr.bf16.mxu0 %v3893_v3  ;;  %1580 = vmatprep.mubr.bf16.mxu1 %v3896_v4 }
 0x10e   :  { %v1101_v10 = vpop.f32.mrf.mxu0  ;;  %1292 = vmatmul.mubr.bf16.gmra.mxu0 %v3895_v5  ;;  %v1390_v12 = vpop.f32.mrf.mxu1  ;;  %1581 = vmatmul.mubr.bf16.gmra.mxu1 %v3898_v6 }
 0x10f   :  { %v1102_v11 = vadd.f32 %v4647_v8, %v1101_v10  ;;  %1299 = vmatprep.mubr.bf16.mxu0 %v3899_v7  ;;  %1588 = vmatprep.mubr.bf16.mxu1 %v3902_v9 }
 0x110   :  { %v1103_v13 = vpop.f32.mrf.mxu0  ;;  %v1392_v15 = vpop.f32.mrf.mxu1 }
 0x111   :  { %v4650_v14 = vadd.f32 %v1390_v12, %v1102_v11  ;;  %v3917_v11 = vld [vmem:[#allocation3 + $0x380] ss:$16 sps:$4 sm:$0xff]  }
 0x112   :  { %v1104_v16 = vpop.f32.mrf.mxu0  ;;  %v1393_v20 = vpop.f32.mrf.mxu1 }
 0x113   :  { %v1709_v18 = vmin.f32 %v4650_v14, 0.0  ;;  %v1105_v19 = vadd.f32 %v4647_v8, %v1104_v16  ;;  %vm1645_vm0 = vcmp.gt.f32.partialorder %v4650_v14, 0.0  ;;  %v3920_v16 = vld [vmem:[#allocation3 + $0x388] ss:$16 sps:$4 sm:$0xff]  }
 0x114   :  { %v1106_v23 = vpop.f32.mrf.mxu0  ;;  %v1395_v27 = vpop.f32.mrf.mxu1 }
 0x115   :  { %v1773_v25 = vmul.f32 1.442695, %v1709_v18  ;;  %v4654_v26 = vadd.f32 %v1393_v20, %v1105_v19 }
 0x116   :  { %v1109_v28 = vpop.f32.mrf.mxu0  ;;  %1300 = vmatmul.mubr.bf16.gmra.mxu0 %v3901_v17  ;;  %v1398_v31 = vpop.f32.mrf.mxu1  ;;  %1589 = vmatmul.mubr.bf16.gmra.mxu1 %v3904_v21  ;;  %v3925_v17 = vld [vmem:[#allocation3 + $0x3a4] ss:$16 sps:$4 sm:$0xff]   ;;  %v3928_v21 = vld [vmem:[#allocation3 + $0x3ac] ss:$16 sps:$4 sm:$0xff]  }
 0x117   :  { %3941 = vpow2.f32 %v1773_v25  ;;  %v1710_v29 = vmin.f32 %v4654_v26, 0.0  ;;  %v1110_v30 = vadd.f32 %v4647_v8, %v1109_v28  ;;  %1307 = vmatprep.mubr.bf16.mxu0 %v3905_v22  ;;  %1596 = vmatprep.mubr.bf16.mxu1 %v3908_v24  ;;  %vm1646_vm1 = vcmp.gt.f32.partialorder %v4654_v26, 0.0 }
 0x118   :  { %v1111_v32 = vpop.f32.mrf.mxu0  ;;  %v1400_v35 = vpop.f32.mrf.mxu1 }
 0x119   :  { %v1775_v33 = vmul.f32 1.442695, %v1710_v29  ;;  %v4658_v34 = vadd.f32 %v1398_v31, %v1110_v30  ;;  %v3923_v30 = vld [vmem:[#allocation3 + $0x3a0] ss:$16 sps:$4 sm:$0xff]   ;;  %v3926_v35 = vld [vmem:[#allocation3 + $0x3a8] ss:$16 sps:$4 sm:$0xff]  }
 0x11a   :  { %v1112_v36 = vpop.f32.mrf.mxu0  ;;  %v1401_v40 = vpop.f32.mrf.mxu1 }
 0x11b   :  { %3943 = vpow2.f32 %v1775_v33  ;;  %v1711_v38 = vmin.f32 %v4658_v34, 0.0  ;;  %v1113_v39 = vadd.f32 %v4647_v8, %v1112_v36  ;;  %vm1647_vm2 = vcmp.gt.f32.partialorder %v4658_v34, 0.0  ;;  %v3931_v36 = vld [vmem:[#allocation3 + $0x3c4] ss:$16 sps:$4 sm:$0xff]  }
 0x11c   :  { %v1114_v43 = vpop.f32.mrf.mxu0  ;;  %v1403_v47 = vpop.f32.mrf.mxu1 }
 0x11d   :  { %v1777_v45 = vmul.f32 1.442695, %v1711_v38  ;;  %v4662_v46 = vadd.f32 %v1401_v40, %v1113_v39  ;;  %v3934_v39 = vld [vmem:[#allocation3 + $0x3cc] ss:$16 sps:$4 sm:$0xff]   ;;  %v3932_v47 = vld [vmem:[#allocation3 + $0x3c8] ss:$16 sps:$4 sm:$0xff]  }
 0x11e   :  { %v1117_v48 = vpop.f32.mrf.mxu0  ;;  %1308 = vmatmul.mubr.bf16.gmra.mxu0 %v3907_v37  ;;  %v1406_v51 = vpop.f32.mrf.mxu1  ;;  %1597 = vmatmul.mubr.bf16.gmra.mxu1 %v3910_v41 }
 0x11f   :  { %3945 = vpow2.f32 %v1777_v45  ;;  %v1712_v49 = vmin.f32 %v4662_v46, 0.0  ;;  %v1118_v50 = vadd.f32 %v4647_v8, %v1117_v48  ;;  %1315 = vmatprep.mubr.bf16.mxu0 %v3911_v42  ;;  %1604 = vmatprep.mubr.bf16.mxu1 %v3914_v44  ;;  %vm1648_vm3 = vcmp.gt.f32.partialorder %v4662_v46, 0.0  ;;  %v3929_v45 = vld [vmem:[#allocation3 + $0x3c0] ss:$16 sps:$4 sm:$0xff]   ;;  %v3937_v48 = vld [vmem:[#allocation3 + $0x3e4] ss:$16 sps:$4 sm:$0xff]  }
 0x120   :  { %v1119_v52 = vpop.f32.mrf.mxu0  ;;  %v1408_v55 = vpop.f32.mrf.mxu1 }
 0x121   :  { %v1779_v53 = vmul.f32 1.442695, %v1712_v49  ;;  %v4666_v54 = vadd.f32 %v1406_v51, %v1118_v50  ;;  %v3940_v50 = vld [vmem:[#allocation3 + $0x3ec] ss:$16 sps:$4 sm:$0xff]  }
 0x122   :  { %v4668_v56 = vpop.f32.mrf.mxu0  ;;  %v4670_v58 = vpop.f32.mrf.mxu1 }
 0x123   :  { %3947 = vpow2.f32 %v1779_v53 }
 0x124   :  { %v3942_v61 = vpop.eup %3941  ;;  %v1122_v62 = vpop.f32.mrf.mxu0 }
 0x125   :  { %v1411_v1 = vpop.f32.mrf.mxu1  ;;  %v3584_v3 = vadd.f32 -1.0, %v3942_v61  ;;  %v3935_v61 = vld [vmem:[#allocation3 + $0x3e0] ss:$16 sps:$4 sm:$0xff]  }
 0x126   :  { %v4672_v2 = vpop.f32.mrf.mxu0  ;;  %1316 = vmatmul.mubr.bf16.gmra.mxu0 %v3913_v57  ;;  %1605 = vmatmul.mubr.bf16.gmra.mxu1 %v3916_v59 }
 0x127   :  { %v4674_v4 = vpop.f32.mrf.mxu1  ;;  %1323 = vmatprep.mubr.bf16.mxu0 %v3919_v60  ;;  %1612 = vmatprep.mubr.bf16.mxu1 %v3922_v63  ;;  %v4681_v12 = vsel %vm1645_vm0, %v4650_v14, %v3584_v3  ;;  %v3938_v63 = vld [vmem:[#allocation3 + $0x3e8] ss:$16 sps:$4 sm:$0xff]  }
 0x128   :  { %v3944_v5 = vpop.eup %3943  ;;  %v1127_v6 = vpop.f32.mrf.mxu0 }
 0x129   :  { %v3585_v7 = vadd.f32 -1.0, %v3944_v5  ;;  %v1416_v9 = vpop.f32.mrf.mxu1 }
 0x12a   :  { %v4678_v10 = vpop.f32.mrf.mxu0 }
 0x12b   :  { %v4684_v13 = vsel %vm1646_vm1, %v4654_v26, %v3585_v7  ;;  %v4686_v15 = vpop.f32.mrf.mxu1 }
 0x12c   :  { %v3946_v18 = vpop.eup %3945  ;;  %v2029_v19 = vpack.c.bf16 %v4684_v13, %v4681_v12  ;;  %v1130_v20 = vpop.f32.mrf.mxu0 }
 0x12d   :  { %v1419_v22 = vpop.f32.mrf.mxu1  ;;  %v3586_v24 = vadd.f32 -1.0, %v3946_v18  ;;  %v4325_v20 = vld [vmem:[#allocation3 + $0x4] ss:$16 sps:$4 sm:$0xff]  }
 0x12e   :  { %v4690_v23 = vpop.f32.mrf.mxu0  ;;  %1324 = vmatmul.mubr.bf16.gmra.mxu0 %v3917_v11  ;;  %1613 = vmatmul.mubr.bf16.gmra.mxu1 %v3920_v16 }
 0x12f   :  { %v4692_v14 = vpop.f32.mrf.mxu1  ;;  %1331 = vmatprep.mubr.bf16.mxu0 %v3925_v17  ;;  %1620 = vmatprep.mubr.bf16.mxu1 %v3928_v21  ;;  %v4697_v31 = vsel %vm1647_vm2, %v4658_v34, %v3586_v24  ;;  %v4326_v24 = vld [vmem:[#allocation3 + $0xc] ss:$16 sps:$4 sm:$0xff]  }
 0x130   :  { %v3948_v25 = vpop.eup %3947  ;;  %v1135_v26 = vpop.f32.mrf.mxu0 }
 0x131   :  { %v3587_v27 = vadd.f32 -1.0, %v3948_v25  ;;  %v1424_v28 = vpop.f32.mrf.mxu1 }
 0x132   :  { %v1136_v29 = vpop.f32.mrf.mxu0 }
 0x133   :  { %v4700_v32 = vsel %vm1648_vm3, %v4662_v46, %v3587_v27  ;;  %v4702_v33 = vpop.f32.mrf.mxu1  ;;  %v1137_v21 = vadd.f32 %v4647_v8, %v1136_v29  ;;  %vm1649_vm3 = vcmp.gt.f32.partialorder %v4666_v54, 0.0 }
 0x134   :  { %v2030_v37 = vpack.c.bf16 %v4700_v32, %v4697_v31  ;;  %v1138_v38 = vpop.f32.mrf.mxu0 }
 0x135   :  { %v1427_v40 = vpop.f32.mrf.mxu1 }
 0x136   :  { %v1141_v41 = vpop.f32.mrf.mxu0  ;;  %1332 = vmatmul.mubr.bf16.gmra.mxu0 %v3923_v30  ;;  %1621 = vmatmul.mubr.bf16.gmra.mxu1 %v3926_v35  ;;  %v1134_v30 = vadd.f32 %v4647_v8, %v4690_v23 }
 0x137   :  { %v1430_v42 = vpop.f32.mrf.mxu1  ;;  %1339 = vmatprep.mubr.bf16.mxu0 %v3931_v36  ;;  %1628 = vmatprep.mubr.bf16.mxu1 %v3934_v39  ;;  %v1142_v16 = vadd.f32 %v4647_v8, %v1141_v41  ;;  %v1129_v41 = vadd.f32 %v4647_v8, %v4678_v10 }
 0x138   :  { %v1143_v34 = vpop.f32.mrf.mxu0 }
 0x139   :  { %v1432_v43 = vpop.f32.mrf.mxu1  ;;  %v4724_v38 = vadd.f32 %v1430_v42, %v1142_v16  ;;  %v4731_v34 = vadd.f32 %v4702_v33, %v1137_v21 }
 0x13a   :  { %v1144_v44 = vpop.f32.mrf.mxu0 }
 0x13b   :  { %v1433_v46 = vpop.f32.mrf.mxu1  ;;  %v1145_v5 = vadd.f32 %v4647_v8, %v1144_v44  ;;  %v1719_v10 = vmin.f32 %v4724_v38, 0.0  ;;  %vm1655_vm9 = vcmp.gt.f32.partialorder %v4724_v38, 0.0  ;;  %vm1654_vm12 = vcmp.gt.f32.partialorder %v4731_v34, 0.0 }
 0x13c   :  { %v1146_v49 = vpop.f32.mrf.mxu0 }
 0x13d   :  { %v1435_v51 = vpop.f32.mrf.mxu1  ;;  %v4716_v25 = vadd.f32 %v1433_v46, %v1145_v5 }
 0x13e   :  { %v1149_v52 = vpop.f32.mrf.mxu0  ;;  %1340 = vmatmul.mubr.bf16.gmra.mxu0 %v3929_v45  ;;  %1629 = vmatmul.mubr.bf16.gmra.mxu1 %v3932_v47  ;;  %v1126_v47 = vadd.f32 %v4647_v8, %v4672_v2 }
 0x13f   :  { %v1438_v53 = vpop.f32.mrf.mxu1  ;;  %1347 = vmatprep.mubr.bf16.mxu0 %v3937_v48  ;;  %1636 = vmatprep.mubr.bf16.mxu1 %v3940_v50  ;;  %v1150_v59 = vadd.f32 %v4647_v8, %v1149_v52  ;;  %v1720_v44 = vmin.f32 %v4716_v25, 0.0  ;;  %v4739_v48 = vadd.f32 %v4692_v14, %v1134_v30  ;;  %v1121_v52 = vadd.f32 %v4647_v8, %v4668_v56 }
 0x140   :  { %v1151_v55 = vpop.f32.mrf.mxu0  ;;  %v1718_v14 = vmin.f32 %v4731_v34, 0.0  ;;  %vm1656_vm8 = vcmp.gt.f32.partialorder %v4716_v25, 0.0 }
 0x141   :  { %v1440_v57 = vpop.f32.mrf.mxu1  ;;  %v4709_v7 = vadd.f32 %v1438_v53, %v1150_v59  ;;  %v4746_v53 = vadd.f32 %v4686_v15, %v1129_v41  ;;  %v1793_v15 = vmul.f32 1.442695, %v1719_v10  ;;  %v4758_v5 = vadd.f32 %v4670_v58, %v1121_v52 }
 0x142   :  { %v1152_v60 = vpop.f32.mrf.mxu0  ;;  %v1795_v57 = vmul.f32 1.442695, %v1720_v44  ;;  %v1791_v16 = vmul.f32 1.442695, %v1718_v14  ;;  %v1713_v41 = vmin.f32 %v4666_v54, 0.0  ;;  %vm1653_vm13 = vcmp.gt.f32.partialorder %v4739_v48, 0.0 }
 0x143   :  { %v1441_v62 = vpop.f32.mrf.mxu1  ;;  %v1153_v1 = vadd.f32 %v4647_v8, %v1152_v60  ;;  %v1721_v35 = vmin.f32 %v4709_v7, 0.0  ;;  %v1714_v30 = vmin.f32 %v4758_v5, 0.0  ;;  %vm1657_vm7 = vcmp.gt.f32.partialorder %v4709_v7, 0.0 }
 0x144   :  { %v1154_v3 = vpop.f32.mrf.mxu0  ;;  %vm1652_vm14 = vcmp.gt.f32.partialorder %v4746_v53, 0.0  ;;  %vm1650_vm2 = vcmp.gt.f32.partialorder %v4758_v5, 0.0 }
 0x145   :  { %v1443_v6 = vpop.f32.mrf.mxu1  ;;  %v4711_v9 = vadd.f32 %v1441_v62, %v1153_v1  ;;  %v1797_v49 = vmul.f32 1.442695, %v1721_v35  ;;  %v1717_v62 = vmin.f32 %v4739_v48, 0.0 }
 0x146   :  { %v1157_v11 = vpop.f32.mrf.mxu0  ;;  %1348 = vmatmul.mubr.bf16.gmra.mxu0 %v3935_v61  ;;  %1637 = vmatmul.mubr.bf16.gmra.mxu1 %v3938_v63  ;;  %v4751_v61 = vadd.f32 %v4674_v4, %v1126_v47  ;;  %v1716_v4 = vmin.f32 %v4746_v53, 0.0 }
 0x147   :  { %v1158_v17 = vadd.f32 %v4647_v8, %v1157_v11  ;;  %v1446_v18 = vpop.f32.mrf.mxu1  ;;  %2093 = vmatprep.mubr.bf16.mxu0 %v4325_v20  ;;  %2382 = vmatprep.mubr.bf16.mxu1 %v4326_v24  ;;  %v1722_v26 = vmin.f32 %v4711_v9, 0.0  ;;  %v1789_v21 = vmul.f32 1.442695, %v1717_v62  ;;  %vm1658_vm6 = vcmp.gt.f32.partialorder %v4711_v9, 0.0 }
 0x148   :  { %v1159_v22 = vpop.f32.mrf.mxu0  ;;  %v1715_v20 = vmin.f32 %v4751_v61, 0.0  ;;  %vm1651_vm15 = vcmp.gt.f32.partialorder %v4751_v61, 0.0 }
 0x149   :  { %v4719_v27 = vadd.f32 %v1446_v18, %v1158_v17  ;;  %v1448_v28 = vpop.f32.mrf.mxu1  ;;  %v1799_v23 = vmul.f32 1.442695, %v1722_v26 }
 0x14a   :  { %v1160_v36 = vpop.f32.mrf.mxu0 }
 0x14b   :  { %v1723_v29 = vmin.f32 %v4719_v27, 0.0  ;;  %v1161_v39 = vadd.f32 %v4647_v8, %v1160_v36  ;;  %v1449_v40 = vpop.f32.mrf.mxu1  ;;  %v1787_v36 = vmul.f32 1.442695, %v1716_v4  ;;  %vm1659_vm4 = vcmp.gt.f32.partialorder %v4719_v27, 0.0 }
 0x14c   :  { %v1162_v43 = vpop.f32.mrf.mxu0 }
 0x14d   :  { %v1801_v45 = vmul.f32 1.442695, %v1723_v29  ;;  %v4734_v46 = vadd.f32 %v1449_v40, %v1161_v39  ;;  %v1451_v42 = vpop.f32.mrf.mxu1  ;;  %v1785_v43 = vmul.f32 1.442695, %v1715_v20 }
 0x14e   :  { %v1165_v50 = vpop.f32.mrf.mxu0 }
 0x14f   :  { %3949 = vpow2.f32 %v1801_v45  ;;  %v1724_v33 = vmin.f32 %v4734_v46, 0.0  ;;  %v1454_v51 = vpop.f32.mrf.mxu1  ;;  %v1166_v55 = vadd.f32 %v4647_v8, %v1165_v50  ;;  %v1783_v50 = vmul.f32 1.442695, %v1714_v30 }
 0x150   :  { %v1167_v2 = vpop.f32.mrf.mxu0  ;;  %3951 = vpow2.f32 %v1799_v23  ;;  %vm1660_vm5 = vcmp.gt.f32.partialorder %v4734_v46, 0.0 }
 0x151   :  { %v1803_v59 = vmul.f32 1.442695, %v1724_v33  ;;  %v1456_v60 = vpop.f32.mrf.mxu1  ;;  %3953 = vpow2.f32 %v1797_v49  ;;  %v4754_v63 = vadd.f32 %v1454_v51, %v1166_v55  ;;  %v1781_v55 = vmul.f32 1.442695, %v1713_v41 }
 0x152   :  { %v1168_v56 = vpop.f32.mrf.mxu0 }
 0x153   :  { %3955 = vpow2.f32 %v1803_v59  ;;  %v1169_v1 = vadd.f32 %v4647_v8, %v1168_v56  ;;  %v1457_v3 = vpop.f32.mrf.mxu1  ;;  %v1725_v6 = vmin.f32 %v4754_v63, 0.0  ;;  %vm1661_vm10 = vcmp.gt.f32.partialorder %v4754_v63, 0.0 }
 0x154   :  { %v1170_v11 = vpop.f32.mrf.mxu0  ;;  %3957 = vpow2.f32 %v1795_v57 }
 0x155   :  { %v4762_v17 = vadd.f32 %v1457_v3, %v1169_v1  ;;  %v1459_v18 = vpop.f32.mrf.mxu1  ;;  %v1805_v22 = vmul.f32 1.442695, %v1725_v6  ;;  %3959 = vpow2.f32 %v1793_v15 }
 0x156   :  { %v1173_v24 = vpop.f32.mrf.mxu0 }
 0x157   :  { %v1726_v26 = vmin.f32 %v4762_v17, 0.0  ;;  %v1174_v58 = vadd.f32 %v4647_v8, %v1173_v24  ;;  %v1462_v28 = vpop.f32.mrf.mxu1  ;;  %3961 = vpow2.f32 %v1805_v22  ;;  %vm1662_vm11 = vcmp.gt.f32.partialorder %v4762_v17, 0.0 }
 0x158   :  { %v1175_v35 = vpop.f32.mrf.mxu0  ;;  %3963 = vpow2.f32 %v1791_v16 }
 0x159   :  { %v1807_v29 = vmul.f32 1.442695, %v1726_v26  ;;  %v4768_v39 = vadd.f32 %v1462_v28, %v1174_v58  ;;  %v1464_v40 = vpop.f32.mrf.mxu1  ;;  %3965 = vpow2.f32 %v1789_v21 }
 0x15a   :  { %v1176_v44 = vpop.f32.mrf.mxu0 }
 0x15b   :  { %3967 = vpow2.f32 %v1807_v29  ;;  %v1727_v23 = vmin.f32 %v4768_v39, 0.0  ;;  %v1177_v45 = vadd.f32 %v4647_v8, %v1176_v44  ;;  %v1465_v42 = vpop.f32.mrf.mxu1  ;;  %vm1663_vm0 = vcmp.gt.f32.partialorder %v4768_v39, 0.0 }
 0x15c   :  { %v3950_v47 = vpop.eup %3949  ;;  %v1178_v49 = vpop.f32.mrf.mxu0  ;;  %3969 = vpow2.f32 %v1787_v36 }
 0x15d   :  { %v1809_v10 = vmul.f32 1.442695, %v1727_v23  ;;  %v4773_v33 = vadd.f32 %v1465_v42, %v1177_v45  ;;  %v1467_v51 = vpop.f32.mrf.mxu1  ;;  %v3952_v52 = vpop.eup %3951  ;;  %3971 = vpow2.f32 %v1785_v43  ;;  %v3598_v57 = vadd.f32 -1.0, %v3950_v47 }
 0x15e   :  { %v1181_v2 = vpop.f32.mrf.mxu0  ;;  %v3954_v14 = vpop.eup %3953  ;;  %v3597_v1 = vadd.f32 -1.0, %v3952_v52 }
 0x15f   :  { %3973 = vpow2.f32 %v1809_v10  ;;  %v1728_v59 = vmin.f32 %v4773_v33, 0.0  ;;  %v1470_v60 = vpop.f32.mrf.mxu1  ;;  %v1182_v56 = vadd.f32 %v4647_v8, %v1181_v2  ;;  %v3596_v20 = vadd.f32 -1.0, %v3954_v14 }
 0x160   :  { %v3956_v62 = vpop.eup %3955  ;;  %v1183_v15 = vpop.f32.mrf.mxu0  ;;  %3975 = vpow2.f32 %v1783_v50  ;;  %v1979_v21 = vsel %vm1659_vm4, %v4719_v27, %v3598_v57  ;;  %v1978_v36 = vsel %vm1658_vm6, %v4711_v9, %v3597_v1  ;;  %vm1664_vm1 = vcmp.gt.f32.partialorder %v4773_v33, 0.0 }
 0x161   :  { %v3599_v3 = vadd.f32 -1.0, %v3956_v62  ;;  %v1811_v6 = vmul.f32 1.442695, %v1728_v59  ;;  %v1472_v11 = vpop.f32.mrf.mxu1  ;;  %v3958_v4 = vpop.eup %3957  ;;  %3977 = vpow2.f32 %v1781_v55  ;;  %v4779_v16 = vadd.f32 %v1470_v60, %v1182_v56 }
 0x162   :  { %v4781_v18 = vpop.f32.mrf.mxu0  ;;  %v3960_v26 = vpop.eup %3959  ;;  %v3595_v35 = vadd.f32 -1.0, %v3958_v4  ;;  %v1977_v43 = vsel %vm1657_vm7, %v4709_v7, %v3596_v20 }
 0x163   :  { %v1980_v22 = vsel %vm1660_vm5, %v4734_v46, %v3599_v3  ;;  %3979 = vpow2.f32 %v1811_v6  ;;  %v4785_v24 = vpop.f32.mrf.mxu1  ;;  %v3594_v46 = vadd.f32 -1.0, %v3960_v26  ;;  %v2035_v9 = vpack.c.bf16 %v1978_v36, %v1977_v43 }
 0x164   :  { %v2036_v58 = vpack.c.bf16 %v1980_v22, %v1979_v21  ;;  %v1186_v28 = vpop.f32.mrf.mxu0  ;;  %v3962_v30 = vpop.eup %3961  ;;  %v1976_v49 = vsel %vm1656_vm8, %v4716_v25, %v3595_v35 }
 0x165   :  { %v1475_v29 = vpop.f32.mrf.mxu1  ;;  %v3964_v40 = vpop.eup %3963  ;;  %v3600_v44 = vadd.f32 -1.0, %v3962_v30  ;;  %v1975_v2 = vsel %vm1655_vm9, %v4724_v38, %v3594_v46 }
 0x166   :  { %v4790_v41 = vpop.f32.mrf.mxu0  ;;  %2062 = vmatpush1.bf16.msra.mxu0 %v2036_v58  ;;  %v3966_v27 = vpop.eup %3965  ;;  %v3593_v47 = vadd.f32 -1.0, %v3964_v40  ;;  %v2034_v60 = vpack.c.bf16 %v1976_v49, %v1975_v2 }
 0x167   :  { %v4793_v23 = vpop.f32.mrf.mxu1  ;;  %2063 = vmatprep.subr.bf16.mxu0 %v4480_v0  ;;  %v3592_v55 = vadd.f32 -1.0, %v3966_v27  ;;  %v4805_v14 = vsel %vm1661_vm10, %v4754_v63, %v3600_v44 }
 0x168   :  { %v3968_v45 = vpop.eup %3967  ;;  %v1191_v42 = vpop.f32.mrf.mxu0  ;;  %v1974_v38 = vsel %vm1654_vm12, %v4731_v34, %v3593_v47 }
 0x169   :  { %v3601_v50 = vadd.f32 -1.0, %v3968_v45  ;;  %v1480_v10 = vpop.f32.mrf.mxu1  ;;  %v3970_v51 = vpop.eup %3969  ;;  %v1973_v11 = vsel %vm1653_vm13, %v4739_v48, %v3592_v55 }
 0x16a   :  { %v4801_v7 = vpop.f32.mrf.mxu0  ;;  %2064 = vmatpush1.bf16.msra.mxu0 %v2035_v9  ;;  %v3972_v52 = vpop.eup %3971  ;;  %v3591_v15 = vadd.f32 -1.0, %v3970_v51  ;;  %v2033_v34 = vpack.c.bf16 %v1974_v38, %v1973_v11 }
 0x16b   :  { %v4808_v25 = vsel %vm1662_vm11, %v4762_v17, %v3601_v50  ;;  %v4810_v57 = vpop.f32.mrf.mxu1  ;;  %2065 = vmatprep.subr.bf16.mxu0 %v4480_v0  ;;  %v3590_v6 = vadd.f32 -1.0, %v3972_v52 }
 0x16c   :  { %v3974_v59 = vpop.eup %3973  ;;  %v2037_v62 = vpack.c.bf16 %v4808_v25, %v4805_v14  ;;  %v1194_v56 = vpop.f32.mrf.mxu0  ;;  %v1972_v58 = vsel %vm1652_vm14, %v4746_v53, %v3591_v15 }
 0x16d   :  { %v1483_v63 = vpop.f32.mrf.mxu1  ;;  %v3976_v1 = vpop.eup %3975  ;;  %v3602_v4 = vadd.f32 -1.0, %v3974_v59  ;;  %v1971_v36 = vsel %vm1651_vm15, %v4751_v61, %v3590_v6 }
 0x16e   :  { %v4818_v17 = vpop.f32.mrf.mxu0  ;;  %2066 = vmatpush1.bf16.msra.mxu0 %v2034_v60  ;;  %v3978_v3 = vpop.eup %3977  ;;  %v3589_v26 = vadd.f32 -1.0, %v3976_v1  ;;  %v2032_v27 = vpack.c.bf16 %v1972_v58, %v1971_v36 }
 0x16f   :  { %v4821_v20 = vpop.f32.mrf.mxu1  ;;  %2067 = vmatprep.subr.bf16.mxu0 %v4480_v0  ;;  %v3588_v35 = vadd.f32 -1.0, %v3978_v3  ;;  %v4831_v29 = vsel %vm1663_vm0, %v4768_v39, %v3602_v4 }
 0x170   :  { %v3980_v21 = vpop.eup %3979  ;;  %v1199_v22 = vpop.f32.mrf.mxu0  ;;  %v1970_v44 = vsel %vm1650_vm2, %v4758_v5, %v3589_v26 }
 0x171   :  { %v3603_v28 = vadd.f32 -1.0, %v3980_v21  ;;  %v1488_v30 = vpop.f32.mrf.mxu1  ;;  %v1969_v39 = vsel %vm1649_vm3, %v4666_v54, %v3588_v35  ;;  %v1198_v21 = vadd.f32 %v4647_v8, %v4818_v17  ;;  %v1185_v17 = vadd.f32 %v4647_v8, %v4781_v18 }
 0x172   :  { %v1200_v48 = vpop.f32.mrf.mxu0  ;;  %2068 = vmatpush1.bf16.msra.mxu0 %v2033_v34  ;;  %v2031_v9 = vpack.c.bf16 %v1970_v44, %v1969_v39  ;;  %vm1665_vm3 = vcmp.gt.f32.partialorder %v4779_v16, 0.0 }
 0x173   :  { %v4834_v40 = vsel %vm1664_vm1, %v4773_v33, %v3603_v28  ;;  %v1489_v53 = vpop.f32.mrf.mxu1  ;;  %2069 = vmatprep.subr.bf16.mxu0 %v4480_v0  ;;  %v1201_v12 = vadd.f32 %v4647_v8, %v1200_v48  ;;  %v1193_v48 = vadd.f32 %v4647_v8, %v4801_v7  ;;  %v4885_v39 = vadd.f32 %v4821_v20, %v1198_v21 }
 0x174   :  { %v2038_v46 = vpack.c.bf16 %v4834_v40, %v4831_v29  ;;  %v1202_v43 = vpop.f32.mrf.mxu0 }
 0x175   :  { %v1491_v45 = vpop.f32.mrf.mxu1  ;;  %v4876_v35 = vadd.f32 %v1489_v53, %v1201_v12  ;;  %vm1669_vm13 = vcmp.gt.f32.partialorder %v4885_v39, 0.0 }
 0x176   :  { %v1205_v61 = vpop.f32.mrf.mxu0  ;;  %2070 = vmatpush1.bf16.msra.mxu0 %v2032_v27 }
 0x177   :  { %v1494_v33 = vpop.f32.mrf.mxu1  ;;  %2071 = vmatprep.subr.bf16.mxu0 %v4480_v0  ;;  %v1206_v38 = vadd.f32 %v4647_v8, %v1205_v61  ;;  %vm1670_vm12 = vcmp.gt.f32.partialorder %v4876_v35, 0.0 }
 0x178   :  { %v1207_v42 = vpop.f32.mrf.mxu0 }
 0x179   :  { %v1496_v47 = vpop.f32.mrf.mxu1  ;;  %v4868_v34 = vadd.f32 %v1494_v33, %v1206_v38  ;;  %v1190_v42 = vadd.f32 %v4647_v8, %v4790_v41  ;;  %v4899_v41 = vadd.f32 %v4785_v24, %v1185_v17 }
 0x17a   :  { %v1208_v49 = vpop.f32.mrf.mxu0  ;;  %2072 = vmatpush1.bf16.msra.mxu0 %v2031_v9 }
 0x17b   :  { %v1497_v50 = vpop.f32.mrf.mxu1  ;;  %2073 = vmatprep.subr.bf16.mxu0 %v4480_v0  ;;  %v1209_v31 = vadd.f32 %v4647_v8, %v1208_v49  ;;  %v1735_v33 = vmin.f32 %v4868_v34, 0.0  ;;  %v1730_v12 = vmin.f32 %v4899_v41, 0.0  ;;  %vm1671_vm9 = vcmp.gt.f32.partialorder %v4868_v34, 0.0 }
 0x17c   :  { %v1210_v10 = vpop.f32.mrf.mxu0  ;;  %vm1666_vm2 = vcmp.gt.f32.partialorder %v4899_v41, 0.0 }
 0x17d   :  { %v1499_v5 = vpop.f32.mrf.mxu1  ;;  %v4863_v6 = vadd.f32 %v1497_v50, %v1209_v31  ;;  %v4893_v50 = vadd.f32 %v4810_v57, %v1193_v48  ;;  %v1734_v10 = vmin.f32 %v4876_v35, 0.0  ;;  %v4903_v57 = vadd.f32 %v4793_v23, %v1190_v42 }
 0x17e   :  { %v1213_v51 = vpop.f32.mrf.mxu0  ;;  %2074 = vmatpush1.bf16.msra.mxu0 %v2030_v37  ;;  %v1729_v48 = vmin.f32 %v4779_v16, 0.0 }
 0x17f   :  { %v1502_v52 = vpop.f32.mrf.mxu1  ;;  %2075 = vmatprep.subr.bf16.mxu0 %v4480_v0  ;;  %v1214_v2 = vadd.f32 %v4647_v8, %v1213_v51  ;;  %v1736_v43 = vmin.f32 %v4863_v6, 0.0  ;;  %v1732_v31 = vmin.f32 %v4893_v50, 0.0  ;;  %v1823_v38 = vmul.f32 1.442695, %v1734_v10 }
 0x180   :  { %v1215_v54 = vpop.f32.mrf.mxu0  ;;  %vm1672_vm8 = vcmp.gt.f32.partialorder %v4863_v6, 0.0  ;;  %vm1668_vm14 = vcmp.gt.f32.partialorder %v4893_v50, 0.0  ;;  %vm1667_vm15 = vcmp.gt.f32.partialorder %v4903_v57, 0.0 }
 0x181   :  { %v1504_v55 = vpop.f32.mrf.mxu1  ;;  %v4859_v63 = vadd.f32 %v1502_v52, %v1214_v2  ;;  %v1827_v5 = vmul.f32 1.442695, %v1736_v43  ;;  %v1825_v2 = vmul.f32 1.442695, %v1735_v33 }
 0x182   :  { %v1216_v59 = vpop.f32.mrf.mxu0  ;;  %2076 = vmatpush1.bf16.msra.mxu0 %v2029_v19  ;;  %v1733_v55 = vmin.f32 %v4885_v39, 0.0 }
 0x183   :  { %v1217_v60 = vadd.f32 %v4647_v8, %v1216_v59  ;;  %v1505_v56 = vpop.f32.mrf.mxu1  ;;  %2077 = vmatprep.subr.bf16.mxu0 %v4480_v0  ;;  %v1737_v22 = vmin.f32 %v4859_v63, 0.0  ;;  %vm1673_vm7 = vcmp.gt.f32.partialorder %v4859_v63, 0.0 }
 0x184   :  { %v1218_v15 = vpop.f32.mrf.mxu0 }
 0x185   :  { %v4856_v32 = vadd.f32 %v1505_v56, %v1217_v60  ;;  %v1507_v37 = vpop.f32.mrf.mxu1  ;;  %v1829_v7 = vmul.f32 1.442695, %v1737_v22 }
 0x186   :  { %v1221_v1 = vpop.f32.mrf.mxu0 }
 0x187   :  { %v1510_v3 = vpop.f32.mrf.mxu1  ;;  %v1222_v13 = vadd.f32 %v4647_v8, %v1221_v1  ;;  %v1738_v11 = vmin.f32 %v4856_v32, 0.0  ;;  %vm1674_vm6 = vcmp.gt.f32.partialorder %v4856_v32, 0.0 }
 0x188   :  { %v1223_v19 = vpop.f32.mrf.mxu0 }
 0x189   :  { %v1512_v4 = vpop.f32.mrf.mxu1  ;;  %v4871_v26 = vadd.f32 %v1510_v3, %v1222_v13  ;;  %v1831_v44 = vmul.f32 1.442695, %v1738_v11  ;;  %v1821_v13 = vmul.f32 1.442695, %v1733_v55  ;;  %v1731_v19 = vmin.f32 %v4903_v57, 0.0 }
 0x18a   :  { %v1224_v58 = vpop.f32.mrf.mxu0 }
 0x18b   :  { %v1225_v28 = vadd.f32 %v4647_v8, %v1224_v58  ;;  %v1513_v30 = vpop.f32.mrf.mxu1  ;;  %v1739_v36 = vmin.f32 %v4871_v26, 0.0  ;;  %v1819_v58 = vmul.f32 1.442695, %v1732_v31  ;;  %v1817_v43 = vmul.f32 1.442695, %v1731_v19 }
 0x18c   :  { %v1226_v27 = vpop.f32.mrf.mxu0  ;;  %vm1675_vm4 = vcmp.gt.f32.partialorder %v4871_v26, 0.0 }
 0x18d   :  { %v4882_v45 = vadd.f32 %v1513_v30, %v1225_v28  ;;  %v1515_v61 = vpop.f32.mrf.mxu1  ;;  %v1833_v53 = vmul.f32 1.442695, %v1739_v36  ;;  %v1815_v36 = vmul.f32 1.442695, %v1730_v12 }
 0x18e   :  { %v1229_v9 = vpop.f32.mrf.mxu0 }
 0x18f   :  { %v1740_v47 = vmin.f32 %v4882_v45, 0.0  ;;  %v1230_v18 = vadd.f32 %v4647_v8, %v1229_v9  ;;  %v1518_v49 = vpop.f32.mrf.mxu1  ;;  %3981 = vpow2.f32 %v1833_v53  ;;  %vm1676_vm5 = vcmp.gt.f32.partialorder %v4882_v45, 0.0 }
 0x190   :  { %v1231_v20 = vpop.f32.mrf.mxu0  ;;  %3983 = vpow2.f32 %v1831_v44 }
 0x191   :  { %v1835_v51 = vmul.f32 1.442695, %v1740_v47  ;;  %v4896_v52 = vadd.f32 %v1518_v49, %v1230_v18  ;;  %v1520_v54 = vpop.f32.mrf.mxu1  ;;  %3985 = vpow2.f32 %v1829_v7  ;;  %v1813_v18 = vmul.f32 1.442695, %v1729_v48 }
 0x192   :  { %v1232_v59 = vpop.f32.mrf.mxu0 }
 0x193   :  { %3987 = vpow2.f32 %v1835_v51  ;;  %v1741_v60 = vmin.f32 %v4896_v52, 0.0  ;;  %v1233_v56 = vadd.f32 %v4647_v8, %v1232_v59  ;;  %v1521_v15 = vpop.f32.mrf.mxu1  ;;  %vm1677_vm10 = vcmp.gt.f32.partialorder %v4896_v52, 0.0 }
 0x194   :  { %v1234_v37 = vpop.f32.mrf.mxu0  ;;  %3989 = vpow2.f32 %v1827_v5 }
 0x195   :  { %v1837_v24 = vmul.f32 1.442695, %v1741_v60  ;;  %v4908_v1 = vadd.f32 %v1521_v15, %v1233_v56  ;;  %v1523_v3 = vpop.f32.mrf.mxu1  ;;  %3991 = vpow2.f32 %v1825_v2 }
 0x196   :  { %v1237_v23 = vpop.f32.mrf.mxu0 }
 0x197   :  { %3993 = vpow2.f32 %v1837_v24  ;;  %v1742_v11 = vmin.f32 %v4908_v1, 0.0  ;;  %v1526_v4 = vpop.f32.mrf.mxu1  ;;  %v1238_v21 = vadd.f32 %v4647_v8, %v1237_v23  ;;  %vm1678_vm11 = vcmp.gt.f32.partialorder %v4908_v1, 0.0 }
 0x198   :  { %v1239_v22 = vpop.f32.mrf.mxu0  ;;  %3995 = vpow2.f32 %v1823_v38 }
 0x199   :  { %v1839_v28 = vmul.f32 1.442695, %v1742_v11  ;;  %v1528_v30 = vpop.f32.mrf.mxu1  ;;  %3997 = vpow2.f32 %v1821_v13  ;;  %v4915_v27 = vadd.f32 %v1526_v4, %v1238_v21 }
 0x19a   :  { %v1240_v17 = vpop.f32.mrf.mxu0 }
 0x19b   :  { %3999 = vpow2.f32 %v1839_v28  ;;  %v1241_v44 = vadd.f32 %v4647_v8, %v1240_v17  ;;  %v1529_v61 = vpop.f32.mrf.mxu1  ;;  %v1743_v33 = vmin.f32 %v4915_v27, 0.0  ;;  %vm1679_vm0 = vcmp.gt.f32.partialorder %v4915_v27, 0.0 }
 0x19c   :  { %v1242_v7 = vpop.f32.mrf.mxu0  ;;  %v3982_v53 = vpop.eup %3981  ;;  %4001 = vpow2.f32 %v1819_v58 }
 0x19d   :  { %v4919_v9 = vadd.f32 %v1529_v61, %v1241_v44  ;;  %v1531_v42 = vpop.f32.mrf.mxu1  ;;  %v3984_v47 = vpop.eup %3983  ;;  %4003 = vpow2.f32 %v1815_v36  ;;  %v1841_v49 = vmul.f32 1.442695, %v1743_v33  ;;  %v3614_v5 = vadd.f32 -1.0, %v3982_v53 }
 0x19e   :  { %v1245_v10 = vpop.f32.mrf.mxu0  ;;  %v3986_v20 = vpop.eup %3985  ;;  %4005 = vpow2.f32 %v1817_v43  ;;  %v3613_v60 = vadd.f32 -1.0, %v3984_v47 }
 0x19f   :  { %v1744_v51 = vmin.f32 %v4919_v9, 0.0  ;;  %v1246_v54 = vadd.f32 %v4647_v8, %v1245_v10  ;;  %v1534_v55 = vpop.f32.mrf.mxu1  ;;  %4007 = vpow2.f32 %v1841_v49  ;;  %v3612_v8 = vadd.f32 -1.0, %v3986_v20 }
 0x1a0   :  { %v3988_v2 = vpop.eup %3987  ;;  %v1247_v59 = vpop.f32.mrf.mxu0  ;;  %4009 = vpow2.f32 %v1813_v18  ;;  %v1995_v12 = vsel %vm1675_vm4, %v4871_v26, %v3614_v5  ;;  %v1994_v22 = vsel %vm1674_vm6, %v4856_v32, %v3613_v60  ;;  %vm1680_vm1 = vcmp.gt.f32.partialorder %v4919_v9, 0.0 }
 0x1a1   :  { %v3615_v56 = vadd.f32 -1.0, %v3988_v2  ;;  %v1843_v15 = vmul.f32 1.442695, %v1744_v51  ;;  %v4923_v31 = vadd.f32 %v1534_v55, %v1246_v54  ;;  %v1536_v37 = vpop.f32.mrf.mxu1  ;;  %v3990_v38 = vpop.eup %3989  ;;  %v1993_v48 = vsel %vm1673_vm7, %v4859_v63, %v3612_v8 }
 0x1a2   :  { %v4927_v24 = vpop.f32.mrf.mxu0  ;;  %v3992_v3 = vpop.eup %3991  ;;  %v3611_v21 = vadd.f32 -1.0, %v3990_v38  ;;  %v2043_v32 = vpack.c.bf16 %v1994_v22, %v1993_v48 }
 0x1a3   :  { %v1996_v13 = vsel %vm1676_vm5, %v4882_v45, %v3615_v56  ;;  %4011 = vpow2.f32 %v1843_v15  ;;  %v4931_v23 = vpop.f32.mrf.mxu1  ;;  %v3610_v45 = vadd.f32 -1.0, %v3992_v3 }
 0x1a4   :  { %v3994_v19 = vpop.eup %3993  ;;  %v2044_v11 = vpack.c.bf16 %v1996_v13, %v1995_v12  ;;  %v1250_v4 = vpop.f32.mrf.mxu0  ;;  %v1992_v33 = vsel %vm1672_vm8, %v4863_v6, %v3611_v21 }
 0x1a5   :  { %v1539_v58 = vpop.f32.mrf.mxu1  ;;  %v3996_v28 = vpop.eup %3995  ;;  %v3616_v36 = vadd.f32 -1.0, %v3994_v19  ;;  %v1991_v49 = vsel %vm1671_vm9, %v4868_v34, %v3610_v45 }
 0x1a6   :  { %v4936_v30 = vpop.f32.mrf.mxu0  ;;  %2078 = vmatpush2.bf16.msra.mxu0 %v2044_v11  ;;  %v3998_v26 = vpop.eup %3997  ;;  %v3609_v61 = vadd.f32 -1.0, %v3996_v28  ;;  %v2042_v51 = vpack.c.bf16 %v1992_v33, %v1991_v49 }
 0x1a7   :  { %v4939_v17 = vpop.f32.mrf.mxu1  ;;  %2079 = vmatprep.subr.bf16.mxu0 %v4480_v0  ;;  %v3608_v18 = vadd.f32 -1.0, %v3998_v26  ;;  %v4951_v10 = vsel %vm1677_vm10, %v4896_v52, %v3616_v36 }
 0x1a8   :  { %v4000_v43 = vpop.eup %3999  ;;  %v1255_v44 = vpop.f32.mrf.mxu0  ;;  %v1990_v52 = vsel %vm1670_vm12, %v4876_v35, %v3609_v61 }
 0x1a9   :  { %v3617_v7 = vadd.f32 -1.0, %v4000_v43  ;;  %v1544_v53 = vpop.f32.mrf.mxu1  ;;  %v4002_v42 = vpop.eup %4001  ;;  %v1989_v15 = vsel %vm1669_vm13, %v4885_v39, %v3608_v18  ;;  %v4998_v18 = vld [vmem:[%s5902_s2] ss:$0 sm:$0xff] }
 0x1aa   :  { %v4947_v63 = vpop.f32.mrf.mxu0  ;;  %2080 = vmatpush2.bf16.msra.mxu0 %v2043_v32  ;;  %v4004_v47 = vpop.eup %4003  ;;  %v3607_v34 = vadd.f32 -1.0, %v4002_v42  ;;  %v2041_v8 = vpack.c.bf16 %v1990_v52, %v1989_v15 }
 0x1ab   :  { %v4954_v6 = vsel %vm1678_vm11, %v4908_v1, %v3617_v7  ;;  %v4956_v20 = vpop.f32.mrf.mxu1  ;;  %2081 = vmatprep.subr.bf16.mxu0 %v4480_v0  ;;  %v4006_v5 = vpop.eup %4005  ;;  %v3605_v12 = vadd.f32 -1.0, %v4004_v47 }
 0x1ac   :  { %v2045_v54 = vpack.c.bf16 %v4954_v6, %v4951_v10  ;;  %v1258_v55 = vpop.f32.mrf.mxu0  ;;  %v4008_v2 = vpop.eup %4007  ;;  %v3606_v56 = vadd.f32 -1.0, %v4006_v5  ;;  %v1988_v13 = vsel %vm1668_vm14, %v4893_v50, %v3607_v34  ;;  %v4328_v34 = vld [vmem:[#allocation3] ss:$16 sps:$4 sm:$0xff]  }
 0x1ad   :  { %v1547_v59 = vpop.f32.mrf.mxu1  ;;  %v4010_v60 = vpop.eup %4009  ;;  %v3618_v37 = vadd.f32 -1.0, %v4008_v2  ;;  %v1986_v48 = vsel %vm1666_vm2, %v4899_v41, %v3605_v12 }
 0x1ae   :  { %v4964_v1 = vpop.f32.mrf.mxu0  ;;  %2082 = vmatpush2.bf16.msra.mxu0 %v2042_v51  ;;  %v3604_v4 = vadd.f32 -1.0, %v4010_v60  ;;  %v1987_v21 = vsel %vm1667_vm15, %v4903_v57, %v3606_v56  ;;  %v4329_v60 = vld [vmem:[#allocation3 + $0x24] ss:$16 sps:$4 sm:$0xff]  }
 0x1af   :  { %v4967_v38 = vpop.f32.mrf.mxu1  ;;  %2083 = vmatprep.subr.bf16.mxu0 %v4480_v0  ;;  %v4977_v22 = vsel %vm1679_vm0, %v4915_v27, %v3618_v37  ;;  %v2040_v28 = vpack.c.bf16 %v1988_v13, %v1987_v21  ;;  %v1262_v12 = vadd.f32 %v4998_v18, %v4964_v1 }
 0x1b0   :  { %v4012_v3 = vpop.eup %4011  ;;  %v1263_v35 = vpop.f32.mrf.mxu0  ;;  %v1985_v27 = vsel %vm1665_vm3, %v4779_v16, %v3604_v4  ;;  %vm1681_vm3 = vcmp.gt.f32.partialorder %v4923_v31, 0.0 }
 0x1b1   :  { %v3619_v19 = vadd.f32 -1.0, %v4012_v3  ;;  %v1552_v11 = vpop.f32.mrf.mxu1  ;;  %v2039_v43 = vpack.c.bf16 %v1986_v48, %v1985_v27 }
 0x1b2   :  { %v1264_v39 = vpop.f32.mrf.mxu0  ;;  %2084 = vmatpush2.bf16.msra.mxu0 %v2041_v8 }
 0x1b3   :  { %v4980_v58 = vsel %vm1680_vm1, %v4919_v9, %v3619_v19  ;;  %v1553_v50 = vpop.f32.mrf.mxu1  ;;  %2085 = vmatprep.subr.bf16.mxu0 %v4480_v0 }
 0x1b4   :  { %v2046_v26 = vpack.c.bf16 %v4980_v58, %v4977_v22  ;;  %v1266_v45 = vpop.f32.mrf.mxu0 }
 0x1b5   :  { %v1555_v36 = vpop.f32.mrf.mxu1 }
 0x1b6   :  { %v1269_v57 = vpop.f32.mrf.mxu0  ;;  %2086 = vmatpush2.bf16.msra.mxu0 %v2040_v28  ;;  %v1257_v28 = vadd.f32 %v4998_v18, %v4947_v63  ;;  %v1254_v63 = vadd.f32 %v4998_v18, %v4936_v30 }
 0x1b7   :  { %v1558_v9 = vpop.f32.mrf.mxu1  ;;  %2087 = vmatprep.subr.bf16.mxu0 %v4480_v0  ;;  %v1270_v56 = vadd.f32 %v4998_v18, %v1269_v57 }
 0x1b8   :  { %v1271_v32 = vpop.f32.mrf.mxu0 }
 0x1b9   :  { %v1560_v44 = vpop.f32.mrf.mxu1  ;;  %v5021_v11 = vadd.f32 %v1558_v9, %v1270_v56  ;;  %v4330_v9 = vld [vmem:[#allocation3 + $0x20] ss:$16 sps:$4 sm:$0xff]   ;;  %v5033_v32 = vadd.f32 %v4967_v38, %v1262_v12  ;;  %v4333_v12 = vld [vmem:[#allocation3 + $0x64] ss:$16 sps:$4 sm:$0xff]  }
 0x1ba   :  { %v1272_v61 = vpop.f32.mrf.mxu0  ;;  %2088 = vmatpush2.bf16.msra.mxu0 %v2039_v43 }
 0x1bb   :  { %v1561_v33 = vpop.f32.mrf.mxu1  ;;  %2089 = vmatprep.subr.bf16.mxu0 %v4480_v0  ;;  %v1273_v51 = vadd.f32 %v4998_v18, %v1272_v61  ;;  %vm1687_vm9 = vcmp.gt.f32.partialorder %v5021_v11, 0.0  ;;  %vm1685_vm13 = vcmp.gt.f32.partialorder %v5033_v32, 0.0 }
 0x1bc   :  { %v1274_v7 = vpop.f32.mrf.mxu0 }
 0x1bd   :  { %v1563_v41 = vpop.f32.mrf.mxu1  ;;  %v5013_v37 = vadd.f32 %v1561_v33, %v1273_v51  ;;  %v4331_v33 = vld [vmem:[#allocation3 + $0x44] ss:$16 sps:$4 sm:$0xff]  }
 0x1be   :  { %v1277_v53 = vpop.f32.mrf.mxu0  ;;  %2090 = vmatpush2.bf16.msra.mxu0 %v2038_v46 }
 0x1bf   :  { %v1566_v42 = vpop.f32.mrf.mxu1  ;;  %2091 = vmatprep.subr.bf16.mxu0 %v4480_v0  ;;  %v1278_v49 = vadd.f32 %v4998_v18, %v1277_v53  ;;  %v1752_v36 = vmin.f32 %v5013_v37, 0.0  ;;  %v1249_v53 = vadd.f32 %v4998_v18, %v4927_v24  ;;  %v5050_v24 = vadd.f32 %v4939_v17, %v1254_v63  ;;  %v4332_v17 = vld [vmem:[#allocation3 + $0x40] ss:$16 sps:$4 sm:$0xff]  }
 0x1c0   :  { %v1279_v16 = vpop.f32.mrf.mxu0  ;;  %vm1688_vm8 = vcmp.gt.f32.partialorder %v5013_v37, 0.0 }
 0x1c1   :  { %v1568_v47 = vpop.f32.mrf.mxu1  ;;  %v5008_v52 = vadd.f32 %v1566_v42, %v1278_v49  ;;  %v5042_v42 = vadd.f32 %v4956_v20, %v1257_v28  ;;  %v1859_v49 = vmul.f32 1.442695, %v1752_v36  ;;  %vm1683_vm15 = vcmp.gt.f32.partialorder %v5050_v24, 0.0 }
 0x1c2   :  { %v1280_v5 = vpop.f32.mrf.mxu0  ;;  %2092 = vmatpush2.bf16.msra.mxu0 %v2037_v62  ;;  %v1265_v62 = vadd.f32 %v4998_v18, %v1264_v39 }
 0x1c3   :  { %v1281_v29 = vadd.f32 %v4998_v18, %v1280_v5  ;;  %v1569_v40 = vpop.f32.mrf.mxu1  ;;  %v1753_v13 = vmin.f32 %v5008_v52, 0.0  ;;  %v1748_v56 = vmin.f32 %v5042_v42, 0.0  ;;  %vm1689_vm7 = vcmp.gt.f32.partialorder %v5008_v52, 0.0 }
 0x1c4   :  { %v1282_v46 = vpop.f32.mrf.mxu0  ;;  %v5027_v45 = vadd.f32 %v1553_v50, %v1265_v62  ;;  %v1751_v50 = vmin.f32 %v5021_v11, 0.0  ;;  %vm1684_vm14 = vcmp.gt.f32.partialorder %v5042_v42, 0.0 }
 0x1c5   :  { %v5006_v55 = vadd.f32 %v1569_v40, %v1281_v29  ;;  %v1571_v2 = vpop.f32.mrf.mxu1  ;;  %2094 = vmatmul.mubr.bf16.vlgmr.msra.gmra.mxu0 %v4328_v34  ;;  %v1861_v44 = vmul.f32 1.442695, %v1753_v13  ;;  %v1749_v29 = vmin.f32 %v5033_v32, 0.0  ;;  %v5054_v34 = vadd.f32 %v4931_v23, %v1249_v53 }
 0x1c6   :  { %v1285_v59 = vpop.f32.mrf.mxu0  ;;  %2101 = vmatprep.mubr.bf16.mxu0 %v4329_v60  ;;  %v1750_v47 = vmin.f32 %v5027_v45, 0.0  ;;  %v1857_v20 = vmul.f32 1.442695, %v1751_v50  ;;  %v1747_v23 = vmin.f32 %v5050_v24, 0.0  ;;  %v1851_v28 = vmul.f32 1.442695, %v1748_v56 }
 0x1c7   :  { %v1286_v14 = vadd.f32 %v4998_v18, %v1285_v59  ;;  %v1574_v25 = vpop.f32.mrf.mxu1  ;;  %v1754_v3 = vmin.f32 %v5006_v55, 0.0  ;;  %vm1690_vm6 = vcmp.gt.f32.partialorder %v5006_v55, 0.0  ;;  %vm1686_vm12 = vcmp.gt.f32.partialorder %v5027_v45, 0.0 }
 0x1c8   :  { %v1287_v15 = vpop.f32.mrf.mxu0  ;;  %vm1682_vm2 = vcmp.gt.f32.partialorder %v5054_v34, 0.0 }
 0x1c9   :  { %v5016_v8 = vadd.f32 %v1574_v25, %v1286_v14  ;;  %v1576_v35 = vpop.f32.mrf.mxu1  ;;  %v1863_v57 = vmul.f32 1.442695, %v1754_v3  ;;  %v1855_v14 = vmul.f32 1.442695, %v1750_v47  ;;  %v1853_v15 = vmul.f32 1.442695, %v1749_v29 }
 0x1ca   :  { %v1288_v19 = vpop.f32.mrf.mxu0 }
 0x1cb   :  { %v1755_v4 = vmin.f32 %v5016_v8, 0.0  ;;  %v1289_v39 = vadd.f32 %v4998_v18, %v1288_v19  ;;  %v1577_v21 = vpop.f32.mrf.mxu1  ;;  %vm1691_vm4 = vcmp.gt.f32.partialorder %v5016_v8, 0.0 }
 0x1cc   :  { %v1290_v48 = vpop.f32.mrf.mxu0 }
 0x1cd   :  { %v1865_v1 = vmul.f32 1.442695, %v1755_v4  ;;  %v5030_v27 = vadd.f32 %v1577_v21, %v1289_v39  ;;  %v1579_v43 = vpop.f32.mrf.mxu1  ;;  %2102 = vmatmul.mubr.bf16.gmra.mxu0 %v4330_v9  ;;  %v1746_v39 = vmin.f32 %v5054_v34, 0.0  ;;  %v1849_v9 = vmul.f32 1.442695, %v1747_v23 }
 0x1ce   :  { %v1293_v61 = vpop.f32.mrf.mxu0  ;;  %2109 = vmatprep.mubr.bf16.mxu0 %v4331_v33  ;;  %v1745_v43 = vmin.f32 %v4923_v31, 0.0 }
 0x1cf   :  { %4013 = vpow2.f32 %v1865_v1  ;;  %v1756_v7 = vmin.f32 %v5030_v27, 0.0  ;;  %v1582_v41 = vpop.f32.mrf.mxu1  ;;  %v1294_v38 = vadd.f32 %v4998_v18, %v1293_v61  ;;  %vm1692_vm5 = vcmp.gt.f32.partialorder %v5030_v27, 0.0 }
 0x1d0   :  { %v1295_v16 = vpop.f32.mrf.mxu0  ;;  %4015 = vpow2.f32 %v1863_v57  ;;  %v1845_v29 = vmul.f32 1.442695, %v1745_v43  ;;  %v4336_v43 = vld [vmem:[#allocation3 + $0x80] ss:$16 sps:$4 sm:$0xff]  }
 0x1d1   :  { %v1867_v30 = vmul.f32 1.442695, %v1756_v7  ;;  %v1584_v5 = vpop.f32.mrf.mxu1  ;;  %4017 = vpow2.f32 %v1861_v44  ;;  %v5047_v40 = vadd.f32 %v1582_v41, %v1294_v38  ;;  %v1847_v7 = vmul.f32 1.442695, %v1746_v39  ;;  %v4334_v38 = vld [vmem:[#allocation3 + $0x60] ss:$16 sps:$4 sm:$0xff]  }
 0x1d2   :  { %v1296_v46 = vpop.f32.mrf.mxu0 }
 0x1d3   :  { %4019 = vpow2.f32 %v1867_v30  ;;  %v1297_v51 = vadd.f32 %v4998_v18, %v1296_v46  ;;  %v1585_v2 = vpop.f32.mrf.mxu1  ;;  %v1757_v59 = vmin.f32 %v5047_v40, 0.0  ;;  %v4335_v30 = vld [vmem:[#allocation3 + $0x84] ss:$16 sps:$4 sm:$0xff]   ;;  %vm1693_vm10 = vcmp.gt.f32.partialorder %v5047_v40, 0.0 }
 0x1d4   :  { %v1298_v60 = vpop.f32.mrf.mxu0  ;;  %4021 = vpow2.f32 %v1859_v49 }
 0x1d5   :  { %v5058_v25 = vadd.f32 %v1585_v2, %v1297_v51  ;;  %v1587_v62 = vpop.f32.mrf.mxu1  ;;  %2110 = vmatmul.mubr.bf16.gmra.mxu0 %v4332_v17  ;;  %v1869_v3 = vmul.f32 1.442695, %v1757_v59  ;;  %4023 = vpow2.f32 %v1857_v20 }
 0x1d6   :  { %v1301_v35 = vpop.f32.mrf.mxu0  ;;  %2117 = vmatprep.mubr.bf16.mxu0 %v4333_v12 }
 0x1d7   :  { %v1758_v13 = vmin.f32 %v5058_v25, 0.0  ;;  %v1302_v19 = vadd.f32 %v4998_v18, %v1301_v35  ;;  %v1590_v4 = vpop.f32.mrf.mxu1  ;;  %4025 = vpow2.f32 %v1869_v3  ;;  %vm1694_vm11 = vcmp.gt.f32.partialorder %v5058_v25, 0.0 }
 0x1d8   :  { %v1303_v21 = vpop.f32.mrf.mxu0  ;;  %4027 = vpow2.f32 %v1855_v14 }
 0x1d9   :  { %v1871_v48 = vmul.f32 1.442695, %v1758_v13  ;;  %v5064_v36 = vadd.f32 %v1590_v4, %v1302_v19  ;;  %v1592_v57 = vpop.f32.mrf.mxu1  ;;  %4029 = vpow2.f32 %v1853_v15 }
 0x1da   :  { %v1304_v1 = vpop.f32.mrf.mxu0 }
 0x1db   :  { %4031 = vpow2.f32 %v1871_v48  ;;  %v1759_v44 = vmin.f32 %v5064_v36, 0.0  ;;  %v1593_v61 = vpop.f32.mrf.mxu1  ;;  %v1305_v63 = vadd.f32 %v4998_v18, %v1304_v1  ;;  %vm1695_vm0 = vcmp.gt.f32.partialorder %v5064_v36, 0.0 }
 0x1dc   :  { %v4014_v33 = vpop.eup %4013  ;;  %v1306_v50 = vpop.f32.mrf.mxu0  ;;  %4033 = vpow2.f32 %v1851_v28 }
 0x1dd   :  { %v1873_v41 = vmul.f32 1.442695, %v1759_v44  ;;  %v1595_v53 = vpop.f32.mrf.mxu1  ;;  %2118 = vmatmul.mubr.bf16.gmra.mxu0 %v4334_v38  ;;  %v4016_v16 = vpop.eup %4015  ;;  %v5069_v47 = vadd.f32 %v1593_v61, %v1305_v63  ;;  %4035 = vpow2.f32 %v1849_v9  ;;  %v3630_v46 = vadd.f32 -1.0, %v4014_v33 }
 0x1de   :  { %v1309_v49 = vpop.f32.mrf.mxu0  ;;  %2125 = vmatprep.mubr.bf16.mxu0 %v4335_v30  ;;  %v4018_v5 = vpop.eup %4017  ;;  %v3629_v56 = vadd.f32 -1.0, %v4016_v16 }
 0x1df   :  { %v1310_v20 = vadd.f32 %v4998_v18, %v1309_v49  ;;  %v1598_v51 = vpop.f32.mrf.mxu1  ;;  %4037 = vpow2.f32 %v1873_v41  ;;  %v1760_v59 = vmin.f32 %v5069_v47, 0.0  ;;  %v3628_v12 = vadd.f32 -1.0, %v4018_v5 }
 0x1e0   :  { %v4020_v2 = vpop.eup %4019  ;;  %v1311_v60 = vpop.f32.mrf.mxu0  ;;  %4039 = vpow2.f32 %v1847_v7  ;;  %v2011_v23 = vsel %vm1691_vm4, %v5016_v8, %v3630_v46  ;;  %v2010_v57 = vsel %vm1690_vm6, %v5006_v55, %v3629_v56  ;;  %vm1696_vm1 = vcmp.gt.f32.partialorder %v5069_v47, 0.0 }
 0x1e1   :  { %v3631_v14 = vadd.f32 -1.0, %v4020_v2  ;;  %v5073_v62 = vadd.f32 %v1598_v51, %v1310_v20  ;;  %v1600_v17 = vpop.f32.mrf.mxu1  ;;  %v4022_v15 = vpop.eup %4021  ;;  %v1875_v3 = vmul.f32 1.442695, %v1760_v59  ;;  %4041 = vpow2.f32 %v1845_v29 }
 0x1e2   :  { %v5077_v35 = vpop.f32.mrf.mxu0  ;;  %v4024_v4 = vpop.eup %4023  ;;  %v3627_v48 = vadd.f32 -1.0, %v4022_v15  ;;  %v2009_v33 = vsel %vm1689_vm7, %v5008_v52, %v3628_v12  ;;  %v4338_v17 = vld [vmem:[#allocation3 + $0xa0] ss:$16 sps:$4 sm:$0xff]  }
 0x1e3   :  { %v2012_v13 = vsel %vm1692_vm5, %v5030_v27, %v3631_v14  ;;  %v5081_v19 = vpop.f32.mrf.mxu1  ;;  %4043 = vpow2.f32 %v1875_v3  ;;  %v4337_v27 = vld [vmem:[#allocation3 + $0xa4] ss:$16 sps:$4 sm:$0xff]   ;;  %v3626_v61 = vadd.f32 -1.0, %v4024_v4  ;;  %v2051_v7 = vpack.c.bf16 %v2010_v57, %v2009_v33 }
 0x1e4   :  { %v2052_v39 = vpack.c.bf16 %v2012_v13, %v2011_v23  ;;  %v1314_v21 = vpop.f32.mrf.mxu0  ;;  %v4026_v28 = vpop.eup %4025  ;;  %v2008_v38 = vsel %vm1688_vm8, %v5013_v37, %v3627_v48  ;;  %v4339_v3 = vld [vmem:[#allocation3 + $0xc4] ss:$16 sps:$4 sm:$0xff]  }
 0x1e5   :  { %v1603_v1 = vpop.f32.mrf.mxu1  ;;  %2126 = vmatmul.mubr.bf16.gmra.mxu0 %v4336_v43  ;;  %v4028_v9 = vpop.eup %4027  ;;  %v3632_v63 = vadd.f32 -1.0, %v4026_v28  ;;  %v2007_v29 = vsel %vm1687_vm9, %v5021_v11, %v3626_v61 }
 0x1e6   :  { %v5086_v8 = vpop.f32.mrf.mxu0  ;;  %2351 = vmatpush1.bf16.msra.mxu1 %v2052_v39  ;;  %2133 = vmatprep.mubr.bf16.mxu0 %v4337_v27  ;;  %v4030_v44 = vpop.eup %4029  ;;  %v3625_v53 = vadd.f32 -1.0, %v4028_v9  ;;  %v2050_v2 = vpack.c.bf16 %v2008_v38, %v2007_v29  ;;  %v4341_v38 = vld [vmem:[#allocation3 + $0xe4] ss:$16 sps:$4 sm:$0xff]  }
 0x1e7   :  { %v5089_v50 = vpop.f32.mrf.mxu1  ;;  %2352 = vmatprep.subr.bf16.mxu1 %v4480_v0  ;;  %v3624_v5 = vadd.f32 -1.0, %v4030_v44  ;;  %v5101_v46 = vsel %vm1693_vm10, %v5047_v40, %v3632_v63 }
 0x1e8   :  { %v4032_v55 = vpop.eup %4031  ;;  %v1319_v41 = vpop.f32.mrf.mxu0  ;;  %v2006_v40 = vsel %vm1686_vm12, %v5027_v45, %v3625_v53 }
 0x1e9   :  { %v3633_v16 = vadd.f32 -1.0, %v4032_v55  ;;  %v1608_v49 = vpop.f32.mrf.mxu1  ;;  %v4034_v30 = vpop.eup %4033  ;;  %v2005_v23 = vsel %vm1685_vm13, %v5033_v32, %v3624_v5  ;;  %v4340_v41 = vld [vmem:[#allocation3 + $0xc0] ss:$16 sps:$4 sm:$0xff]  }
 0x1ea   :  { %v5097_v52 = vpop.f32.mrf.mxu0  ;;  %2353 = vmatpush1.bf16.msra.mxu1 %v2051_v7  ;;  %v4036_v51 = vpop.eup %4035  ;;  %v3623_v11 = vadd.f32 -1.0, %v4034_v30  ;;  %v2049_v45 = vpack.c.bf16 %v2006_v40, %v2005_v23  ;;  %v4344_v23 = vld [vmem:[#allocation3 + $0x100] ss:$16 sps:$4 sm:$0xff]  }
 0x1eb   :  { %v5104_v37 = vsel %vm1694_vm11, %v5058_v25, %v3633_v16  ;;  %v5106_v20 = vpop.f32.mrf.mxu1  ;;  %2354 = vmatprep.subr.bf16.mxu1 %v4480_v0  ;;  %v3622_v12 = vadd.f32 -1.0, %v4036_v51 }
 0x1ec   :  { %v2053_v59 = vpack.c.bf16 %v5104_v37, %v5101_v46  ;;  %v1322_v60 = vpop.f32.mrf.mxu0  ;;  %v4038_v56 = vpop.eup %4037  ;;  %v2004_v57 = vsel %vm1684_vm14, %v5042_v42, %v3623_v11  ;;  %v4369_v46 = vld [vmem:[#allocation3 + $0x240] ss:$16 sps:$4 sm:$0xff]   ;;  %v4370_v37 = vld [vmem:[#allocation3 + $0x6c] ss:$16 sps:$4 sm:$0xff]  }
 0x1ed   :  { %v1611_v14 = vpop.f32.mrf.mxu1  ;;  %2134 = vmatmul.mubr.bf16.gmra.mxu0 %v4338_v17  ;;  %v4040_v25 = vpop.eup %4039  ;;  %v3634_v39 = vadd.f32 -1.0, %v4038_v56  ;;  %v2003_v27 = vsel %vm1683_vm15, %v5050_v24, %v3622_v12  ;;  %vm1697_vm15 = vcmp.gt.f32.partialorder %v5073_v62, 0.0 }
 0x1ee   :  { %v5114_v15 = vpop.f32.mrf.mxu0  ;;  %2355 = vmatpush1.bf16.msra.mxu1 %v2050_v2  ;;  %2141 = vmatprep.mubr.bf16.mxu0 %v4339_v3  ;;  %v4042_v4 = vpop.eup %4041  ;;  %v3621_v48 = vadd.f32 -1.0, %v4040_v25  ;;  %v2048_v42 = vpack.c.bf16 %v2004_v57, %v2003_v27  ;;  %v4342_v2 = vld [vmem:[#allocation3 + $0xe0] ss:$16 sps:$4 sm:$0xff]  }
 0x1ef   :  { %v5117_v13 = vpop.f32.mrf.mxu1  ;;  %2356 = vmatprep.subr.bf16.mxu1 %v4480_v0  ;;  %v3620_v32 = vadd.f32 -1.0, %v4042_v4  ;;  %v5133_v61 = vsel %vm1695_vm0, %v5064_v36, %v3634_v39  ;;  %v4345_v39 = vld [vmem:[#allocation3 + $0x124] ss:$16 sps:$4 sm:$0xff]   ;;  %vm2710_vm0 = vcmask 523264  }
 0x1f0   :  { %v1327_v21 = vpop.f32.mrf.mxu0  ;;  %v4044_v28 = vpop.eup %4043  ;;  %v2002_v24 = vsel %vm1682_vm2, %v5054_v34, %v3621_v48 }
 0x1f1   :  { %v1616_v1 = vpop.f32.mrf.mxu1  ;;  %v3635_v43 = vadd.f32 -1.0, %v4044_v28  ;;  %v2001_v36 = vsel %vm1681_vm3, %v4923_v31, %v3620_v32  ;;  %v4343_v31 = vld [vmem:[#allocation3 + $0x104] ss:$16 sps:$4 sm:$0xff]  }
 0x1f2   :  { %v5123_v9 = vpop.f32.mrf.mxu0  ;;  %2357 = vmatpush1.bf16.msra.mxu1 %v2049_v45 }
 0x1f3   :  { %v5128_v44 = vpop.f32.mrf.mxu1  ;;  %2358 = vmatprep.subr.bf16.mxu1 %v4480_v0  ;;  %v5136_v33 = vsel %vm1696_vm1, %v5069_v47, %v3635_v43  ;;  %v2047_v47 = vpack.c.bf16 %v2002_v24, %v2001_v36  ;;  %v1329_v28 = vadd.f32 %v4998_v18, %v5123_v9  ;;  %v1321_v9 = vadd.f32 %v4998_v18, %v5097_v52 }
 0x1f4   :  { %v1330_v63 = vpop.f32.mrf.mxu0  ;;  %v2054_v55 = vpack.c.bf16 %v5136_v33, %v5133_v61  ;;  %v1318_v52 = vadd.f32 %v4998_v18, %v5086_v8  ;;  %v4365_v61 = vld [vmem:[#allocation3 + $0x220] ss:$16 sps:$4 sm:$0xff]   ;;  %v4366_v33 = vld [vmem:[#allocation3 + $0x4c] ss:$16 sps:$4 sm:$0xff]   ;;  %vm3353_vm1 = vcmask 7168  }
 0x1f5   :  { %v1619_v7 = vpop.f32.mrf.mxu1  ;;  %2142 = vmatmul.mubr.bf16.gmra.mxu0 %v4340_v41 }
 0x1f6   :  { %v1333_v53 = vpop.f32.mrf.mxu0  ;;  %2359 = vmatpush1.bf16.msra.mxu1 %v2048_v42  ;;  %2149 = vmatprep.mubr.bf16.mxu0 %v4341_v38  ;;  %v1326_v42 = vadd.f32 %v4998_v18, %v5114_v15  ;;  %v5179_v38 = vadd.f32 %v5128_v44, %v1329_v28  ;;  %v5198_v8 = vadd.f32 %v5089_v50, %v1318_v52 }
 0x1f7   :  { %v1622_v16 = vpop.f32.mrf.mxu1  ;;  %2360 = vmatprep.subr.bf16.mxu1 %v4480_v0  ;;  %v1334_v10 = vadd.f32 %v4998_v18, %v1333_v53 }
 0x1f8   :  { %v1335_v49 = vpop.f32.mrf.mxu0  ;;  %vm1702_vm10 = vcmp.gt.f32.partialorder %v5179_v38, 0.0  ;;  %vm1699_vm13 = vcmp.gt.f32.partialorder %v5198_v8, 0.0 }
 0x1f9   :  { %v1624_v34 = vpop.f32.mrf.mxu1  ;;  %v5172_v63 = vadd.f32 %v1622_v16, %v1334_v10  ;;  %v4346_v16 = vld [vmem:[#allocation3 + $0x120] ss:$16 sps:$4 sm:$0xff]   ;;  %v4351_v10 = vld [vmem:[#allocation3 + $0x184] ss:$16 sps:$4 sm:$0xff]  }
 0x1fa   :  { %v1336_v30 = vpop.f32.mrf.mxu0  ;;  %2361 = vmatpush1.bf16.msra.mxu1 %v2047_v47 }
 0x1fb   :  { %v1625_v5 = vpop.f32.mrf.mxu1  ;;  %2362 = vmatprep.subr.bf16.mxu1 %v4480_v0  ;;  %v1337_v58 = vadd.f32 %v4998_v18, %v1336_v30  ;;  %v1767_v44 = vmin.f32 %v5172_v63, 0.0  ;;  %vm1703_vm9 = vcmp.gt.f32.partialorder %v5172_v63, 0.0 }
 0x1fc   :  { %v1338_v29 = vpop.f32.mrf.mxu0 }
 0x1fd   :  { %v1627_v51 = vpop.f32.mrf.mxu1  ;;  %2150 = vmatmul.mubr.bf16.gmra.mxu0 %v4342_v2  ;;  %v5164_v48 = vadd.f32 %v1625_v5, %v1337_v58  ;;  %v4347_v5 = vld [vmem:[#allocation3 + $0x144] ss:$16 sps:$4 sm:$0xff]   ;;  %v5187_v29 = vadd.f32 %v5117_v13, %v1326_v42  ;;  %v1313_v2 = vadd.f32 %v4998_v18, %v5077_v35  ;;  %v1761_v58 = vmin.f32 %v5073_v62, 0.0 }
 0x1fe   :  { %v1341_v60 = vpop.f32.mrf.mxu0  ;;  %2363 = vmatpush1.bf16.msra.mxu1 %v2046_v26  ;;  %2157 = vmatprep.mubr.bf16.mxu0 %v4343_v31  ;;  %v1766_v31 = vmin.f32 %v5179_v38, 0.0 }
 0x1ff   :  { %v1630_v56 = vpop.f32.mrf.mxu1  ;;  %2364 = vmatprep.subr.bf16.mxu1 %v4480_v0  ;;  %v1342_v14 = vadd.f32 %v4998_v18, %v1341_v60  ;;  %v1768_v36 = vmin.f32 %v5164_v48, 0.0  ;;  %v5194_v60 = vadd.f32 %v5106_v20, %v1321_v9  ;;  %v1765_v13 = vmin.f32 %v5187_v29, 0.0  ;;  %v4348_v20 = vld [vmem:[#allocation3 + $0x140] ss:$16 sps:$4 sm:$0xff]  }
 0x200   :  { %v1343_v11 = vpop.f32.mrf.mxu0  ;;  %v1887_v35 = vmul.f32 1.442695, %v1766_v31  ;;  %vm1704_vm8 = vcmp.gt.f32.partialorder %v5164_v48, 0.0  ;;  %vm1701_vm11 = vcmp.gt.f32.partialorder %v5187_v29, 0.0 }
 0x201   :  { %v1632_v40 = vpop.f32.mrf.mxu1  ;;  %v5158_v4 = vadd.f32 %v1630_v56, %v1342_v14  ;;  %v1891_v56 = vmul.f32 1.442695, %v1768_v36  ;;  %v5202_v14 = vadd.f32 %v5081_v19, %v1313_v2  ;;  %v4352_v36 = vld [vmem:[#allocation3 + $0x180] ss:$16 sps:$4 sm:$0xff]   ;;  %vm1700_vm12 = vcmp.gt.f32.partialorder %v5194_v60, 0.0 }
 0x202   :  { %v1344_v17 = vpop.f32.mrf.mxu0  ;;  %2365 = vmatpush1.bf16.msra.mxu1 %v2045_v54  ;;  %v1889_v40 = vmul.f32 1.442695, %v1767_v44 }
 0x203   :  { %v1345_v25 = vadd.f32 %v4998_v18, %v1344_v17  ;;  %v1633_v3 = vpop.f32.mrf.mxu1  ;;  %2366 = vmatprep.subr.bf16.mxu1 %v4480_v0  ;;  %v1769_v43 = vmin.f32 %v5158_v4, 0.0  ;;  %v4349_v17 = vld [vmem:[#allocation3 + $0x164] ss:$16 sps:$4 sm:$0xff]   ;;  %v1762_v50 = vmin.f32 %v5202_v14, 0.0  ;;  %vm1705_vm7 = vcmp.gt.f32.partialorder %v5158_v4, 0.0 }
 0x204   :  { %v1346_v22 = vpop.f32.mrf.mxu0  ;;  %vm1698_vm14 = vcmp.gt.f32.partialorder %v5202_v14, 0.0 }
 0x205   :  { %v5156_v26 = vadd.f32 %v1633_v3, %v1345_v25  ;;  %v1635_v12 = vpop.f32.mrf.mxu1  ;;  %2158 = vmatmul.mubr.bf16.gmra.mxu0 %v4344_v23  ;;  %v1893_v34 = vmul.f32 1.442695, %v1769_v43  ;;  %v1763_v25 = vmin.f32 %v5198_v8, 0.0  ;;  %v1885_v3 = vmul.f32 1.442695, %v1765_v13 }
 0x206   :  { %v1349_v45 = vpop.f32.mrf.mxu0  ;;  %2165 = vmatprep.mubr.bf16.mxu0 %v4345_v39  ;;  %v1879_v23 = vmul.f32 1.442695, %v1762_v50  ;;  %v4357_v50 = vld [vmem:[#allocation3 + $0x1e4] ss:$16 sps:$4 sm:$0xff]  }
 0x207   :  { %v1638_v6 = vpop.f32.mrf.mxu1  ;;  %v1350_v54 = vadd.f32 %v4998_v18, %v1349_v45  ;;  %v1770_v57 = vmin.f32 %v5156_v26, 0.0  ;;  %v1881_v19 = vmul.f32 1.442695, %v1763_v25  ;;  %v4350_v45 = vld [vmem:[#allocation3 + $0x160] ss:$16 sps:$4 sm:$0xff]   ;;  %vm1706_vm6 = vcmp.gt.f32.partialorder %v5156_v26, 0.0 }
 0x208   :  { %v1351_v21 = vpop.f32.mrf.mxu0 }
 0x209   :  { %v1640_v1 = vpop.f32.mrf.mxu1  ;;  %v5168_v32 = vadd.f32 %v1638_v6, %v1350_v54  ;;  %v1895_v47 = vmul.f32 1.442695, %v1770_v57  ;;  %v1877_v54 = vmul.f32 1.442695, %v1761_v58  ;;  %v4361_v58 = vld [vmem:[#allocation3 + $0x200] ss:$16 sps:$4 sm:$0xff]  }
 0x20a   :  { %v1352_v27 = vpop.f32.mrf.mxu0 }
 0x20b   :  { %v1353_v24 = vadd.f32 %v4998_v18, %v1352_v27  ;;  %v1641_v7 = vpop.f32.mrf.mxu1  ;;  %v1771_v41 = vmin.f32 %v5168_v32, 0.0  ;;  %v1764_v18 = vmin.f32 %v5194_v60, 0.0  ;;  %vm1707_vm4 = vcmp.gt.f32.partialorder %v5168_v32, 0.0 }
 0x20c   :  { %v1354_v53 = vpop.f32.mrf.mxu0 }
 0x20d   :  { %v5182_v49 = vadd.f32 %v1641_v7, %v1353_v24  ;;  %v1643_v15 = vpop.f32.mrf.mxu1  ;;  %2166 = vmatmul.mubr.bf16.gmra.mxu0 %v4346_v16  ;;  %v1897_v30 = vmul.f32 1.442695, %v1771_v41  ;;  %v1883_v22 = vmul.f32 1.442695, %v1764_v18 }
 0x20e   :  { %2173 = vmatprep.mubr.bf16.mxu0 %v4347_v5  ;;  %v4353_v15 = vld [vmem:[#allocation3 + $0x1a4] ss:$16 sps:$4 sm:$0xff]  }
 0x20f   :  { %v1772_v51 = vmin.f32 %v5182_v49, 0.0  ;;  %4045 = vpow2.f32 %v1897_v30  ;;  %vm1708_vm5 = vcmp.gt.f32.partialorder %v5182_v49, 0.0 }
 0x210   :  { %4047 = vpow2.f32 %v1895_v47 }
 0x211   :  { %v1899_v11 = vmul.f32 1.442695, %v1772_v51  ;;  %4049 = vpow2.f32 %v1893_v34 }
 0x213   :  { %4051 = vpow2.f32 %v1899_v11 }
 0x214   :  { %4053 = vpow2.f32 %v1891_v56  ;;  %v4354_v56 = vld [vmem:[#allocation3 + $0x1a0] ss:$16 sps:$4 sm:$0xff]  }
 0x215   :  { %2174 = vmatmul.mubr.bf16.gmra.mxu0 %v4348_v20  ;;  %4055 = vpow2.f32 %v1889_v40 }
 0x216   :  { %2181 = vmatprep.mubr.bf16.mxu0 %v4349_v17  ;;  %4057 = vpow2.f32 %v1887_v35 }
 0x217   :  { %4059 = vpow2.f32 %v1885_v3  ;;  %v4356_v3 = vld [vmem:[#allocation3 + $0x1c0] ss:$16 sps:$4 sm:$0xff]  }
 0x218   :  { %4061 = vpow2.f32 %v1883_v22 }
 0x219   :  { %4063 = vpow2.f32 %v1881_v19  ;;  %v4362_v19 = vld [vmem:[#allocation3 + $0x2c] ss:$16 sps:$4 sm:$0xff]  }
 0x21a   :  { %4065 = vpow2.f32 %v1879_v23  ;;  %v4364_v23 = vld [vmem:[#allocation3 + $0x28] ss:$16 sps:$4 sm:$0xff]  }
 0x21b   :  { %4067 = vpow2.f32 %v1877_v54  ;;  %v4376_v54 = vld [vmem:[#allocation3 + $0x88] ss:$16 sps:$4 sm:$0xff]  }
 0x21c   :  { %v4046_v12 = vpop.eup %4045 }
 0x21d   :  { %2182 = vmatmul.mubr.bf16.gmra.mxu0 %v4350_v45  ;;  %v4048_v39 = vpop.eup %4047  ;;  %v3646_v21 = vadd.f32 -1.0, %v4046_v12  ;;  %v4363_v12 = vld [vmem:[#allocation3 + $0x224] ss:$16 sps:$4 sm:$0xff]   ;;  %v4372_v45 = vld [vmem:[#allocation3 + $0x68] ss:$16 sps:$4 sm:$0xff]  }
 0x21e   :  { %2189 = vmatprep.mubr.bf16.mxu0 %v4351_v10  ;;  %v4050_v6 = vpop.eup %4049  ;;  %v3645_v57 = vadd.f32 -1.0, %v4048_v39  ;;  %v4373_v39 = vld [vmem:[#allocation3 + $0x260] ss:$16 sps:$4 sm:$0xff]   ;;  %v4374_v10 = vld [vmem:[#allocation3 + $0x8c] ss:$16 sps:$4 sm:$0xff]  }
 0x21f   :  { %v3644_v27 = vadd.f32 -1.0, %v4050_v6  ;;  %v2027_v42 = vsel %vm1707_vm4, %v5168_v32, %v3646_v21  ;;  %v4375_v6 = vld [vmem:[#allocation3 + $0x284] ss:$16 sps:$4 sm:$0xff]   ;;  %v4377_v21 = vld [vmem:[#allocation3 + $0x280] ss:$16 sps:$4 sm:$0xff]  }
 0x220   :  { %v4052_v28 = vpop.eup %4051  ;;  %v2026_v53 = vsel %vm1706_vm6, %v5156_v26, %v3645_v57  ;;  %v4379_v57 = vld [vmem:[#allocation3 + $0x2a4] ss:$16 sps:$4 sm:$0xff]  }
 0x221   :  { %v3647_v1 = vadd.f32 -1.0, %v4052_v28  ;;  %v4054_v43 = vpop.eup %4053  ;;  %v2025_v32 = vsel %vm1705_vm7, %v5158_v4, %v3644_v27  ;;  %v4378_v28 = vld [vmem:[#allocation3 + $0xac] ss:$16 sps:$4 sm:$0xff]  }
 0x222   :  { %v4056_v7 = vpop.eup %4055  ;;  %v3643_v41 = vadd.f32 -1.0, %v4054_v43  ;;  %v2059_v34 = vpack.c.bf16 %v2026_v53, %v2025_v32  ;;  %v4381_v43 = vld [vmem:[#allocation3 + $0x2a0] ss:$16 sps:$4 sm:$0xff]   ;;  %v4382_v27 = vld [vmem:[#allocation3 + $0xcc] ss:$16 sps:$4 sm:$0xff]  }
 0x223   :  { %v2028_v24 = vsel %vm1708_vm5, %v5182_v49, %v3647_v1  ;;  %v4058_v47 = vpop.eup %4057  ;;  %v3642_v16 = vadd.f32 -1.0, %v4056_v7  ;;  %v4380_v1 = vld [vmem:[#allocation3 + $0xa8] ss:$16 sps:$4 sm:$0xff]   ;;  %v4385_v7 = vld [vmem:[#allocation3 + $0x2c0] ss:$16 sps:$4 sm:$0xff]  }
 0x224   :  { %v2060_v9 = vpack.c.bf16 %v2028_v24, %v2027_v42  ;;  %v4060_v49 = vpop.eup %4059  ;;  %v3641_v30 = vadd.f32 -1.0, %v4058_v47  ;;  %v2024_v26 = vsel %vm1704_vm8, %v5164_v48, %v3643_v41  ;;  %v4355_v48 = vld [vmem:[#allocation3 + $0x1c4] ss:$16 sps:$4 sm:$0xff]   ;;  %v4384_v24 = vld [vmem:[#allocation3 + $0xc8] ss:$16 sps:$4 sm:$0xff]  }
 0x225   :  { %2190 = vmatmul.mubr.bf16.gmra.mxu0 %v4352_v36  ;;  %v4062_v5 = vpop.eup %4061  ;;  %v3640_v52 = vadd.f32 -1.0, %v4060_v49  ;;  %v2023_v44 = vsel %vm1703_vm9, %v5172_v63, %v3642_v16  ;;  %v4383_v42 = vld [vmem:[#allocation3 + $0x2c4] ss:$16 sps:$4 sm:$0xff]   ;;  %v4388_v53 = vld [vmem:[#allocation3 + $0xe8] ss:$16 sps:$4 sm:$0xff]  }
 0x226   :  { %2367 = vmatpush2.bf16.msra.mxu1 %v2060_v9  ;;  %2197 = vmatprep.mubr.bf16.mxu0 %v4353_v15  ;;  %v4064_v51 = vpop.eup %4063  ;;  %v2058_v4 = vpack.c.bf16 %v2024_v26, %v2023_v44  ;;  %v3639_v2 = vadd.f32 -1.0, %v4062_v5  ;;  %v2022_v31 = vsel %vm1702_vm10, %v5179_v38, %v3641_v30  ;;  %v4386_v9 = vld [vmem:[#allocation3 + $0xec] ss:$16 sps:$4 sm:$0xff]   ;;  %v4387_v41 = vld [vmem:[#allocation3 + $0x2e4] ss:$16 sps:$4 sm:$0xff]  }
 0x227   :  { %2368 = vmatprep.subr.bf16.mxu1 %v4480_v0  ;;  %v4066_v11 = vpop.eup %4065  ;;  %v3638_v13 = vadd.f32 -1.0, %v4064_v51  ;;  %v2021_v63 = vsel %vm1701_vm11, %v5187_v29, %v3640_v52  ;;  %v4389_v36 = vld [vmem:[#allocation3 + $0x2e0] ss:$16 sps:$4 sm:$0xff]   ;;  %v4390_v47 = vld [vmem:[#allocation3 + $0x10c] ss:$16 sps:$4 sm:$0xff]  }
 0x228   :  { %v4068_v40 = vpop.eup %4067  ;;  %v2057_v18 = vpack.c.bf16 %v2022_v31, %v2021_v63  ;;  %v3637_v35 = vadd.f32 -1.0, %v4066_v11  ;;  %v2020_v38 = vsel %vm1700_vm12, %v5194_v60, %v3639_v2  ;;  %v4391_v15 = vld [vmem:[#allocation3 + $0x304] ss:$16 sps:$4 sm:$0xff]   ;;  %v4392_v16 = vld [vmem:[#allocation3 + $0x108] ss:$16 sps:$4 sm:$0xff]  }
 0x229   :  { %v3636_v20 = vadd.f32 -1.0, %v4068_v40  ;;  %v2019_v17 = vsel %vm1699_vm13, %v5198_v8, %v3638_v13  ;;  %v4358_v8 = vld [vmem:[#allocation3 + $0x1e0] ss:$16 sps:$4 sm:$0xff]   ;;  %v4395_v30 = vld [vmem:[#allocation3 + $0x324] ss:$16 sps:$4 sm:$0xff]  }
 0x22a   :  { %2369 = vmatpush2.bf16.msra.mxu1 %v2059_v34  ;;  %v2056_v29 = vpack.c.bf16 %v2020_v38, %v2019_v17  ;;  %v2018_v25 = vsel %vm1698_vm14, %v5202_v14, %v3637_v35  ;;  %v4359_v14 = vld [vmem:[#allocation3 + $0x204] ss:$16 sps:$4 sm:$0xff]   ;;  %v4393_v49 = vld [vmem:[#allocation3 + $0x300] ss:$16 sps:$4 sm:$0xff]   ;;  %v4394_v34 = vld [vmem:[#allocation3 + $0x12c] ss:$16 sps:$4 sm:$0xff]  }
 0x22b   :  { %2370 = vmatprep.subr.bf16.mxu1 %v4480_v0  ;;  %v2017_v60 = vsel %vm1697_vm15, %v5073_v62, %v3636_v20  ;;  %v4360_v62 = vld [vmem:[#allocation3 + $0x8] ss:$16 sps:$4 sm:$0xff]   ;;  %v4397_v51 = vld [vmem:[#allocation3 + $0x320] ss:$16 sps:$4 sm:$0xff]   ;;  %v4398_v2 = vld [vmem:[#allocation3 + $0x14c] ss:$16 sps:$4 sm:$0xff]  }
 0x22c   :  { %v2055_v22 = vpack.c.bf16 %v2018_v25, %v2017_v60  ;;  %v4396_v44 = vld [vmem:[#allocation3 + $0x128] ss:$16 sps:$4 sm:$0xff]   ;;  %v4399_v31 = vld [vmem:[#allocation3 + $0x344] ss:$16 sps:$4 sm:$0xff]   ;;  %v4401_v63 = vld [vmem:[#allocation3 + $0x340] ss:$16 sps:$4 sm:$0xff]  }
 0x22d   :  { %2198 = vmatmul.mubr.bf16.gmra.mxu0 %v4354_v56  ;;  %v4400_v13 = vld [vmem:[#allocation3 + $0x148] ss:$16 sps:$4 sm:$0xff]   ;;  %v4403_v35 = vld [vmem:[#allocation3 + $0x364] ss:$16 sps:$4 sm:$0xff]  }
 0x22e   :  { %2371 = vmatpush2.bf16.msra.mxu1 %v2058_v4  ;;  %2205 = vmatprep.mubr.bf16.mxu0 %v4355_v48  ;;  %v4407_v60 = vld [vmem:[#allocation3 + $0x384] ss:$16 sps:$4 sm:$0xff]  }
 0x22f   :  { %2372 = vmatprep.subr.bf16.mxu1 %v4480_v0 }
 0x232   :  { %2373 = vmatpush2.bf16.msra.mxu1 %v2057_v18  ;;  %v4402_v18 = vld [vmem:[#allocation3 + $0x16c] ss:$16 sps:$4 sm:$0xff]  }
 0x233   :  { %2374 = vmatprep.subr.bf16.mxu1 %v4480_v0 }
 0x235   :  { %2206 = vmatmul.mubr.bf16.gmra.mxu0 %v4356_v3  ;;  %v4405_v3 = vld [vmem:[#allocation3 + $0x360] ss:$16 sps:$4 sm:$0xff]  }
 0x236   :  { %2375 = vmatpush2.bf16.msra.mxu1 %v2056_v29  ;;  %2213 = vmatprep.mubr.bf16.mxu0 %v4357_v50  ;;  %v4404_v29 = vld [vmem:[#allocation3 + $0x168] ss:$16 sps:$4 sm:$0xff]   ;;  %v4406_v50 = vld [vmem:[#allocation3 + $0x18c] ss:$16 sps:$4 sm:$0xff]  }
 0x237   :  { %2376 = vmatprep.subr.bf16.mxu1 %v4480_v0 }
 0x23a   :  { %2377 = vmatpush2.bf16.msra.mxu1 %v2055_v22 }
 0x23b   :  { %2378 = vmatprep.subr.bf16.mxu1 %v4480_v0 }
 0x23d   :  { %2214 = vmatmul.mubr.bf16.gmra.mxu0 %v4358_v8 }
 0x23e   :  { %2379 = vmatpush2.bf16.msra.mxu1 %v2054_v55  ;;  %2221 = vmatprep.mubr.bf16.mxu0 %v4359_v14  ;;  %v4367_v55 = vld [vmem:[#allocation3 + $0x244] ss:$16 sps:$4 sm:$0xff]  }
 0x23f   :  { %2380 = vmatprep.subr.bf16.mxu1 %v4480_v0  ;;  %v4368_v0 = vld [vmem:[#allocation3 + $0x48] ss:$16 sps:$4 sm:$0xff]  }
 0x242   :  { %2381 = vmatpush2.bf16.msra.mxu1 %v2053_v59  ;;  %v4371_v59 = vld [vmem:[#allocation3 + $0x264] ss:$16 sps:$4 sm:$0xff]  }
 0x245   :  { %2383 = vmatmul.mubr.bf16.vlgmr.msra.gmra.mxu1 %v4360_v62  ;;  %2222 = vmatmul.mubr.bf16.gmra.mxu0 %v4361_v58  ;;  %v4408_v62 = vld [vmem:[#allocation3 + $0x188] ss:$16 sps:$4 sm:$0xff]  }
 0x246   :  { %2390 = vmatprep.mubr.bf16.mxu1 %v4362_v19  ;;  %2229 = vmatprep.mubr.bf16.mxu0 %v4363_v12  ;;  %v4409_v19 = vld [vmem:[#allocation3 + $0x380] ss:$16 sps:$4 sm:$0xff]   ;;  %v4410_v12 = vld [vmem:[#allocation3 + $0x1ac] ss:$16 sps:$4 sm:$0xff]  }
 0x24d   :  { %2391 = vmatmul.mubr.bf16.gmra.mxu1 %v4364_v23  ;;  %2230 = vmatmul.mubr.bf16.gmra.mxu0 %v4365_v61  ;;  %v4411_v23 = vld [vmem:[#allocation3 + $0x3a4] ss:$16 sps:$4 sm:$0xff]  }
 0x24e   :  { %2398 = vmatprep.mubr.bf16.mxu1 %v4366_v33  ;;  %2237 = vmatprep.mubr.bf16.mxu0 %v4367_v55 }
 0x255   :  { %2399 = vmatmul.mubr.bf16.gmra.mxu1 %v4368_v0  ;;  %2238 = vmatmul.mubr.bf16.gmra.mxu0 %v4369_v46  ;;  %v4412_v0 = vld [vmem:[#allocation3 + $0x1a8] ss:$16 sps:$4 sm:$0xff]  }
 0x256   :  { %2406 = vmatprep.mubr.bf16.mxu1 %v4370_v37  ;;  %2245 = vmatprep.mubr.bf16.mxu0 %v4371_v59  ;;  %v4413_v37 = vld [vmem:[#allocation3 + $0x3a0] ss:$16 sps:$4 sm:$0xff]   ;;  %v4414_v59 = vld [vmem:[#allocation3 + $0x1cc] ss:$16 sps:$4 sm:$0xff]  }
 0x25d   :  { %2407 = vmatmul.mubr.bf16.gmra.mxu1 %v4372_v45  ;;  %2246 = vmatmul.mubr.bf16.gmra.mxu0 %v4373_v39  ;;  %v4415_v45 = vld [vmem:[#allocation3 + $0x3c4] ss:$16 sps:$4 sm:$0xff]  }
 0x25e   :  { %2414 = vmatprep.mubr.bf16.mxu1 %v4374_v10  ;;  %2253 = vmatprep.mubr.bf16.mxu0 %v4375_v6 }
 0x265   :  { %2415 = vmatmul.mubr.bf16.gmra.mxu1 %v4376_v54  ;;  %2254 = vmatmul.mubr.bf16.gmra.mxu0 %v4377_v21  ;;  %v4416_v54 = vld [vmem:[#allocation3 + $0x1c8] ss:$16 sps:$4 sm:$0xff]  }
 0x266   :  { %2422 = vmatprep.mubr.bf16.mxu1 %v4378_v28  ;;  %2261 = vmatprep.mubr.bf16.mxu0 %v4379_v57  ;;  %v4417_v28 = vld [vmem:[#allocation3 + $0x3c0] ss:$16 sps:$4 sm:$0xff]   ;;  %v4418_v57 = vld [vmem:[#allocation3 + $0x1ec] ss:$16 sps:$4 sm:$0xff]  }
 0x26d   :  { %2423 = vmatmul.mubr.bf16.gmra.mxu1 %v4380_v1  ;;  %2262 = vmatmul.mubr.bf16.gmra.mxu0 %v4381_v43  ;;  %v4419_v1 = vld [vmem:[#allocation3 + $0x3e4] ss:$16 sps:$4 sm:$0xff]  }
 0x26e   :  { %2430 = vmatprep.mubr.bf16.mxu1 %v4382_v27  ;;  %2269 = vmatprep.mubr.bf16.mxu0 %v4383_v42 }
 0x275   :  { %2431 = vmatmul.mubr.bf16.gmra.mxu1 %v4384_v24  ;;  %2270 = vmatmul.mubr.bf16.gmra.mxu0 %v4385_v7  ;;  %v4420_v24 = vld [vmem:[#allocation3 + $0x1e8] ss:$16 sps:$4 sm:$0xff]  }
 0x276   :  { %2438 = vmatprep.mubr.bf16.mxu1 %v4386_v9  ;;  %2277 = vmatprep.mubr.bf16.mxu0 %v4387_v41  ;;  %v4421_v9 = vld [vmem:[#allocation3 + $0x3e0] ss:$16 sps:$4 sm:$0xff]   ;;  %v4422_v41 = vld [vmem:[#allocation3 + $0x20c] ss:$16 sps:$4 sm:$0xff]  }
 0x27d   :  { %2439 = vmatmul.mubr.bf16.gmra.mxu1 %v4388_v53  ;;  %2278 = vmatmul.mubr.bf16.gmra.mxu0 %v4389_v36 }
 0x27e   :  { %2446 = vmatprep.mubr.bf16.mxu1 %v4390_v47  ;;  %2285 = vmatprep.mubr.bf16.mxu0 %v4391_v15  ;;  %v4423_v15 = vld [vmem:[#allocation3 + $0x208] ss:$16 sps:$4 sm:$0xff]  }
 0x285   :  { %2447 = vmatmul.mubr.bf16.gmra.mxu1 %v4392_v16  ;;  %v5245_v32 = vpop.f32.mrf.mxu0  ;;  %2286 = vmatmul.mubr.bf16.gmra.mxu0 %v4393_v49  ;;  %v4424_v49 = vld [vmem:[#allocation3 + $0x22c] ss:$16 sps:$4 sm:$0xff]  }
 0x286   :  { %2454 = vmatprep.mubr.bf16.mxu1 %v4394_v34  ;;  %2293 = vmatprep.mubr.bf16.mxu0 %v4395_v30 }
 0x287   :  { %v2097_v26 = vpop.f32.mrf.mxu0 }
 0x289   :  { %v5247_v5 = vpop.f32.mrf.mxu0 }
 0x28b   :  { %v2100_v52 = vpop.f32.mrf.mxu0 }
 0x28c   :  { %v4425_v52 = vld [vmem:[#allocation3 + $0x228] ss:$16 sps:$4 sm:$0xff]  }
 0x28d   :  { %2455 = vmatmul.mubr.bf16.gmra.mxu1 %v4396_v44  ;;  %2294 = vmatmul.mubr.bf16.gmra.mxu0 %v4397_v51  ;;  %v5249_v4 = vpop.f32.mrf.mxu0  ;;  %v4426_v51 = vld [vmem:[#allocation3 + $0x24c] ss:$16 sps:$4 sm:$0xff]  }
 0x28e   :  { %2462 = vmatprep.mubr.bf16.mxu1 %v4398_v2  ;;  %2301 = vmatprep.mubr.bf16.mxu0 %v4399_v31 }
 0x28f   :  { %v2105_v56 = vpop.f32.mrf.mxu0 }
 0x291   :  { %v5251_v11 = vpop.f32.mrf.mxu0 }
 0x293   :  { %v2108_v48 = vpop.f32.mrf.mxu0 }
 0x294   :  { %v4427_v48 = vld [vmem:[#allocation3 + $0x248] ss:$16 sps:$4 sm:$0xff]  }
 0x295   :  { %2463 = vmatmul.mubr.bf16.gmra.mxu1 %v4400_v13  ;;  %2302 = vmatmul.mubr.bf16.gmra.mxu0 %v4401_v63  ;;  %v5253_v40 = vpop.f32.mrf.mxu0  ;;  %v4428_v63 = vld [vmem:[#allocation3 + $0x26c] ss:$16 sps:$4 sm:$0xff]  }
 0x296   :  { %2470 = vmatprep.mubr.bf16.mxu1 %v4402_v18  ;;  %2309 = vmatprep.mubr.bf16.mxu0 %v4403_v35 }
 0x297   :  { %v2113_v38 = vpop.f32.mrf.mxu0 }
 0x299   :  { %v5255_v20 = vpop.f32.mrf.mxu0 }
 0x29b   :  { %v2116_v17 = vpop.f32.mrf.mxu0 }
 0x29c   :  { %v4429_v17 = vld [vmem:[#allocation3 + $0x268] ss:$16 sps:$4 sm:$0xff]  }
 0x29d   :  { %2471 = vmatmul.mubr.bf16.gmra.mxu1 %v4404_v29  ;;  %v5257_v25 = vpop.f32.mrf.mxu0  ;;  %2310 = vmatmul.mubr.bf16.gmra.mxu0 %v4405_v3  ;;  %v4430_v3 = vld [vmem:[#allocation3 + $0x28c] ss:$16 sps:$4 sm:$0xff]  }
 0x29e   :  { %2478 = vmatprep.mubr.bf16.mxu1 %v4406_v50  ;;  %2317 = vmatprep.mubr.bf16.mxu0 %v4407_v60 }
 0x29f   :  { %v2121_v22 = vpop.f32.mrf.mxu0 }
 0x2a1   :  { %v5259_v8 = vpop.f32.mrf.mxu0 }
 0x2a3   :  { %v2124_v14 = vpop.f32.mrf.mxu0 }
 0x2a4   :  { %v4431_v14 = vld [vmem:[#allocation3 + $0x288] ss:$16 sps:$4 sm:$0xff]  }
 0x2a5   :  { %2479 = vmatmul.mubr.bf16.gmra.mxu1 %v4408_v62  ;;  %v5261_v58 = vpop.f32.mrf.mxu0  ;;  %2318 = vmatmul.mubr.bf16.gmra.mxu0 %v4409_v19  ;;  %v4432_v19 = vld [vmem:[#allocation3 + $0x2ac] ss:$16 sps:$4 sm:$0xff]  }
 0x2a6   :  { %2486 = vmatprep.mubr.bf16.mxu1 %v4410_v12  ;;  %2325 = vmatprep.mubr.bf16.mxu0 %v4411_v23 }
 0x2a7   :  { %v2129_v61 = vpop.f32.mrf.mxu0 }
 0x2a9   :  { %v5263_v33 = vpop.f32.mrf.mxu0 }
 0x2ab   :  { %v2132_v55 = vpop.f32.mrf.mxu0 }
 0x2ac   :  { %v4433_v55 = vld [vmem:[#allocation3 + $0x2a8] ss:$16 sps:$4 sm:$0xff]  }
 0x2ad   :  { %2487 = vmatmul.mubr.bf16.gmra.mxu1 %v4412_v0  ;;  %v5265_v46 = vpop.f32.mrf.mxu0  ;;  %2326 = vmatmul.mubr.bf16.gmra.mxu0 %v4413_v37  ;;  %v4434_v37 = vld [vmem:[#allocation3 + $0x2cc] ss:$16 sps:$4 sm:$0xff]  }
 0x2ae   :  { %2494 = vmatprep.mubr.bf16.mxu1 %v4414_v59  ;;  %2333 = vmatprep.mubr.bf16.mxu0 %v4415_v45 }
 0x2af   :  { %v2137_v39 = vpop.f32.mrf.mxu0 }
 0x2b1   :  { %v5267_v10 = vpop.f32.mrf.mxu0 }
 0x2b3   :  { %v2140_v6 = vpop.f32.mrf.mxu0 }
 0x2b4   :  { %v4435_v6 = vld [vmem:[#allocation3 + $0x2c8] ss:$16 sps:$4 sm:$0xff]  }
 0x2b5   :  { %2495 = vmatmul.mubr.bf16.gmra.mxu1 %v4416_v54  ;;  %v5269_v21 = vpop.f32.mrf.mxu0  ;;  %2334 = vmatmul.mubr.bf16.gmra.mxu0 %v4417_v28  ;;  %v4436_v28 = vld [vmem:[#allocation3 + $0x2ec] ss:$16 sps:$4 sm:$0xff]  }
 0x2b6   :  { %2502 = vmatprep.mubr.bf16.mxu1 %v4418_v57  ;;  %2341 = vmatprep.mubr.bf16.mxu0 %v4419_v1 }
 0x2b7   :  { %v2145_v43 = vpop.f32.mrf.mxu0 }
 0x2b9   :  { %v5271_v27 = vpop.f32.mrf.mxu0 }
 0x2bb   :  { %v2148_v42 = vpop.f32.mrf.mxu0 }
 0x2bc   :  { %v4437_v42 = vld [vmem:[#allocation3 + $0x2e8] ss:$16 sps:$4 sm:$0xff]  }
 0x2bd   :  { %2503 = vmatmul.mubr.bf16.gmra.mxu1 %v4420_v24  ;;  %v5273_v7 = vpop.f32.mrf.mxu0  ;;  %2342 = vmatmul.mubr.bf16.gmra.mxu0 %v4421_v9  ;;  %v4438_v9 = vld [vmem:[#allocation3 + $0x30c] ss:$16 sps:$4 sm:$0xff]  }
 0x2be   :  { %2510 = vmatprep.mubr.bf16.mxu1 %v4422_v41 }
 0x2bf   :  { %v2153_v53 = vpop.f32.mrf.mxu0 }
 0x2c1   :  { %v5275_v36 = vpop.f32.mrf.mxu0 }
 0x2c3   :  { %v2156_v47 = vpop.f32.mrf.mxu0 }
 0x2c5   :  { %2511 = vmatmul.mubr.bf16.gmra.mxu1 %v4423_v15  ;;  %v5277_v16 = vpop.f32.mrf.mxu0 }
 0x2c6   :  { %2518 = vmatprep.mubr.bf16.mxu1 %v4424_v49  ;;  %v4439_v49 = vld [vmem:[#allocation3 + $0x308] ss:$16 sps:$4 sm:$0xff]  }
 0x2c7   :  { %v2161_v34 = vpop.f32.mrf.mxu0 }
 0x2c8   :  { %v5312_v34 = vld [vmem:[%s5903_s3] ss:$0 sm:$0xff] }
 0x2c9   :  { %v5279_v30 = vpop.f32.mrf.mxu0 }
 0x2cb   :  { %v2164_v26 = vpop.f32.mrf.mxu0 }
 0x2cd   :  { %2519 = vmatmul.mubr.bf16.gmra.mxu1 %v4425_v52  ;;  %v5281_v44 = vpop.f32.mrf.mxu0 }
 0x2ce   :  { %2526 = vmatprep.mubr.bf16.mxu1 %v4426_v51  ;;  %v4440_v51 = vld [vmem:[#allocation3 + $0x32c] ss:$16 sps:$4 sm:$0xff]  }
 0x2cf   :  { %v2169_v2 = vpop.f32.mrf.mxu0 }
 0x2d1   :  { %v5283_v31 = vpop.f32.mrf.mxu0 }
 0x2d3   :  { %v2172_v56 = vpop.f32.mrf.mxu0 }
 0x2d5   :  { %2527 = vmatmul.mubr.bf16.gmra.mxu1 %v4427_v48  ;;  %v5285_v13 = vpop.f32.mrf.mxu0 }
 0x2d6   :  { %2534 = vmatprep.mubr.bf16.mxu1 %v4428_v63 }
 0x2d7   :  { %v2177_v18 = vpop.f32.mrf.mxu0 }
 0x2d9   :  { %v5287_v35 = vpop.f32.mrf.mxu0 }
 0x2db   :  { %v2180_v38 = vpop.f32.mrf.mxu0 }
 0x2dd   :  { %2535 = vmatmul.mubr.bf16.gmra.mxu1 %v4429_v17  ;;  %v5289_v29 = vpop.f32.mrf.mxu0 }
 0x2de   :  { %2542 = vmatprep.mubr.bf16.mxu1 %v4430_v3 }
 0x2df   :  { %v2185_v50 = vpop.f32.mrf.mxu0 }
 0x2e1   :  { %v5291_v60 = vpop.f32.mrf.mxu0 }
 0x2e3   :  { %v2188_v22 = vpop.f32.mrf.mxu0 }
 0x2e5   :  { %2543 = vmatmul.mubr.bf16.gmra.mxu1 %v4431_v14  ;;  %v5293_v62 = vpop.f32.mrf.mxu0  ;;  %v4441_v14 = vld [vmem:[#allocation3 + $0x328] ss:$16 sps:$4 sm:$0xff]  }
 0x2e6   :  { %2550 = vmatprep.mubr.bf16.mxu1 %v4432_v19 }
 0x2e7   :  { %v2193_v12 = vpop.f32.mrf.mxu0 }
 0x2e9   :  { %v5295_v23 = vpop.f32.mrf.mxu0 }
 0x2eb   :  { %v2196_v61 = vpop.f32.mrf.mxu0 }
 0x2ed   :  { %2551 = vmatmul.mubr.bf16.gmra.mxu1 %v4433_v55  ;;  %v5297_v0 = vpop.f32.mrf.mxu0  ;;  %v4442_v55 = vld [vmem:[#allocation3 + $0x34c] ss:$16 sps:$4 sm:$0xff]  }
 0x2ee   :  { %2558 = vmatprep.mubr.bf16.mxu1 %v4434_v37 }
 0x2ef   :  { %v2201_v59 = vpop.f32.mrf.mxu0 }
 0x2f1   :  { %v5299_v45 = vpop.f32.mrf.mxu0 }
 0x2f3   :  { %v2204_v39 = vpop.f32.mrf.mxu0 }
 0x2f5   :  { %2559 = vmatmul.mubr.bf16.gmra.mxu1 %v4435_v6  ;;  %v5301_v54 = vpop.f32.mrf.mxu0 }
 0x2f6   :  { %2566 = vmatprep.mubr.bf16.mxu1 %v4436_v28 }
 0x2f7   :  { %v2209_v57 = vpop.f32.mrf.mxu0 }
 0x2f9   :  { %v5303_v1 = vpop.f32.mrf.mxu0 }
 0x2fb   :  { %v2212_v43 = vpop.f32.mrf.mxu0 }
 0x2fd   :  { %2567 = vmatmul.mubr.bf16.gmra.mxu1 %v4437_v42  ;;  %v5305_v24 = vpop.f32.mrf.mxu0 }
 0x2fe   :  { %2574 = vmatprep.mubr.bf16.mxu1 %v4438_v9 }
 0x2ff   :  { %v2217_v41 = vpop.f32.mrf.mxu0 }
 0x300   :  { %v4443_v41 = vld [vmem:[#allocation3 + $0x348] ss:$16 sps:$4 sm:$0xff]  }
 0x301   :  { %v5307_v53 = vpop.f32.mrf.mxu0 }
 0x303   :  { %v2220_v47 = vpop.f32.mrf.mxu0 }
 0x305   :  { %v2384_v15 = vpop.f32.mrf.mxu1  ;;  %2575 = vmatmul.mubr.bf16.gmra.mxu1 %v4439_v49  ;;  %v5314_v26 = vpop.f32.mrf.mxu0 }
 0x306   :  { %v2385_v52 = vadd.f32 %v2384_v15, %v5245_v32  ;;  %2582 = vmatprep.mubr.bf16.mxu1 %v4440_v51 }
 0x307   :  { %v2386_v2 = vpop.f32.mrf.mxu1  ;;  %v2225_v56 = vpop.f32.mrf.mxu0 }
 0x308   :  { %v2646_v48 = vmul.f32 %v5312_v34, %v2385_v52  ;;  %v4444_v52 = vld [vmem:[#allocation3 + $0x36c] ss:$16 sps:$4 sm:$0xff]  }
 0x309   :  { %v2387_v63 = vpop.f32.mrf.mxu1  ;;  %v5318_v18 = vpop.f32.mrf.mxu0 }
 0x30a   :  { %v2388_v38 = vadd.f32 %v2387_v63, %v5247_v5  ;;  %v2711_v17 = vsel %vm2710_vm0, %v2646_v48, 0.0 }
 0x30b   :  { %v2389_v3 = vpop.f32.mrf.mxu1  ;;  %2712 = vadd.xlane.f32.xlu0 %v2711_v17  ;;  %v2228_v50 = vpop.f32.mrf.mxu0 }
 0x30c   :  { %v2647_v22 = vmul.f32 %v5312_v34, %v2388_v38 }
 0x30d   :  { %v2392_v32 = vpop.f32.mrf.mxu1  ;;  %2583 = vmatmul.mubr.bf16.gmra.mxu1 %v4441_v14  ;;  %v5323_v19 = vpop.f32.mrf.mxu0 }
 0x30e   :  { %v2393_v12 = vadd.f32 %v2392_v32, %v5249_v4  ;;  %v2714_v61 = vsel %vm2710_vm0, %v2647_v22, 0.0  ;;  %2590 = vmatprep.mubr.bf16.mxu1 %v4442_v55  ;;  %v4445_v22 = vld [vmem:[#allocation3 + $0x368] ss:$16 sps:$4 sm:$0xff]  }
 0x30f   :  { %v2394_v37 = vpop.f32.mrf.mxu1  ;;  %2715 = vadd.xlane.f32.xlu0 %v2714_v61  ;;  %v2233_v5 = vpop.f32.mrf.mxu0  ;;  %v4446_v61 = vld [vmem:[#allocation3 + $0x38c] ss:$16 sps:$4 sm:$0xff]  }
 0x310   :  { %v2648_v59 = vmul.f32 %v5312_v34, %v2393_v12 }
 0x311   :  { %v2395_v39 = vpop.f32.mrf.mxu1  ;;  %v5328_v6 = vpop.f32.mrf.mxu0 }
 0x312   :  { %v2396_v28 = vadd.f32 %v2395_v39, %v5251_v11  ;;  %v2717_v57 = vsel %vm2710_vm0, %v2648_v59, 0.0 }
 0x313   :  { %v2397_v43 = vpop.f32.mrf.mxu1  ;;  %2718 = vadd.xlane.f32.xlu1 %v2717_v57  ;;  %v2236_v42 = vpop.f32.mrf.mxu0 }
 0x314   :  { %v2649_v4 = vmul.f32 %v5312_v34, %v2396_v28 }
 0x315   :  { %v2400_v9 = vpop.f32.mrf.mxu1  ;;  %2591 = vmatmul.mubr.bf16.gmra.mxu1 %v4443_v41  ;;  %v5333_v47 = vpop.f32.mrf.mxu0 }
 0x316   :  { %v2401_v15 = vadd.f32 %v2400_v9, %v5253_v40  ;;  %v2720_v49 = vsel %vm2710_vm0, %v2649_v4, 0.0  ;;  %2598 = vmatprep.mubr.bf16.mxu1 %v4444_v52  ;;  %v4447_v4 = vld [vmem:[#allocation3 + $0x388] ss:$16 sps:$4 sm:$0xff]  }
 0x317   :  { %v2402_v51 = vpop.f32.mrf.mxu1  ;;  %2721 = vadd.xlane.f32.xlu1 %v2720_v49  ;;  %v2241_v11 = vpop.f32.mrf.mxu0  ;;  %v4448_v49 = vld [vmem:[#allocation3 + $0x3ac] ss:$16 sps:$4 sm:$0xff]  }
 0x318   :  { %v2650_v2 = vmul.f32 %v5312_v34, %v2401_v15 }
 0x319   :  { %v2403_v56 = vpop.f32.mrf.mxu1  ;;  %v5338_v48 = vpop.f32.mrf.mxu0 }
 0x31a   :  { %v2404_v63 = vadd.f32 %v2403_v56, %v5255_v20  ;;  %v2723_v38 = vsel %vm2710_vm0, %v2650_v2, 0.0 }
 0x31b   :  { %v2405_v17 = vpop.f32.mrf.mxu1  ;;  %2724 = vadd.xlane.f32.xlu0 %v2723_v38  ;;  %v2244_v3 = vpop.f32.mrf.mxu0 }
 0x31c   :  { %v2651_v40 = vmul.f32 %v5312_v34, %v2404_v63 }
 0x31d   :  { %v2408_v50 = vpop.f32.mrf.mxu1  ;;  %2599 = vmatmul.mubr.bf16.gmra.mxu1 %v4445_v22  ;;  %v5343_v32 = vpop.f32.mrf.mxu0 }
 0x31e   :  { %v2409_v14 = vadd.f32 %v2408_v50, %v5257_v25  ;;  %v2726_v12 = vsel %vm2710_vm0, %v2651_v40, 0.0  ;;  %2606 = vmatprep.mubr.bf16.mxu1 %v4446_v61  ;;  %v4449_v40 = vld [vmem:[#allocation3 + $0x3a8] ss:$16 sps:$4 sm:$0xff]  }
 0x31f   :  { %v2410_v55 = vpop.f32.mrf.mxu1  ;;  %2727 = vadd.xlane.f32.xlu1 %v2726_v12  ;;  %v2249_v20 = vpop.f32.mrf.mxu0  ;;  %v4450_v12 = vld [vmem:[#allocation3 + $0x3cc] ss:$16 sps:$4 sm:$0xff]  }
 0x320   :  { %v2652_v37 = vmul.f32 %v5312_v34, %v2409_v14 }
 0x321   :  { %v2411_v5 = vpop.f32.mrf.mxu1  ;;  %v5348_v59 = vpop.f32.mrf.mxu0 }
 0x322   :  { %v2412_v39 = vadd.f32 %v2411_v5, %v5259_v8  ;;  %v2729_v28 = vsel %vm2710_vm0, %v2652_v37, 0.0 }
 0x323   :  { %v2413_v57 = vpop.f32.mrf.mxu1  ;;  %2730 = vadd.xlane.f32.xlu0 %v2729_v28  ;;  %v2252_v43 = vpop.f32.mrf.mxu0 }
 0x324   :  { %v2653_v25 = vmul.f32 %v5312_v34, %v2412_v39 }
 0x325   :  { %v2416_v42 = vpop.f32.mrf.mxu1  ;;  %2607 = vmatmul.mubr.bf16.gmra.mxu1 %v4447_v4  ;;  %v5353_v9 = vpop.f32.mrf.mxu0 }
 0x326   :  { %v2417_v41 = vadd.f32 %v2416_v42, %v5261_v58  ;;  %v2732_v15 = vsel %vm2710_vm0, %v2653_v25, 0.0  ;;  %2614 = vmatprep.mubr.bf16.mxu1 %v4448_v49  ;;  %v4451_v25 = vld [vmem:[#allocation3 + $0x3c8] ss:$16 sps:$4 sm:$0xff]  }
 0x327   :  { %v2418_v52 = vpop.f32.mrf.mxu1  ;;  %2733 = vadd.xlane.f32.xlu1 %v2732_v15  ;;  %v2257_v8 = vpop.f32.mrf.mxu0  ;;  %v4452_v15 = vld [vmem:[#allocation3 + $0x3ec] ss:$16 sps:$4 sm:$0xff]  }
 0x328   :  { %v2654_v51 = vmul.f32 %v5312_v34, %v2417_v41 }
 0x329   :  { %v2419_v11 = vpop.f32.mrf.mxu1  ;;  %v5358_v2 = vpop.f32.mrf.mxu0 }
 0x32a   :  { %v2420_v56 = vadd.f32 %v2419_v11, %v5263_v33  ;;  %v2735_v63 = vsel %vm2710_vm0, %v2654_v51, 0.0 }
 0x32b   :  { %v2421_v38 = vpop.f32.mrf.mxu1  ;;  %2736 = vadd.xlane.f32.xlu0 %v2735_v63  ;;  %v2260_v17 = vpop.f32.mrf.mxu0 }
 0x32c   :  { %v2655_v58 = vmul.f32 %v5312_v34, %v2420_v56 }
 0x32d   :  { %v2424_v3 = vpop.f32.mrf.mxu1  ;;  %2615 = vmatmul.mubr.bf16.gmra.mxu1 %v4449_v40  ;;  %v5363_v50 = vpop.f32.mrf.mxu0 }
 0x32e   :  { %v2425_v22 = vadd.f32 %v2424_v3, %v5265_v46  ;;  %v2738_v14 = vsel %vm2710_vm0, %v2655_v58, 0.0  ;;  %2622 = vmatprep.mubr.bf16.mxu1 %v4450_v12  ;;  %v4453_v58 = vld [vmem:[#allocation3 + $0x3e8] ss:$16 sps:$4 sm:$0xff]  }
 0x32f   :  { %v2426_v61 = vpop.f32.mrf.mxu1  ;;  %2739 = vadd.xlane.f32.xlu1 %v2738_v14  ;;  %v2265_v33 = vpop.f32.mrf.mxu0 }
 0x330   :  { %v2656_v55 = vmul.f32 %v5312_v34, %v2425_v22 }
 0x331   :  { %v2427_v20 = vpop.f32.mrf.mxu1  ;;  %v5368_v37 = vpop.f32.mrf.mxu0 }
 0x332   :  { %v2428_v5 = vadd.f32 %v2427_v20, %v5267_v10  ;;  %v2741_v39 = vsel %vm2710_vm0, %v2656_v55, 0.0 }
 0x333   :  { %v2429_v28 = vpop.f32.mrf.mxu1  ;;  %2742 = vadd.xlane.f32.xlu0 %v2741_v39  ;;  %v2268_v57 = vpop.f32.mrf.mxu0 }
 0x334   :  { %v2657_v46 = vmul.f32 %v5312_v34, %v2428_v5 }
 0x335   :  { %v2432_v43 = vpop.f32.mrf.mxu1  ;;  %2623 = vmatmul.mubr.bf16.gmra.mxu1 %v4451_v25  ;;  %v5373_v42 = vpop.f32.mrf.mxu0 }
 0x336   :  { %v2433_v4 = vadd.f32 %v2432_v43, %v5269_v21  ;;  %v2744_v41 = vsel %vm2710_vm0, %v2657_v46, 0.0  ;;  %2630 = vmatprep.mubr.bf16.mxu1 %v4452_v15 }
 0x337   :  { %v2434_v49 = vpop.f32.mrf.mxu1  ;;  %2745 = vadd.xlane.f32.xlu1 %v2744_v41  ;;  %v2273_v10 = vpop.f32.mrf.mxu0 }
 0x338   :  { %v2658_v52 = vmul.f32 %v5312_v34, %v2433_v4 }
 0x339   :  { %v2435_v8 = vpop.f32.mrf.mxu1  ;;  %v5378_v51 = vpop.f32.mrf.mxu0 }
 0x33a   :  { %v2436_v11 = vadd.f32 %v2435_v8, %v5271_v27  ;;  %v2747_v56 = vsel %vm2710_vm0, %v2658_v52, 0.0 }
 0x33b   :  { %v2437_v63 = vpop.f32.mrf.mxu1  ;;  %2748 = vadd.xlane.f32.xlu0 %v2747_v56  ;;  %v2276_v38 = vpop.f32.mrf.mxu0 }
 0x33c   :  { %v2659_v21 = vmul.f32 %v5312_v34, %v2436_v11 }
 0x33d   :  { %v2440_v17 = vpop.f32.mrf.mxu1  ;;  %2631 = vmatmul.mubr.bf16.gmra.mxu1 %v4453_v58  ;;  %v5383_v3 = vpop.f32.mrf.mxu0 }
 0x33e   :  { %v2441_v40 = vadd.f32 %v2440_v17, %v5273_v7  ;;  %v2750_v22 = vsel %vm2710_vm0, %v2659_v21, 0.0 }
 0x33f   :  { %v2442_v14 = vpop.f32.mrf.mxu1  ;;  %2751 = vadd.xlane.f32.xlu1 %v2750_v22  ;;  %v2281_v12 = vpop.f32.mrf.mxu0 }
 0x340   :  { %v2660_v27 = vmul.f32 %v5312_v34, %v2441_v40 }
 0x341   :  { %v2443_v61 = vpop.f32.mrf.mxu1  ;;  %v5388_v33 = vpop.f32.mrf.mxu0 }
 0x342   :  { %v2444_v55 = vadd.f32 %v2443_v61, %v5275_v36  ;;  %v2753_v20 = vsel %vm2710_vm0, %v2660_v27, 0.0 }
 0x343   :  { %v2445_v5 = vpop.f32.mrf.mxu1  ;;  %2754 = vadd.xlane.f32.xlu0 %v2753_v20  ;;  %v2284_v39 = vpop.f32.mrf.mxu0 }
 0x344   :  { %v2661_v28 = vmul.f32 %v5312_v34, %v2444_v55 }
 0x345   :  { %v2448_v7 = vpop.f32.mrf.mxu1  ;;  %v5393_v57 = vpop.f32.mrf.mxu0 }
 0x346   :  { %v2449_v46 = vadd.f32 %v2448_v7, %v5277_v16  ;;  %v2756_v43 = vsel %vm2710_vm0, %v2661_v28, 0.0 }
 0x347   :  { %v2450_v25 = vpop.f32.mrf.mxu1  ;;  %2757 = vadd.xlane.f32.xlu1 %v2756_v43  ;;  %v2289_v4 = vpop.f32.mrf.mxu0 }
 0x348   :  { %v2662_v41 = vmul.f32 %v5312_v34, %v2449_v46 }
 0x349   :  { %v2451_v36 = vpop.f32.mrf.mxu1  ;;  %v5398_v15 = vpop.f32.mrf.mxu0 }
 0x34a   :  { %v2452_v49 = vadd.f32 %v2451_v36, %v5279_v30  ;;  %v2759_v10 = vsel %vm2710_vm0, %v2662_v41, 0.0 }
 0x34b   :  { %v2453_v52 = vpop.f32.mrf.mxu1  ;;  %2760 = vadd.xlane.f32.xlu0 %v2759_v10  ;;  %v2292_v8 = vpop.f32.mrf.mxu0 }
 0x34c   :  { %v2663_v11 = vmul.f32 %v5312_v34, %v2452_v49 }
 0x34d   :  { %v2456_v16 = vpop.f32.mrf.mxu1  ;;  %v5403_v56 = vpop.f32.mrf.mxu0 }
 0x34e   :  { %v2457_v63 = vadd.f32 %v2456_v16, %v5281_v44  ;;  %v2762_v38 = vsel %vm2710_vm0, %v2663_v11, 0.0 }
 0x34f   :  { %v2458_v21 = vpop.f32.mrf.mxu1  ;;  %2763 = vadd.xlane.f32.xlu1 %v2762_v38  ;;  %v2297_v17 = vpop.f32.mrf.mxu0 }
 0x350   :  { %v2664_v58 = vmul.f32 %v5312_v34, %v2457_v63 }
 0x351   :  { %v2459_v30 = vpop.f32.mrf.mxu1  ;;  %v5408_v40 = vpop.f32.mrf.mxu0 }
 0x352   :  { %v2460_v22 = vadd.f32 %v2459_v30, %v5283_v31  ;;  %v2765_v14 = vsel %vm2710_vm0, %v2664_v58, 0.0 }
 0x353   :  { %v2461_v12 = vpop.f32.mrf.mxu1  ;;  %2766 = vadd.xlane.f32.xlu0 %v2765_v14  ;;  %v2300_v27 = vpop.f32.mrf.mxu0 }
 0x354   :  { %v2665_v61 = vmul.f32 %v5312_v34, %v2460_v22 }
 0x355   :  { %v2464_v44 = vpop.f32.mrf.mxu1  ;;  %v5413_v55 = vpop.f32.mrf.mxu0 }
 0x356   :  { %v2465_v20 = vadd.f32 %v2464_v44, %v5285_v13  ;;  %v2768_v5 = vsel %vm2710_vm0, %v2665_v61, 0.0 }
 0x357   :  { %v2466_v39 = vpop.f32.mrf.mxu1  ;;  %2769 = vadd.xlane.f32.xlu1 %v2768_v5  ;;  %v2305_v28 = vpop.f32.mrf.mxu0 }
 0x358   :  { %v2666_v7 = vmul.f32 %v5312_v34, %v2465_v20 }
 0x359   :  { %v2467_v31 = vpop.f32.mrf.mxu1  ;;  %v5418_v46 = vpop.f32.mrf.mxu0 }
 0x35a   :  { %v2468_v43 = vadd.f32 %v2467_v31, %v5287_v35  ;;  %v2771_v25 = vsel %vm2710_vm0, %v2666_v7, 0.0 }
 0x35b   :  { %v2469_v4 = vpop.f32.mrf.mxu1  ;;  %2772 = vadd.xlane.f32.xlu0 %v2771_v25  ;;  %v2308_v41 = vpop.f32.mrf.mxu0 }
 0x35c   :  { %v2667_v36 = vmul.f32 %v5312_v34, %v2468_v43 }
 0x35d   :  { %v2472_v13 = vpop.f32.mrf.mxu1  ;;  %v5423_v49 = vpop.f32.mrf.mxu0 }
 0x35e   :  { %v2473_v10 = vadd.f32 %v2472_v13, %v5289_v29  ;;  %v2774_v52 = vsel %vm2710_vm0, %v2667_v36, 0.0 }
 0x35f   :  { %v2474_v8 = vpop.f32.mrf.mxu1  ;;  %2775 = vadd.xlane.f32.xlu1 %v2774_v52  ;;  %v2313_v11 = vpop.f32.mrf.mxu0 }
 0x360   :  { %v2668_v16 = vmul.f32 %v5312_v34, %v2473_v10 }
 0x361   :  { %v2475_v35 = vpop.f32.mrf.mxu1  ;;  %v5428_v63 = vpop.f32.mrf.mxu0 }
 0x362   :  { %v2476_v38 = vadd.f32 %v2475_v35, %v5291_v60  ;;  %v2777_v21 = vsel %vm2710_vm0, %v2668_v16, 0.0 }
 0x363   :  { %v2477_v17 = vpop.f32.mrf.mxu1  ;;  %2778 = vadd.xlane.f32.xlu0 %v2777_v21  ;;  %v2316_v58 = vpop.f32.mrf.mxu0 }
 0x364   :  { %v2669_v30 = vmul.f32 %v5312_v34, %v2476_v38 }
 0x365   :  { %v2480_v29 = vpop.f32.mrf.mxu1  ;;  %v5433_v22 = vpop.f32.mrf.mxu0 }
 0x366   :  { %v2481_v14 = vadd.f32 %v2480_v29, %v5293_v62  ;;  %v2780_v12 = vsel %vm2710_vm0, %v2669_v30, 0.0 }
 0x367   :  { %v2482_v27 = vpop.f32.mrf.mxu1  ;;  %2781 = vadd.xlane.f32.xlu1 %v2780_v12  ;;  %v2321_v61 = vpop.f32.mrf.mxu0 }
 0x368   :  { %v2670_v44 = vmul.f32 %v5312_v34, %v2481_v14 }
 0x369   :  { %v2483_v60 = vpop.f32.mrf.mxu1  ;;  %v5438_v20 = vpop.f32.mrf.mxu0 }
 0x36a   :  { %v2484_v5 = vadd.f32 %v2483_v60, %v5295_v23  ;;  %v2783_v39 = vsel %vm2710_vm0, %v2670_v44, 0.0 }
 0x36b   :  { %v2485_v28 = vpop.f32.mrf.mxu1  ;;  %2784 = vadd.xlane.f32.xlu0 %v2783_v39  ;;  %v2324_v7 = vpop.f32.mrf.mxu0 }
 0x36c   :  { %v2671_v31 = vmul.f32 %v5312_v34, %v2484_v5 }
 0x36d   :  { %v2488_v62 = vpop.f32.mrf.mxu1  ;;  %v5443_v43 = vpop.f32.mrf.mxu0 }
 0x36e   :  { %v2489_v25 = vadd.f32 %v2488_v62, %v5297_v0  ;;  %v2786_v4 = vsel %vm2710_vm0, %v2671_v31, 0.0 }
 0x36f   :  { %v2490_v41 = vpop.f32.mrf.mxu1  ;;  %2787 = vadd.xlane.f32.xlu1 %v2786_v4  ;;  %v2329_v36 = vpop.f32.mrf.mxu0 }
 0x370   :  { %v2672_v13 = vmul.f32 %v5312_v34, %v2489_v25 }
 0x371   :  { %v2491_v23 = vpop.f32.mrf.mxu1  ;;  %v5448_v10 = vpop.f32.mrf.mxu0 }
 0x372   :  { %v2492_v52 = vadd.f32 %v2491_v23, %v5299_v45  ;;  %v2789_v8 = vsel %vm2710_vm0, %v2672_v13, 0.0 }
 0x373   :  { %v2493_v11 = vpop.f32.mrf.mxu1  ;;  %2790 = vadd.xlane.f32.xlu0 %v2789_v8  ;;  %v2332_v16 = vpop.f32.mrf.mxu0 }
 0x374   :  { %v2673_v35 = vmul.f32 %v5312_v34, %v2492_v52 }
 0x375   :  { %v2496_v0 = vpop.f32.mrf.mxu1  ;;  %v5453_v38 = vpop.f32.mrf.mxu0 }
 0x376   :  { %v2497_v21 = vadd.f32 %v2496_v0, %v5301_v54  ;;  %v2792_v17 = vsel %vm2710_vm0, %v2673_v35, 0.0 }
 0x377   :  { %v2498_v58 = vpop.f32.mrf.mxu1  ;;  %2793 = vadd.xlane.f32.xlu1 %v2792_v17  ;;  %v2337_v30 = vpop.f32.mrf.mxu0 }
 0x378   :  { %v2674_v29 = vmul.f32 %v5312_v34, %v2497_v21 }
 0x379   :  { %v2499_v45 = vpop.f32.mrf.mxu1  ;;  %v5458_v14 = vpop.f32.mrf.mxu0 }
 0x37a   :  { %v2500_v12 = vadd.f32 %v2499_v45, %v5303_v1  ;;  %v2795_v27 = vsel %vm2710_vm0, %v2674_v29, 0.0 }
 0x37b   :  { %v2501_v61 = vpop.f32.mrf.mxu1  ;;  %2796 = vadd.xlane.f32.xlu0 %v2795_v27  ;;  %v2340_v44 = vpop.f32.mrf.mxu0 }
 0x37c   :  { %v2675_v60 = vmul.f32 %v5312_v34, %v2500_v12 }
 0x37d   :  { %v2504_v54 = vpop.f32.mrf.mxu1  ;;  %v5463_v5 = vpop.f32.mrf.mxu0 }
 0x37e   :  { %v2505_v39 = vadd.f32 %v2504_v54, %v5305_v24  ;;  %v2798_v28 = vsel %vm2710_vm0, %v2675_v60, 0.0 }
 0x37f   :  { %v2506_v7 = vpop.f32.mrf.mxu1  ;;  %2799 = vadd.xlane.f32.xlu1 %v2798_v28  ;;  %v2345_v31 = vpop.f32.mrf.mxu0 }
 0x380   :  { %v2676_v62 = vmul.f32 %v5312_v34, %v2505_v39 }
 0x381   :  { %v2507_v1 = vpop.f32.mrf.mxu1  ;;  %v5468_v25 = vpop.f32.mrf.mxu0 }
 0x382   :  { %v2508_v4 = vadd.f32 %v2507_v1, %v5307_v53  ;;  %v2801_v41 = vsel %vm2710_vm0, %v2676_v62, 0.0 }
 0x383   :  { %v2509_v36 = vpop.f32.mrf.mxu1  ;;  %2802 = vadd.xlane.f32.xlu0 %v2801_v41  ;;  %v2348_v13 = vpop.f32.mrf.mxu0 }
 0x384   :  { %v2677_v23 = vmul.f32 %v5312_v34, %v2508_v4 }
 0x385   :  { %v2512_v24 = vpop.f32.mrf.mxu1 }
 0x386   :  { %v2513_v52 = vadd.f32 %v2512_v24, %v5314_v26  ;;  %v2804_v8 = vsel %vm2710_vm0, %v2677_v23, 0.0 }
 0x387   :  { %v2514_v11 = vpop.f32.mrf.mxu1  ;;  %2805 = vadd.xlane.f32.xlu1 %v2804_v8 }
 0x388   :  { %v2678_v16 = vmul.f32 %v5312_v34, %v2513_v52 }
 0x389   :  { %v2515_v35 = vpop.f32.mrf.mxu1 }
 0x38a   :  { %v2516_v0 = vadd.f32 %v2515_v35, %v5318_v18  ;;  %v2807_v53 = vsel %vm2710_vm0, %v2678_v16, 0.0  ;;  %v5486_v18 = vstv %s5904_s4 }
 0x38b   :  { %v2517_v21 = vpop.f32.mrf.mxu1  ;;  %2808 = vadd.xlane.f32.xlu0 %v2807_v53 }
 0x38c   :  { %v2679_v17 = vmul.f32 %v5312_v34, %v2516_v0 }
 0x38d   :  { %v2520_v58 = vpop.f32.mrf.mxu1 }
 0x38e   :  { %v2521_v30 = vadd.f32 %v2520_v58, %v5323_v19  ;;  %v2810_v26 = vsel %vm2710_vm0, %v2679_v17, 0.0 }
 0x38f   :  { %v2522_v29 = vpop.f32.mrf.mxu1  ;;  %2811 = vadd.xlane.f32.xlu1 %v2810_v26 }
 0x390   :  { %v2680_v45 = vmul.f32 %v5312_v34, %v2521_v30 }
 0x391   :  { %v2523_v12 = vpop.f32.mrf.mxu1 }
 0x392   :  { %v2524_v27 = vadd.f32 %v2523_v12, %v5328_v6  ;;  %v2813_v61 = vsel %vm2710_vm0, %v2680_v45, 0.0 }
 0x393   :  { %v2525_v44 = vpop.f32.mrf.mxu1  ;;  %2814 = vadd.xlane.f32.xlu0 %v2813_v61 }
 0x394   :  { %v2713_v60 = vpop.xlane.xlu0 %2712  ;;  %v2681_v19 = vmul.f32 %v5312_v34, %v2524_v27 }
 0x395   :  { %v2528_v54 = vpop.f32.mrf.mxu1  ;;  %v2905_v39 = vadd.f32 %v5486_v18, %v2713_v60 }
 0x396   :  { %v2529_v28 = vadd.f32 %v2528_v54, %v5333_v47  ;;  %v2816_v7 = vsel %vm2710_vm0, %v2681_v19, 0.0 }
 0x397   :  { %v3649_v6 = vmul.f32 -1.442695, %v2905_v39  ;;  %v2530_v31 = vpop.f32.mrf.mxu1  ;;  %2817 = vadd.xlane.f32.xlu1 %v2816_v7 }
 0x398   :  { %v2716_v62 = vpop.xlane.xlu0 %2715  ;;  %v2682_v1 = vmul.f32 %v5312_v34, %v2529_v28 }
 0x399   :  { %4069 = vpow2.f32 %v3649_v6  ;;  %v2531_v4 = vpop.f32.mrf.mxu1  ;;  %v2906_v41 = vadd.f32 %v5486_v18, %v2716_v62 }
 0x39a   :  { %v2532_v36 = vadd.f32 %v2531_v4, %v5338_v48  ;;  %v2819_v13 = vsel %vm2710_vm0, %v2682_v1, 0.0 }
 0x39b   :  { %v3650_v23 = vmul.f32 -1.442695, %v2906_v41  ;;  %v2533_v24 = vpop.f32.mrf.mxu1  ;;  %2820 = vadd.xlane.f32.xlu0 %v2819_v13 }
 0x39c   :  { %v2719_v47 = vpop.xlane.xlu1 %2718  ;;  %v2683_v52 = vmul.f32 %v5312_v34, %v2532_v36 }
 0x39d   :  { %4071 = vpow2.f32 %v3650_v23  ;;  %v2536_v8 = vpop.f32.mrf.mxu1  ;;  %v2907_v11 = vadd.f32 %v5486_v18, %v2719_v47 }
 0x39e   :  { %v2537_v16 = vadd.f32 %v2536_v8, %v5343_v32  ;;  %v2822_v35 = vsel %vm2710_vm0, %v2683_v52, 0.0 }
 0x39f   :  { %v3651_v0 = vmul.f32 -1.442695, %v2907_v11  ;;  %v2538_v53 = vpop.f32.mrf.mxu1  ;;  %2823 = vadd.xlane.f32.xlu1 %v2822_v35 }
 0x3a0   :  { %v2722_v48 = vpop.xlane.xlu1 %2721  ;;  %v2684_v21 = vmul.f32 %v5312_v34, %v2537_v16 }
 0x3a1   :  { %4073 = vpow2.f32 %v3651_v0  ;;  %v2539_v17 = vpop.f32.mrf.mxu1  ;;  %v2908_v58 = vadd.f32 %v5486_v18, %v2722_v48 }
 0x3a2   :  { %v2540_v30 = vadd.f32 %v2539_v17, %v5348_v59  ;;  %v2825_v26 = vsel %vm2710_vm0, %v2684_v21, 0.0 }
 0x3a3   :  { %v3652_v29 = vmul.f32 -1.442695, %v2908_v58  ;;  %v2541_v45 = vpop.f32.mrf.mxu1  ;;  %2826 = vadd.xlane.f32.xlu0 %v2825_v26 }
 0x3a4   :  { %v2685_v32 = vmul.f32 %v5312_v34, %v2540_v30  ;;  %v2725_v12 = vpop.xlane.xlu0 %2724 }
 0x3a5   :  { %4075 = vpow2.f32 %v3652_v29  ;;  %v2544_v27 = vpop.f32.mrf.mxu1  ;;  %v2909_v61 = vadd.f32 %v5486_v18, %v2725_v12 }
 0x3a6   :  { %v4070_v44 = vpop.eup %4069  ;;  %v2545_v60 = vadd.f32 %v2544_v27, %v5353_v9  ;;  %v2828_v19 = vsel %vm2710_vm0, %v2685_v32, 0.0 }
 0x3a7   :  { %v3161_v54 = vadd.f32 1.0, %v4070_v44  ;;  %v2546_v39 = vpop.f32.mrf.mxu1  ;;  %2829 = vadd.xlane.f32.xlu1 %v2828_v19  ;;  %v3653_v59 = vmul.f32 -1.442695, %v2909_v61 }
 0x3a8   :  { %v2728_v28 = vpop.xlane.xlu1 %2727  ;;  %v2686_v7 = vmul.f32 %v5312_v34, %v2545_v60 }
 0x3a9   :  { %4077 = vrcp.f32 %v3161_v54  ;;  %v2547_v6 = vpop.f32.mrf.mxu1  ;;  %v2910_v31 = vadd.f32 %v5486_v18, %v2728_v28 }
 0x3aa   :  { %v4072_v62 = vpop.eup %4071  ;;  %v2548_v1 = vadd.f32 %v2547_v6, %v5358_v2  ;;  %4079 = vpow2.f32 %v3653_v59  ;;  %v2831_v4 = vsel %vm2710_vm0, %v2686_v7, 0.0 }
 0x3ab   :  { %v3162_v9 = vadd.f32 1.0, %v4072_v62  ;;  %v3654_v41 = vmul.f32 -1.442695, %v2910_v31  ;;  %v2549_v36 = vpop.f32.mrf.mxu1  ;;  %2832 = vadd.xlane.f32.xlu0 %v2831_v4 }
 0x3ac   :  { %v2687_v13 = vmul.f32 %v5312_v34, %v2548_v1  ;;  %v2731_v23 = vpop.xlane.xlu0 %2730 }
 0x3ad   :  { %4081 = vrcp.f32 %v3162_v9  ;;  %v2552_v24 = vpop.f32.mrf.mxu1  ;;  %v2911_v47 = vadd.f32 %v5486_v18, %v2731_v23 }
 0x3ae   :  { %v4074_v52 = vpop.eup %4073  ;;  %4083 = vpow2.f32 %v3654_v41  ;;  %v2553_v8 = vadd.f32 %v2552_v24, %v5363_v50  ;;  %v2834_v2 = vsel %vm2710_vm0, %v2687_v13, 0.0 }
 0x3af   :  { %v3163_v11 = vadd.f32 1.0, %v4074_v52  ;;  %v2554_v16 = vpop.f32.mrf.mxu1  ;;  %2835 = vadd.xlane.f32.xlu1 %v2834_v2  ;;  %v3655_v35 = vmul.f32 -1.442695, %v2911_v47 }
 0x3b0   :  { %v2734_v0 = vpop.xlane.xlu1 %2733  ;;  %v2688_v53 = vmul.f32 %v5312_v34, %v2553_v8 }
 0x3b1   :  { %4085 = vrcp.f32 %v3163_v11  ;;  %v2555_v48 = vpop.f32.mrf.mxu1  ;;  %v2912_v21 = vadd.f32 %v5486_v18, %v2734_v0 }
 0x3b2   :  { %v4076_v17 = vpop.eup %4075  ;;  %v2556_v58 = vadd.f32 %v2555_v48, %v5368_v37  ;;  %4087 = vpow2.f32 %v3655_v35  ;;  %v2837_v30 = vsel %vm2710_vm0, %v2688_v53, 0.0 }
 0x3b3   :  { %v3164_v50 = vadd.f32 1.0, %v4076_v17  ;;  %v3656_v26 = vmul.f32 -1.442695, %v2912_v21  ;;  %v2557_v29 = vpop.f32.mrf.mxu1  ;;  %2838 = vadd.xlane.f32.xlu0 %v2837_v30 }
 0x3b4   :  { %v2689_v45 = vmul.f32 %v5312_v34, %v2556_v58  ;;  %v2737_v32 = vpop.xlane.xlu0 %2736 }
 0x3b5   :  { %4089 = vrcp.f32 %v3164_v50  ;;  %v2560_v12 = vpop.f32.mrf.mxu1  ;;  %v2913_v27 = vadd.f32 %v5486_v18, %v2737_v32 }
 0x3b6   :  { %v4078_v61 = vpop.eup %4077  ;;  %4091 = vpow2.f32 %v3656_v26  ;;  %v2561_v44 = vadd.f32 %v2560_v12, %v5373_v42  ;;  %v2840_v37 = vsel %vm2710_vm0, %v2689_v45, 0.0 }
 0x3b7   :  { %v4080_v60 = vpop.eup %4079  ;;  %3354 = vst.msk [vmem:[%s5905_s5] sm:$0xff] %vm3353_vm1, %v4078_v61  ;;  %v2562_v19 = vpop.f32.mrf.mxu1  ;;  %2841 = vadd.xlane.f32.xlu1 %v2840_v37  ;;  %v3657_v54 = vmul.f32 -1.442695, %v2913_v27 }
 0x3b8   :  { %v3165_v39 = vadd.f32 1.0, %v4080_v60  ;;  %v2740_v59 = vpop.xlane.xlu1 %2739  ;;  %v2690_v28 = vmul.f32 %v5312_v34, %v2561_v44 }
 0x3b9   :  { %v2563_v7 = vpop.f32.mrf.mxu1  ;;  %4093 = vpow2.f32 %v3657_v54  ;;  %v2914_v6 = vadd.f32 %v5486_v18, %v2740_v59 }
 0x3ba   :  { %v4082_v42 = vpop.eup %4081  ;;  %4095 = vrcp.f32 %v3165_v39  ;;  %v2564_v31 = vadd.f32 %v2563_v7, %v5378_v51  ;;  %v2843_v62 = vsel %vm2710_vm0, %v2690_v28, 0.0 }
 0x3bb   :  { %v4084_v1 = vpop.eup %4083  ;;  %3355 = vst.msk [vmem:[%s5905_s5 + $0x8] sm:$0xff] %vm3353_vm1, %v4082_v42  ;;  %v3658_v4 = vmul.f32 -1.442695, %v2914_v6  ;;  %v2565_v9 = vpop.f32.mrf.mxu1  ;;  %2844 = vadd.xlane.f32.xlu0 %v2843_v62 }
 0x3bc   :  { %v3166_v41 = vadd.f32 1.0, %v4084_v1  ;;  %v2691_v36 = vmul.f32 %v5312_v34, %v2564_v31  ;;  %v2743_v13 = vpop.xlane.xlu0 %2742 }
 0x3bd   :  { %4097 = vpow2.f32 %v3658_v4  ;;  %v2568_v23 = vpop.f32.mrf.mxu1  ;;  %v2915_v24 = vadd.f32 %v5486_v18, %v2743_v13 }
 0x3be   :  { %v4086_v51 = vpop.eup %4085  ;;  %4099 = vrcp.f32 %v3166_v41  ;;  %v2569_v47 = vadd.f32 %v2568_v23, %v5383_v3  ;;  %v2846_v52 = vsel %vm2710_vm0, %v2691_v36, 0.0 }
 0x3bf   :  { %v4088_v8 = vpop.eup %4087  ;;  %3356 = vst.msk [vmem:[%s5905_s5 + $0x10] sm:$0xff] %vm3353_vm1, %v4086_v51  ;;  %v2570_v2 = vpop.f32.mrf.mxu1  ;;  %2847 = vadd.xlane.f32.xlu1 %v2846_v52  ;;  %v3659_v11 = vmul.f32 -1.442695, %v2915_v24 }
 0x3c0   :  { %v3167_v16 = vadd.f32 1.0, %v4088_v8  ;;  %v2746_v35 = vpop.xlane.xlu1 %2745  ;;  %v2692_v0 = vmul.f32 %v5312_v34, %v2569_v47 }
 0x3c1   :  { %v2571_v53 = vpop.f32.mrf.mxu1  ;;  %4101 = vpow2.f32 %v3659_v11  ;;  %v2916_v48 = vadd.f32 %v5486_v18, %v2746_v35 }
 0x3c2   :  { %v4090_v3 = vpop.eup %4089  ;;  %4103 = vrcp.f32 %v3167_v16  ;;  %v2572_v21 = vadd.f32 %v2571_v53, %v5388_v33  ;;  %v2849_v17 = vsel %vm2710_vm0, %v2692_v0, 0.0 }
 0x3c3   :  { %v4092_v58 = vpop.eup %4091  ;;  %3357 = vst.msk [vmem:[%s5905_s5 + $0x18] sm:$0xff] %vm3353_vm1, %v4090_v3  ;;  %v3660_v30 = vmul.f32 -1.442695, %v2916_v48  ;;  %v2573_v50 = vpop.f32.mrf.mxu1  ;;  %2850 = vadd.xlane.f32.xlu0 %v2849_v17 }
 0x3c4   :  { %v3168_v26 = vadd.f32 1.0, %v4092_v58  ;;  %v2693_v29 = vmul.f32 %v5312_v34, %v2572_v21  ;;  %v2749_v45 = vpop.xlane.xlu0 %2748 }
 0x3c5   :  { %4105 = vpow2.f32 %v3660_v30  ;;  %v2576_v32 = vpop.f32.mrf.mxu1  ;;  %v2917_v12 = vadd.f32 %v5486_v18, %v2749_v45 }
 0x3c6   :  { %v4094_v33 = vpop.eup %4093  ;;  %4107 = vrcp.f32 %v3168_v26  ;;  %v2577_v27 = vadd.f32 %v2576_v32, %v5393_v57  ;;  %v2852_v61 = vsel %vm2710_vm0, %v2693_v29, 0.0 }
 0x3c7   :  { %v4096_v44 = vpop.eup %4095  ;;  %v3169_v37 = vadd.f32 1.0, %v4094_v33  ;;  %v2578_v60 = vpop.f32.mrf.mxu1  ;;  %2853 = vadd.xlane.f32.xlu1 %v2852_v61  ;;  %v3661_v19 = vmul.f32 -1.442695, %v2917_v12 }
 0x3c8   :  { %3358 = vst.msk [vmem:[%s5905_s5 + $0x20] sm:$0xff] %vm3353_vm1, %v4096_v44  ;;  %v2752_v54 = vpop.xlane.xlu1 %2751  ;;  %v2694_v39 = vmul.f32 %v5312_v34, %v2577_v27  ;;  %v5596_v27 = vld [vmem:[%s5903_s3] ss:$0 sm:$0xff] }
 0x3c9   :  { %4109 = vrcp.f32 %v3169_v37  ;;  %v2579_v59 = vpop.f32.mrf.mxu1  ;;  %v2918_v28 = vadd.f32 %v5486_v18, %v2752_v54 }
 0x3ca   :  { %v4098_v57 = vpop.eup %4097  ;;  %v2580_v7 = vadd.f32 %v2579_v59, %v5398_v15  ;;  %4111 = vpow2.f32 %v3661_v19  ;;  %v2855_v6 = vsel %vm2710_vm0, %v2694_v39, 0.0 }
 0x3cb   :  { %v4100_v42 = vpop.eup %4099  ;;  %v3170_v31 = vadd.f32 1.0, %v4098_v57  ;;  %v3662_v62 = vmul.f32 -1.442695, %v2918_v28  ;;  %v2581_v1 = vpop.f32.mrf.mxu1  ;;  %2856 = vadd.xlane.f32.xlu0 %v2855_v6 }
 0x3cc   :  { %3359 = vst.msk [vmem:[%s5905_s5 + $0x28] sm:$0xff] %vm3353_vm1, %v4100_v42  ;;  %v2695_v4 = vmul.f32 %v5312_v34, %v2580_v7  ;;  %v2755_v9 = vpop.xlane.xlu0 %2754 }
 0x3cd   :  { %4113 = vrcp.f32 %v3170_v31  ;;  %v2584_v41 = vpop.f32.mrf.mxu1  ;;  %v2919_v15 = vadd.f32 %v5486_v18, %v2755_v9 }
 0x3ce   :  { %v4102_v36 = vpop.eup %4101  ;;  %4115 = vpow2.f32 %v3662_v62  ;;  %v2585_v13 = vadd.f32 %v2584_v41, %v5403_v56  ;;  %v2858_v23 = vsel %vm2710_vm0, %v2695_v4, 0.0 }
 0x3cf   :  { %v4104_v24 = vpop.eup %4103  ;;  %v3171_v51 = vadd.f32 1.0, %v4102_v36  ;;  %v2586_v47 = vpop.f32.mrf.mxu1  ;;  %2859 = vadd.xlane.f32.xlu1 %v2858_v23  ;;  %v3663_v52 = vmul.f32 -1.442695, %v2919_v15 }
 0x3d0   :  { %3360 = vst.msk [vmem:[%s5905_s5 + $0x30] sm:$0xff] %vm3353_vm1, %v4104_v24  ;;  %v2758_v8 = vpop.xlane.xlu1 %2757  ;;  %v2696_v2 = vmul.f32 %v5312_v34, %v2585_v13 }
 0x3d1   :  { %4117 = vrcp.f32 %v3171_v51  ;;  %v2587_v11 = vpop.f32.mrf.mxu1  ;;  %v2920_v16 = vadd.f32 %v5486_v18, %v2758_v8 }
 0x3d2   :  { %v4106_v56 = vpop.eup %4105  ;;  %v2588_v35 = vadd.f32 %v2587_v11, %v5408_v40  ;;  %4119 = vpow2.f32 %v3663_v52  ;;  %v2861_v0 = vsel %vm2710_vm0, %v2696_v2, 0.0 }
 0x3d3   :  { %v4108_v53 = vpop.eup %4107  ;;  %v3172_v48 = vadd.f32 1.0, %v4106_v56  ;;  %v3664_v3 = vmul.f32 -1.442695, %v2920_v16  ;;  %v2589_v21 = vpop.f32.mrf.mxu1  ;;  %2862 = vadd.xlane.f32.xlu0 %v2861_v0 }
 0x3d4   :  { %3361 = vst.msk [vmem:[%s5905_s5 + $0x38] sm:$0xff] %vm3353_vm1, %v4108_v53  ;;  %v2697_v17 = vmul.f32 %v5312_v34, %v2588_v35  ;;  %v2761_v58 = vpop.xlane.xlu0 %2760 }
 0x3d5   :  { %4121 = vrcp.f32 %v3172_v48  ;;  %v2592_v30 = vpop.f32.mrf.mxu1  ;;  %v2921_v40 = vadd.f32 %v5486_v18, %v2761_v58 }
 0x3d6   :  { %v4110_v50 = vpop.eup %4109  ;;  %4123 = vpow2.f32 %v3664_v3  ;;  %v2593_v26 = vadd.f32 %v2592_v30, %v5413_v55  ;;  %v2864_v29 = vsel %vm2710_vm0, %v2697_v17, 0.0 }
 0x3d7   :  { %v4112_v45 = vpop.eup %4111  ;;  %3362 = vst.msk [vmem:[%s5905_s5 + $0x40] sm:$0xff] %vm3353_vm1, %v4110_v50  ;;  %v2594_v32 = vpop.f32.mrf.mxu1  ;;  %2865 = vadd.xlane.f32.xlu1 %v2864_v29  ;;  %v3665_v34 = vmul.f32 -1.442695, %v2921_v40 }
 0x3d8   :  { %v3173_v12 = vadd.f32 1.0, %v4112_v45  ;;  %v2764_v33 = vpop.xlane.xlu1 %2763  ;;  %v2698_v55 = vmul.f32 %v5596_v27, %v2593_v26 }
 0x3d9   :  { %v2595_v61 = vpop.f32.mrf.mxu1  ;;  %4125 = vpow2.f32 %v3665_v34  ;;  %v2922_v44 = vadd.f32 %v5486_v18, %v2764_v33 }
 0x3da   :  { %v4114_v37 = vpop.eup %4113  ;;  %4127 = vrcp.f32 %v3173_v12  ;;  %v2596_v60 = vadd.f32 %v2595_v61, %v5418_v46  ;;  %v2867_v19 = vsel %vm2710_vm0, %v2698_v55, 0.0 }
 0x3db   :  { %v4116_v54 = vpop.eup %4115  ;;  %3363 = vst.msk [vmem:[%s5905_s5 + $0x48] sm:$0xff] %vm3353_vm1, %v4114_v37  ;;  %v3666_v39 = vmul.f32 -1.442695, %v2922_v44  ;;  %v2597_v59 = vpop.f32.mrf.mxu1  ;;  %2868 = vadd.xlane.f32.xlu0 %v2867_v19 }
 0x3dc   :  { %v3174_v28 = vadd.f32 1.0, %v4116_v54  ;;  %v2699_v57 = vmul.f32 %v5596_v27, %v2596_v60  ;;  %v2767_v7 = vpop.xlane.xlu0 %2766 }
 0x3dd   :  { %4129 = vpow2.f32 %v3666_v39  ;;  %v2600_v6 = vpop.f32.mrf.mxu1  ;;  %v2923_v42 = vadd.f32 %v5486_v18, %v2767_v7 }
 0x3de   :  { %v4118_v46 = vpop.eup %4117  ;;  %4131 = vrcp.f32 %v3174_v28  ;;  %v2601_v31 = vadd.f32 %v2600_v6, %v5423_v49  ;;  %v2870_v62 = vsel %vm2710_vm0, %v2699_v57, 0.0 }
 0x3df   :  { %v4120_v1 = vpop.eup %4119  ;;  %3364 = vst.msk [vmem:[%s5905_s5 + $0x50] sm:$0xff] %vm3353_vm1, %v4118_v46  ;;  %v2602_v4 = vpop.f32.mrf.mxu1  ;;  %2871 = vadd.xlane.f32.xlu1 %v2870_v62  ;;  %v3667_v9 = vmul.f32 -1.442695, %v2923_v42 }
 0x3e0   :  { %v3175_v41 = vadd.f32 1.0, %v4120_v1  ;;  %v2770_v15 = vpop.xlane.xlu1 %2769  ;;  %v2700_v36 = vmul.f32 %v5596_v27, %v2601_v31 }
 0x3e1   :  { %v2603_v13 = vpop.f32.mrf.mxu1  ;;  %4133 = vpow2.f32 %v3667_v9  ;;  %v2924_v23 = vadd.f32 %v5486_v18, %v2770_v15 }
 0x3e2   :  { %v4122_v49 = vpop.eup %4121  ;;  %4135 = vrcp.f32 %v3175_v41  ;;  %v2604_v24 = vadd.f32 %v2603_v13, %v5428_v63  ;;  %v2873_v51 = vsel %vm2710_vm0, %v2700_v36, 0.0 }
 0x3e3   :  { %v4124_v47 = vpop.eup %4123  ;;  %3365 = vst.msk [vmem:[%s5905_s5 + $0x58] sm:$0xff] %vm3353_vm1, %v4122_v49  ;;  %v3668_v52 = vmul.f32 -1.442695, %v2924_v23  ;;  %v2605_v8 = vpop.f32.mrf.mxu1  ;;  %2874 = vadd.xlane.f32.xlu0 %v2873_v51 }
 0x3e4   :  { %v3176_v2 = vadd.f32 1.0, %v4124_v47  ;;  %v2701_v11 = vmul.f32 %v5596_v27, %v2604_v24  ;;  %v2773_v16 = vpop.xlane.xlu0 %2772 }
 0x3e5   :  { %4137 = vpow2.f32 %v3668_v52  ;;  %v2608_v56 = vpop.f32.mrf.mxu1  ;;  %v2925_v35 = vadd.f32 %v5486_v18, %v2773_v16 }
 0x3e6   :  { %v4126_v63 = vpop.eup %4125  ;;  %4139 = vrcp.f32 %v3176_v2  ;;  %v2609_v0 = vadd.f32 %v2608_v56, %v5433_v22  ;;  %v2876_v53 = vsel %vm2710_vm0, %v2701_v11, 0.0 }
 0x3e7   :  { %v4128_v48 = vpop.eup %4127  ;;  %v3177_v3 = vadd.f32 1.0, %v4126_v63  ;;  %v2610_v21 = vpop.f32.mrf.mxu1  ;;  %2877 = vadd.xlane.f32.xlu1 %v2876_v53  ;;  %v3669_v17 = vmul.f32 -1.442695, %v2925_v35 }
 0x3e8   :  { %3366 = vst.msk [vmem:[%s5905_s5 + $0x60] sm:$0xff] %vm3353_vm1, %v4128_v48  ;;  %v2776_v58 = vpop.xlane.xlu1 %2775  ;;  %v2702_v30 = vmul.f32 %v5596_v27, %v2609_v0 }
 0x3e9   :  { %4141 = vrcp.f32 %v3177_v3  ;;  %v2611_v40 = vpop.f32.mrf.mxu1  ;;  %v2926_v50 = vadd.f32 %v5486_v18, %v2776_v58 }
 0x3ea   :  { %v4130_v22 = vpop.eup %4129  ;;  %v2612_v26 = vadd.f32 %v2611_v40, %v5438_v20  ;;  %4143 = vpow2.f32 %v3669_v17  ;;  %v2879_v29 = vsel %vm2710_vm0, %v2702_v30, 0.0 }
 0x3eb   :  { %v4132_v45 = vpop.eup %4131  ;;  %v3178_v32 = vadd.f32 1.0, %v4130_v22  ;;  %v3670_v34 = vmul.f32 -1.442695, %v2926_v50  ;;  %v2613_v12 = vpop.f32.mrf.mxu1  ;;  %2880 = vadd.xlane.f32.xlu0 %v2879_v29 }
 0x3ec   :  { %3367 = vst.msk [vmem:[%s5905_s5 + $0x68] sm:$0xff] %vm3353_vm1, %v4132_v45  ;;  %v2703_v33 = vmul.f32 %v5596_v27, %v2612_v26  ;;  %v2779_v55 = vpop.xlane.xlu0 %2778 }
 0x3ed   :  { %4145 = vrcp.f32 %v3178_v32  ;;  %v2616_v61 = vpop.f32.mrf.mxu1  ;;  %v2927_v20 = vadd.f32 %v5486_v18, %v2779_v55 }
 0x3ee   :  { %v4134_v44 = vpop.eup %4133  ;;  %4147 = vpow2.f32 %v3670_v34  ;;  %v2617_v37 = vadd.f32 %v2616_v61, %v5443_v43  ;;  %v2882_v60 = vsel %vm2710_vm0, %v2703_v33, 0.0 }
 0x3ef   :  { %v4136_v19 = vpop.eup %4135  ;;  %v3179_v54 = vadd.f32 1.0, %v4134_v44  ;;  %v2618_v39 = vpop.f32.mrf.mxu1  ;;  %2883 = vadd.xlane.f32.xlu1 %v2882_v60  ;;  %v3671_v59 = vmul.f32 -1.442695, %v2927_v20 }
 0x3f0   :  { %3368 = vst.msk [vmem:[%s5905_s5 + $0x70] sm:$0xff] %vm3353_vm1, %v4136_v19  ;;  %v2782_v28 = vpop.xlane.xlu1 %2781  ;;  %v2704_v57 = vmul.f32 %v5596_v27, %v2617_v37 }
 0x3f1   :  { %4149 = vrcp.f32 %v3179_v54  ;;  %v2619_v7 = vpop.f32.mrf.mxu1  ;;  %v2928_v6 = vadd.f32 %v5486_v18, %v2782_v28 }
 0x3f2   :  { %v4138_v43 = vpop.eup %4137  ;;  %v2620_v42 = vadd.f32 %v2619_v7, %v5448_v10  ;;  %4151 = vpow2.f32 %v3671_v59  ;;  %v2885_v46 = vsel %vm2710_vm0, %v2704_v57, 0.0 }
 0x3f3   :  { %v4140_v31 = vpop.eup %4139  ;;  %v3180_v62 = vadd.f32 1.0, %v4138_v43  ;;  %v3672_v1 = vmul.f32 -1.442695, %v2928_v6  ;;  %v2621_v4 = vpop.f32.mrf.mxu1  ;;  %2886 = vadd.xlane.f32.xlu0 %v2885_v46 }
 0x3f4   :  { %3369 = vst.msk [vmem:[%s5905_s5 + $0x78] sm:$0xff] %vm3353_vm1, %v4140_v31  ;;  %v2705_v9 = vmul.f32 %v5596_v27, %v2620_v42  ;;  %v2785_v41 = vpop.xlane.xlu0 %2784 }
 0x3f5   :  { %4153 = vrcp.f32 %v3180_v62  ;;  %v2624_v15 = vpop.f32.mrf.mxu1  ;;  %v2929_v10 = vadd.f32 %v5486_v18, %v2785_v41 }
 0x3f6   :  { %v4142_v36 = vpop.eup %4141  ;;  %4155 = vpow2.f32 %v3672_v1  ;;  %v2625_v13 = vadd.f32 %v2624_v15, %v5453_v38  ;;  %v2888_v23 = vsel %vm2710_vm0, %v2705_v9, 0.0 }
 0x3f7   :  { %v4144_v49 = vpop.eup %4143  ;;  %3370 = vst.msk [vmem:[%s5905_s5 + $0x80] sm:$0xff] %vm3353_vm1, %v4142_v36  ;;  %v2626_v24 = vpop.f32.mrf.mxu1  ;;  %2889 = vadd.xlane.f32.xlu1 %v2888_v23  ;;  %v3673_v51 = vmul.f32 -1.442695, %v2929_v10 }
 0x3f8   :  { %v3181_v47 = vadd.f32 1.0, %v4144_v49  ;;  %v2788_v52 = vpop.xlane.xlu1 %2787  ;;  %v2706_v8 = vmul.f32 %v5596_v27, %v2625_v13 }
 0x3f9   :  { %v2627_v2 = vpop.f32.mrf.mxu1  ;;  %4157 = vpow2.f32 %v3673_v51  ;;  %v2930_v11 = vadd.f32 %v5486_v18, %v2788_v52 }
 0x3fa   :  { %v4146_v38 = vpop.eup %4145  ;;  %4159 = vrcp.f32 %v3181_v47  ;;  %v2628_v16 = vadd.f32 %v2627_v2, %v5458_v14  ;;  %v2891_v56 = vsel %vm2710_vm0, %v2706_v8, 0.0 }
 0x3fb   :  { %v4148_v35 = vpop.eup %4147  ;;  %3371 = vst.msk [vmem:[%s5905_s5 + $0x88] sm:$0xff] %vm3353_vm1, %v4146_v38  ;;  %v3674_v63 = vmul.f32 -1.442695, %v2930_v11  ;;  %v2629_v0 = vpop.f32.mrf.mxu1  ;;  %2892 = vadd.xlane.f32.xlu0 %v2891_v56 }
 0x3fc   :  { %v3182_v53 = vadd.f32 1.0, %v4148_v35  ;;  %v2707_v48 = vmul.f32 %v5596_v27, %v2628_v16  ;;  %v2791_v3 = vpop.xlane.xlu0 %2790 }
 0x3fd   :  { %4161 = vpow2.f32 %v3674_v63  ;;  %v2632_v21 = vpop.f32.mrf.mxu1  ;;  %v2931_v17 = vadd.f32 %v5486_v18, %v2791_v3 }
 0x3fe   :  { %v4150_v14 = vpop.eup %4149  ;;  %4163 = vrcp.f32 %v3182_v53  ;;  %v2633_v58 = vadd.f32 %v2632_v21, %v5463_v5  ;;  %v2894_v30 = vsel %vm2710_vm0, %v2707_v48, 0.0 }
 0x3ff   :  { %v4152_v40 = vpop.eup %4151  ;;  %3372 = vst.msk [vmem:[%s5905_s5 + $0x90] sm:$0xff] %vm3353_vm1, %v4150_v14  ;;  %v2634_v50 = vpop.f32.mrf.mxu1  ;;  %2895 = vadd.xlane.f32.xlu1 %v2894_v30  ;;  %v3675_v22 = vmul.f32 -1.442695, %v2931_v17 }
 0x400   :  { %v3183_v26 = vadd.f32 1.0, %v4152_v40  ;;  %v2794_v29 = vpop.xlane.xlu1 %2793  ;;  %v2708_v45 = vmul.f32 %v5596_v27, %v2633_v58 }
 0x401   :  { %v2635_v32 = vpop.f32.mrf.mxu1  ;;  %4165 = vpow2.f32 %v3675_v22  ;;  %v2932_v34 = vadd.f32 %v5486_v18, %v2794_v29 }
 0x402   :  { %v4154_v5 = vpop.eup %4153  ;;  %4167 = vrcp.f32 %v3183_v26  ;;  %v2636_v12 = vadd.f32 %v2635_v32, %v5468_v25  ;;  %v2897_v33 = vsel %vm2710_vm0, %v2708_v45, 0.0 }
 0x403   :  { %v4156_v55 = vpop.eup %4155  ;;  %3373 = vst.msk [vmem:[%s5905_s5 + $0x98] sm:$0xff] %vm3353_vm1, %v4154_v5  ;;  %v3676_v61 = vmul.f32 -1.442695, %v2932_v34  ;;  %v2637_v20 = vpop.f32.mrf.mxu1  ;;  %2898 = vadd.xlane.f32.xlu0 %v2897_v33 }
 0x404   :  { %v3184_v44 = vadd.f32 1.0, %v4156_v55  ;;  %v2709_v37 = vmul.f32 %v5596_v27, %v2636_v12  ;;  %v2797_v60 = vpop.xlane.xlu0 %2796 }
 0x405   :  { %4169 = vpow2.f32 %v3676_v61  ;;  %v2933_v19 = vadd.f32 %v5486_v18, %v2797_v60 }
 0x406   :  { %v4158_v54 = vpop.eup %4157  ;;  %4171 = vrcp.f32 %v3184_v44  ;;  %v2900_v25 = vsel %vm2710_vm0, %v2709_v37, 0.0 }
 0x407   :  { %v4160_v39 = vpop.eup %4159  ;;  %v3185_v59 = vadd.f32 1.0, %v4158_v54  ;;  %2901 = vadd.xlane.f32.xlu1 %v2900_v25  ;;  %v3677_v28 = vmul.f32 -1.442695, %v2933_v19 }
 0x408   :  { %3374 = vst.msk [vmem:[%s5905_s5 + $0xa0] sm:$0xff] %vm3353_vm1, %v4160_v39  ;;  %v2800_v57 = vpop.xlane.xlu1 %2799 }
 0x409   :  { %4173 = vrcp.f32 %v3185_v59  ;;  %v2934_v27 = vadd.f32 %v5486_v18, %v2800_v57 }
 0x40a   :  { %v4162_v7 = vpop.eup %4161  ;;  %4175 = vpow2.f32 %v3677_v28 }
 0x40b   :  { %v4164_v6 = vpop.eup %4163  ;;  %v3186_v43 = vadd.f32 1.0, %v4162_v7  ;;  %v3678_v42 = vmul.f32 -1.442695, %v2934_v27 }
 0x40c   :  { %3375 = vst.msk [vmem:[%s5905_s5 + $0xa8] sm:$0xff] %vm3353_vm1, %v4164_v6  ;;  %v2803_v46 = vpop.xlane.xlu0 %2802 }
 0x40d   :  { %4177 = vrcp.f32 %v3186_v43  ;;  %v2935_v31 = vadd.f32 %v5486_v18, %v2803_v46 }
 0x40e   :  { %v4166_v62 = vpop.eup %4165  ;;  %4179 = vpow2.f32 %v3678_v42 }
 0x40f   :  { %v4168_v1 = vpop.eup %4167  ;;  %v3187_v4 = vadd.f32 1.0, %v4166_v62  ;;  %v3679_v9 = vmul.f32 -1.442695, %v2935_v31 }
 0x410   :  { %3376 = vst.msk [vmem:[%s5905_s5 + $0xb0] sm:$0xff] %vm3353_vm1, %v4168_v1  ;;  %v2806_v41 = vpop.xlane.xlu1 %2805 }
 0x411   :  { %4181 = vrcp.f32 %v3187_v4  ;;  %v2936_v15 = vadd.f32 %v5486_v18, %v2806_v41 }
 0x412   :  { %v4170_v10 = vpop.eup %4169  ;;  %4183 = vpow2.f32 %v3679_v9 }
 0x413   :  { %v4172_v36 = vpop.eup %4171  ;;  %v3188_v13 = vadd.f32 1.0, %v4170_v10  ;;  %v3680_v23 = vmul.f32 -1.442695, %v2936_v15 }
 0x414   :  { %3377 = vst.msk [vmem:[%s5905_s5 + $0xb8] sm:$0xff] %vm3353_vm1, %v4172_v36  ;;  %v2809_v49 = vpop.xlane.xlu0 %2808 }
 0x415   :  { %4185 = vrcp.f32 %v3188_v13  ;;  %v2937_v24 = vadd.f32 %v5486_v18, %v2809_v49 }
 0x416   :  { %v4174_v51 = vpop.eup %4173  ;;  %4187 = vpow2.f32 %v3680_v23 }
 0x417   :  { %v4176_v47 = vpop.eup %4175  ;;  %3378 = vst.msk [vmem:[%s5905_s5 + $0xc0] sm:$0xff] %vm3353_vm1, %v4174_v51  ;;  %v3681_v52 = vmul.f32 -1.442695, %v2937_v24 }
 0x418   :  { %v3189_v8 = vadd.f32 1.0, %v4176_v47  ;;  %v2812_v2 = vpop.xlane.xlu1 %2811 }
 0x419   :  { %4189 = vpow2.f32 %v3681_v52  ;;  %v2938_v11 = vadd.f32 %v5486_v18, %v2812_v2 }
 0x41a   :  { %v4178_v38 = vpop.eup %4177  ;;  %4191 = vrcp.f32 %v3189_v8 }
 0x41b   :  { %v4180_v16 = vpop.eup %4179  ;;  %3379 = vst.msk [vmem:[%s5905_s5 + $0xc8] sm:$0xff] %vm3353_vm1, %v4178_v38  ;;  %v3682_v56 = vmul.f32 -1.442695, %v2938_v11 }
 0x41c   :  { %v3190_v35 = vadd.f32 1.0, %v4180_v16  ;;  %v2815_v63 = vpop.xlane.xlu0 %2814 }
 0x41d   :  { %4193 = vpow2.f32 %v3682_v56  ;;  %v2939_v0 = vadd.f32 %v5486_v18, %v2815_v63 }
 0x41e   :  { %v4182_v53 = vpop.eup %4181  ;;  %4195 = vrcp.f32 %v3190_v35 }
 0x41f   :  { %v4184_v48 = vpop.eup %4183  ;;  %3380 = vst.msk [vmem:[%s5905_s5 + $0xd0] sm:$0xff] %vm3353_vm1, %v4182_v53  ;;  %v3683_v3 = vmul.f32 -1.442695, %v2939_v0 }
 0x420   :  { %v3191_v21 = vadd.f32 1.0, %v4184_v48  ;;  %v2818_v17 = vpop.xlane.xlu1 %2817 }
 0x421   :  { %4197 = vpow2.f32 %v3683_v3  ;;  %v2940_v14 = vadd.f32 %v5486_v18, %v2818_v17 }
 0x422   :  { %v4186_v58 = vpop.eup %4185  ;;  %4199 = vrcp.f32 %v3191_v21 }
 0x423   :  { %v4188_v30 = vpop.eup %4187  ;;  %3381 = vst.msk [vmem:[%s5905_s5 + $0xd8] sm:$0xff] %vm3353_vm1, %v4186_v58  ;;  %v3684_v40 = vmul.f32 -1.442695, %v2940_v14 }
 0x424   :  { %v3192_v50 = vadd.f32 1.0, %v4188_v30  ;;  %v2821_v22 = vpop.xlane.xlu0 %2820 }
 0x425   :  { %4201 = vpow2.f32 %v3684_v40  ;;  %v2941_v26 = vadd.f32 %v5486_v18, %v2821_v22 }
 0x426   :  { %v4190_v29 = vpop.eup %4189  ;;  %4203 = vrcp.f32 %v3192_v50 }
 0x427   :  { %v4192_v45 = vpop.eup %4191  ;;  %v3193_v32 = vadd.f32 1.0, %v4190_v29  ;;  %v3685_v34 = vmul.f32 -1.442695, %v2941_v26 }
 0x428   :  { %3382 = vst.msk [vmem:[%s5905_s5 + $0xe0] sm:$0xff] %vm3353_vm1, %v4192_v45  ;;  %v2824_v5 = vpop.xlane.xlu1 %2823 }
 0x429   :  { %4205 = vrcp.f32 %v3193_v32  ;;  %v2942_v12 = vadd.f32 %v5486_v18, %v2824_v5 }
 0x42a   :  { %v4194_v33 = vpop.eup %4193  ;;  %4207 = vpow2.f32 %v3685_v34 }
 0x42b   :  { %v4196_v55 = vpop.eup %4195  ;;  %v3194_v61 = vadd.f32 1.0, %v4194_v33  ;;  %v3686_v20 = vmul.f32 -1.442695, %v2942_v12 }
 0x42c   :  { %3383 = vst.msk [vmem:[%s5905_s5 + $0xe8] sm:$0xff] %vm3353_vm1, %v4196_v55  ;;  %v2827_v44 = vpop.xlane.xlu0 %2826 }
 0x42d   :  { %4209 = vrcp.f32 %v3194_v61  ;;  %v2943_v37 = vadd.f32 %v5486_v18, %v2827_v44 }
 0x42e   :  { %v4198_v60 = vpop.eup %4197  ;;  %4211 = vpow2.f32 %v3686_v20 }
 0x42f   :  { %v4200_v19 = vpop.eup %4199  ;;  %v3195_v54 = vadd.f32 1.0, %v4198_v60  ;;  %v3687_v25 = vmul.f32 -1.442695, %v2943_v37 }
 0x430   :  { %3384 = vst.msk [vmem:[%s5905_s5 + $0xf0] sm:$0xff] %vm3353_vm1, %v4200_v19  ;;  %v2830_v39 = vpop.xlane.xlu1 %2829 }
 0x431   :  { %4213 = vrcp.f32 %v3195_v54  ;;  %v2944_v59 = vadd.f32 %v5486_v18, %v2830_v39 }
 0x432   :  { %v4202_v28 = vpop.eup %4201  ;;  %4215 = vpow2.f32 %v3687_v25 }
 0x433   :  { %v4204_v57 = vpop.eup %4203  ;;  %v3196_v27 = vadd.f32 1.0, %v4202_v28  ;;  %v3688_v7 = vmul.f32 -1.442695, %v2944_v59 }
 0x434   :  { %3385 = vst.msk [vmem:[%s5905_s5 + $0xf8] sm:$0xff] %vm3353_vm1, %v4204_v57  ;;  %v2833_v6 = vpop.xlane.xlu0 %2832 }
 0x435   :  { %4217 = vrcp.f32 %v3196_v27  ;;  %v2945_v43 = vadd.f32 %v5486_v18, %v2833_v6 }
 0x436   :  { %v4206_v42 = vpop.eup %4205  ;;  %4219 = vpow2.f32 %v3688_v7 }
 0x437   :  { %v4208_v46 = vpop.eup %4207  ;;  %3386 = vst.msk [vmem:[%s5905_s5 + $0x100] sm:$0xff] %vm3353_vm1, %v4206_v42  ;;  %v3689_v31 = vmul.f32 -1.442695, %v2945_v43 }
 0x438   :  { %v3197_v62 = vadd.f32 1.0, %v4208_v46  ;;  %v2836_v1 = vpop.xlane.xlu1 %2835 }
 0x439   :  { %4221 = vpow2.f32 %v3689_v31  ;;  %v2946_v4 = vadd.f32 %v5486_v18, %v2836_v1 }
 0x43a   :  { %v4210_v9 = vpop.eup %4209  ;;  %4223 = vrcp.f32 %v3197_v62 }
 0x43b   :  { %v4212_v41 = vpop.eup %4211  ;;  %3387 = vst.msk [vmem:[%s5905_s5 + $0x108] sm:$0xff] %vm3353_vm1, %v4210_v9  ;;  %v3690_v15 = vmul.f32 -1.442695, %v2946_v4 }
 0x43c   :  { %v3198_v10 = vadd.f32 1.0, %v4212_v41  ;;  %v2839_v36 = vpop.xlane.xlu0 %2838 }
 0x43d   :  { %4225 = vpow2.f32 %v3690_v15  ;;  %v2947_v13 = vadd.f32 %v5486_v18, %v2839_v36 }
 0x43e   :  { %v4214_v23 = vpop.eup %4213  ;;  %4227 = vrcp.f32 %v3198_v10 }
 0x43f   :  { %v4216_v49 = vpop.eup %4215  ;;  %3388 = vst.msk [vmem:[%s5905_s5 + $0x110] sm:$0xff] %vm3353_vm1, %v4214_v23  ;;  %v3691_v24 = vmul.f32 -1.442695, %v2947_v13 }
 0x440   :  { %v3199_v51 = vadd.f32 1.0, %v4216_v49  ;;  %v2842_v47 = vpop.xlane.xlu1 %2841 }
 0x441   :  { %4229 = vpow2.f32 %v3691_v24  ;;  %v2948_v52 = vadd.f32 %v5486_v18, %v2842_v47 }
 0x442   :  { %v4218_v8 = vpop.eup %4217  ;;  %4231 = vrcp.f32 %v3199_v51 }
 0x443   :  { %v4220_v2 = vpop.eup %4219  ;;  %3389 = vst.msk [vmem:[%s5905_s5 + $0x118] sm:$0xff] %vm3353_vm1, %v4218_v8  ;;  %v3692_v11 = vmul.f32 -1.442695, %v2948_v52 }
 0x444   :  { %v3200_v38 = vadd.f32 1.0, %v4220_v2  ;;  %v2845_v16 = vpop.xlane.xlu0 %2844 }
 0x445   :  { %4233 = vpow2.f32 %v3692_v11  ;;  %v2949_v56 = vadd.f32 %v5486_v18, %v2845_v16 }
 0x446   :  { %v4222_v35 = vpop.eup %4221  ;;  %4235 = vrcp.f32 %v3200_v38 }
 0x447   :  { %v4224_v63 = vpop.eup %4223  ;;  %v3201_v0 = vadd.f32 1.0, %v4222_v35  ;;  %v3693_v53 = vmul.f32 -1.442695, %v2949_v56 }
 0x448   :  { %3390 = vst.msk [vmem:[%s5905_s5 + $0x120] sm:$0xff] %vm3353_vm1, %v4224_v63  ;;  %v2848_v48 = vpop.xlane.xlu1 %2847 }
 0x449   :  { %4237 = vrcp.f32 %v3201_v0  ;;  %v2950_v3 = vadd.f32 %v5486_v18, %v2848_v48 }
 0x44a   :  { %v4226_v21 = vpop.eup %4225  ;;  %4239 = vpow2.f32 %v3693_v53 }
 0x44b   :  { %v4228_v17 = vpop.eup %4227  ;;  %v3202_v14 = vadd.f32 1.0, %v4226_v21  ;;  %v3694_v58 = vmul.f32 -1.442695, %v2950_v3 }
 0x44c   :  { %3391 = vst.msk [vmem:[%s5905_s5 + $0x128] sm:$0xff] %vm3353_vm1, %v4228_v17  ;;  %v2851_v30 = vpop.xlane.xlu0 %2850 }
 0x44d   :  { %4241 = vrcp.f32 %v3202_v14  ;;  %v2951_v40 = vadd.f32 %v5486_v18, %v2851_v30 }
 0x44e   :  { %v4230_v50 = vpop.eup %4229  ;;  %4243 = vpow2.f32 %v3694_v58 }
 0x44f   :  { %v4232_v22 = vpop.eup %4231  ;;  %v3203_v26 = vadd.f32 1.0, %v4230_v50  ;;  %v3695_v29 = vmul.f32 -1.442695, %v2951_v40 }
 0x450   :  { %3392 = vst.msk [vmem:[%s5905_s5 + $0x130] sm:$0xff] %vm3353_vm1, %v4232_v22  ;;  %v2854_v45 = vpop.xlane.xlu1 %2853 }
 0x451   :  { %4245 = vrcp.f32 %v3203_v26  ;;  %v2952_v32 = vadd.f32 %v5486_v18, %v2854_v45 }
 0x452   :  { %v4234_v34 = vpop.eup %4233  ;;  %4247 = vpow2.f32 %v3695_v29 }
 0x453   :  { %v4236_v5 = vpop.eup %4235  ;;  %v3204_v12 = vadd.f32 1.0, %v4234_v34  ;;  %v3696_v33 = vmul.f32 -1.442695, %v2952_v32 }
 0x454   :  { %3393 = vst.msk [vmem:[%s5905_s5 + $0x138] sm:$0xff] %vm3353_vm1, %v4236_v5  ;;  %v2857_v55 = vpop.xlane.xlu0 %2856 }
 0x455   :  { %4249 = vrcp.f32 %v3204_v12  ;;  %v2953_v61 = vadd.f32 %v5486_v18, %v2857_v55 }
 0x456   :  { %v4238_v20 = vpop.eup %4237  ;;  %4251 = vpow2.f32 %v3696_v33 }
 0x457   :  { %v4240_v44 = vpop.eup %4239  ;;  %3394 = vst.msk [vmem:[%s5905_s5 + $0x140] sm:$0xff] %vm3353_vm1, %v4238_v20  ;;  %v3697_v37 = vmul.f32 -1.442695, %v2953_v61 }
 0x458   :  { %v3205_v60 = vadd.f32 1.0, %v4240_v44  ;;  %v2860_v19 = vpop.xlane.xlu1 %2859 }
 0x459   :  { %4253 = vpow2.f32 %v3697_v37  ;;  %v2954_v54 = vadd.f32 %v5486_v18, %v2860_v19 }
 0x45a   :  { %v4242_v25 = vpop.eup %4241  ;;  %4255 = vrcp.f32 %v3205_v60 }
 0x45b   :  { %v4244_v39 = vpop.eup %4243  ;;  %3395 = vst.msk [vmem:[%s5905_s5 + $0x148] sm:$0xff] %vm3353_vm1, %v4242_v25  ;;  %v3698_v59 = vmul.f32 -1.442695, %v2954_v54 }
 0x45c   :  { %v3206_v28 = vadd.f32 1.0, %v4244_v39  ;;  %v2863_v57 = vpop.xlane.xlu0 %2862 }
 0x45d   :  { %4257 = vpow2.f32 %v3698_v59  ;;  %v2955_v27 = vadd.f32 %v5486_v18, %v2863_v57 }
 0x45e   :  { %v4246_v7 = vpop.eup %4245  ;;  %4259 = vrcp.f32 %v3206_v28 }
 0x45f   :  { %v4248_v6 = vpop.eup %4247  ;;  %3396 = vst.msk [vmem:[%s5905_s5 + $0x150] sm:$0xff] %vm3353_vm1, %v4246_v7  ;;  %v3699_v43 = vmul.f32 -1.442695, %v2955_v27 }
 0x460   :  { %v3207_v42 = vadd.f32 1.0, %v4248_v6  ;;  %v2866_v46 = vpop.xlane.xlu1 %2865 }
 0x461   :  { %4261 = vpow2.f32 %v3699_v43  ;;  %v2956_v31 = vadd.f32 %v5486_v18, %v2866_v46 }
 0x462   :  { %v4250_v62 = vpop.eup %4249  ;;  %4263 = vrcp.f32 %v3207_v42 }
 0x463   :  { %v4252_v1 = vpop.eup %4251  ;;  %3397 = vst.msk [vmem:[%s5905_s5 + $0x158] sm:$0xff] %vm3353_vm1, %v4250_v62  ;;  %v3700_v4 = vmul.f32 -1.442695, %v2956_v31 }
 0x464   :  { %v3208_v9 = vadd.f32 1.0, %v4252_v1  ;;  %v2869_v41 = vpop.xlane.xlu0 %2868 }
 0x465   :  { %4265 = vpow2.f32 %v3700_v4  ;;  %v2957_v15 = vadd.f32 %v5486_v18, %v2869_v41 }
 0x466   :  { %v4254_v10 = vpop.eup %4253  ;;  %4267 = vrcp.f32 %v3208_v9 }
 0x467   :  { %v4256_v36 = vpop.eup %4255  ;;  %v3209_v13 = vadd.f32 1.0, %v4254_v10  ;;  %v3701_v23 = vmul.f32 -1.442695, %v2957_v15 }
 0x468   :  { %3398 = vst.msk [vmem:[%s5905_s5 + $0x160] sm:$0xff] %vm3353_vm1, %v4256_v36  ;;  %v2872_v49 = vpop.xlane.xlu1 %2871 }
 0x469   :  { %4269 = vrcp.f32 %v3209_v13  ;;  %v2958_v24 = vadd.f32 %v5486_v18, %v2872_v49 }
 0x46a   :  { %v4258_v51 = vpop.eup %4257  ;;  %4271 = vpow2.f32 %v3701_v23 }
 0x46b   :  { %v4260_v47 = vpop.eup %4259  ;;  %v3210_v52 = vadd.f32 1.0, %v4258_v51  ;;  %v3702_v8 = vmul.f32 -1.442695, %v2958_v24 }
 0x46c   :  { %3399 = vst.msk [vmem:[%s5905_s5 + $0x168] sm:$0xff] %vm3353_vm1, %v4260_v47  ;;  %v2875_v2 = vpop.xlane.xlu0 %2874 }
 0x46d   :  { %4273 = vrcp.f32 %v3210_v52  ;;  %v2959_v11 = vadd.f32 %v5486_v18, %v2875_v2 }
 0x46e   :  { %v4262_v38 = vpop.eup %4261  ;;  %4275 = vpow2.f32 %v3702_v8 }
 0x46f   :  { %v4264_v16 = vpop.eup %4263  ;;  %v3211_v56 = vadd.f32 1.0, %v4262_v38  ;;  %v3703_v35 = vmul.f32 -1.442695, %v2959_v11 }
 0x470   :  { %3400 = vst.msk [vmem:[%s5905_s5 + $0x170] sm:$0xff] %vm3353_vm1, %v4264_v16  ;;  %v2878_v63 = vpop.xlane.xlu1 %2877 }
 0x471   :  { %4277 = vrcp.f32 %v3211_v56  ;;  %v2960_v0 = vadd.f32 %v5486_v18, %v2878_v63 }
 0x472   :  { %v4266_v53 = vpop.eup %4265  ;;  %4279 = vpow2.f32 %v3703_v35 }
 0x473   :  { %v4268_v48 = vpop.eup %4267  ;;  %v3212_v3 = vadd.f32 1.0, %v4266_v53  ;;  %v3704_v21 = vmul.f32 -1.442695, %v2960_v0 }
 0x474   :  { %3401 = vst.msk [vmem:[%s5905_s5 + $0x178] sm:$0xff] %vm3353_vm1, %v4268_v48  ;;  %v2881_v17 = vpop.xlane.xlu0 %2880 }
 0x475   :  { %4281 = vrcp.f32 %v3212_v3  ;;  %v2961_v14 = vadd.f32 %v5486_v18, %v2881_v17 }
 0x476   :  { %v4270_v58 = vpop.eup %4269  ;;  %4283 = vpow2.f32 %v3704_v21 }
 0x477   :  { %v4272_v30 = vpop.eup %4271  ;;  %3402 = vst.msk [vmem:[%s5905_s5 + $0x180] sm:$0xff] %vm3353_vm1, %v4270_v58  ;;  %v3705_v40 = vmul.f32 -1.442695, %v2961_v14 }
 0x478   :  { %v3213_v50 = vadd.f32 1.0, %v4272_v30  ;;  %v2884_v22 = vpop.xlane.xlu1 %2883 }
 0x479   :  { %4285 = vpow2.f32 %v3705_v40  ;;  %v2962_v26 = vadd.f32 %v5486_v18, %v2884_v22 }
 0x47a   :  { %v4274_v29 = vpop.eup %4273  ;;  %4287 = vrcp.f32 %v3213_v50 }
 0x47b   :  { %v4276_v45 = vpop.eup %4275  ;;  %3403 = vst.msk [vmem:[%s5905_s5 + $0x188] sm:$0xff] %vm3353_vm1, %v4274_v29  ;;  %v3706_v32 = vmul.f32 -1.442695, %v2962_v26 }
 0x47c   :  { %v3214_v34 = vadd.f32 1.0, %v4276_v45  ;;  %v2887_v5 = vpop.xlane.xlu0 %2886 }
 0x47d   :  { %4289 = vpow2.f32 %v3706_v32  ;;  %v2963_v12 = vadd.f32 %v5486_v18, %v2887_v5 }
 0x47e   :  { %v4278_v33 = vpop.eup %4277  ;;  %4291 = vrcp.f32 %v3214_v34 }
 0x47f   :  { %v4280_v55 = vpop.eup %4279  ;;  %3404 = vst.msk [vmem:[%s5905_s5 + $0x190] sm:$0xff] %vm3353_vm1, %v4278_v33  ;;  %v3707_v61 = vmul.f32 -1.442695, %v2963_v12 }
 0x480   :  { %v3215_v20 = vadd.f32 1.0, %v4280_v55  ;;  %v2890_v44 = vpop.xlane.xlu1 %2889 }
 0x481   :  { %4293 = vpow2.f32 %v3707_v61  ;;  %v2964_v37 = vadd.f32 %v5486_v18, %v2890_v44 }
 0x482   :  { %v4282_v60 = vpop.eup %4281  ;;  %4295 = vrcp.f32 %v3215_v20 }
 0x483   :  { %v4284_v19 = vpop.eup %4283  ;;  %3405 = vst.msk [vmem:[%s5905_s5 + $0x198] sm:$0xff] %vm3353_vm1, %v4282_v60  ;;  %v3708_v54 = vmul.f32 -1.442695, %v2964_v37 }
 0x484   :  { %v3216_v25 = vadd.f32 1.0, %v4284_v19  ;;  %v2893_v39 = vpop.xlane.xlu0 %2892 }
 0x485   :  { %4297 = vpow2.f32 %v3708_v54  ;;  %v2965_v59 = vadd.f32 %v5486_v18, %v2893_v39 }
 0x486   :  { %v4286_v28 = vpop.eup %4285  ;;  %4299 = vrcp.f32 %v3216_v25 }
 0x487   :  { %v4288_v57 = vpop.eup %4287  ;;  %v3217_v27 = vadd.f32 1.0, %v4286_v28  ;;  %v3709_v7 = vmul.f32 -1.442695, %v2965_v59 }
 0x488   :  { %3406 = vst.msk [vmem:[%s5905_s5 + $0x1a0] sm:$0xff] %vm3353_vm1, %v4288_v57  ;;  %v2896_v6 = vpop.xlane.xlu1 %2895 }
 0x489   :  { %4301 = vrcp.f32 %v3217_v27  ;;  %v2966_v43 = vadd.f32 %v5486_v18, %v2896_v6 }
 0x48a   :  { %v4290_v42 = vpop.eup %4289  ;;  %4303 = vpow2.f32 %v3709_v7 }
 0x48b   :  { %v4292_v46 = vpop.eup %4291  ;;  %v3218_v31 = vadd.f32 1.0, %v4290_v42  ;;  %v3710_v62 = vmul.f32 -1.442695, %v2966_v43 }
 0x48c   :  { %3407 = vst.msk [vmem:[%s5905_s5 + $0x1a8] sm:$0xff] %vm3353_vm1, %v4292_v46  ;;  %v2899_v1 = vpop.xlane.xlu0 %2898 }
 0x48d   :  { %4305 = vrcp.f32 %v3218_v31  ;;  %v2967_v4 = vadd.f32 %v5486_v18, %v2899_v1 }
 0x48e   :  { %v4294_v9 = vpop.eup %4293  ;;  %4307 = vpow2.f32 %v3710_v62 }
 0x48f   :  { %v4296_v41 = vpop.eup %4295  ;;  %v3219_v15 = vadd.f32 1.0, %v4294_v9  ;;  %v3711_v10 = vmul.f32 -1.442695, %v2967_v4 }
 0x490   :  { %3408 = vst.msk [vmem:[%s5905_s5 + $0x1b0] sm:$0xff] %vm3353_vm1, %v4296_v41  ;;  %v2902_v36 = vpop.xlane.xlu1 %2901 }
 0x491   :  { %4309 = vrcp.f32 %v3219_v15  ;;  %v2968_v13 = vadd.f32 %v5486_v18, %v2902_v36 }
 0x492   :  { %v4298_v23 = vpop.eup %4297  ;;  %4311 = vpow2.f32 %v3711_v10 }
 0x493   :  { %v4300_v49 = vpop.eup %4299  ;;  %v3220_v24 = vadd.f32 1.0, %v4298_v23  ;;  %v3712_v51 = vmul.f32 -1.442695, %v2968_v13 }
 0x494   :  { %3409 = vst.msk [vmem:[%s5905_s5 + $0x1b8] sm:$0xff] %vm3353_vm1, %v4300_v49 }
 0x495   :  { %4313 = vrcp.f32 %v3220_v24 }
 0x496   :  { %v4302_v47 = vpop.eup %4301  ;;  %4315 = vpow2.f32 %v3712_v51 }
 0x497   :  { %v4304_v52 = vpop.eup %4303  ;;  %3410 = vst.msk [vmem:[%s5905_s5 + $0x1c0] sm:$0xff] %vm3353_vm1, %v4302_v47 }
 0x498   :  { %v3221_v18 = vadd.f32 1.0, %v4304_v52 }
 0x49a   :  { %v4306_v8 = vpop.eup %4305  ;;  %4317 = vrcp.f32 %v3221_v18 }
 0x49b   :  { %v4308_v2 = vpop.eup %4307  ;;  %3411 = vst.msk [vmem:[%s5905_s5 + $0x1c8] sm:$0xff] %vm3353_vm1, %v4306_v8 }
 0x49c   :  { %v3222_v11 = vadd.f32 1.0, %v4308_v2 }
 0x49e   :  { %v4310_v38 = vpop.eup %4309  ;;  %4319 = vrcp.f32 %v3222_v11 }
 0x49f   :  { %v4312_v16 = vpop.eup %4311  ;;  %3412 = vst.msk [vmem:[%s5905_s5 + $0x1d0] sm:$0xff] %vm3353_vm1, %v4310_v38 }
 0x4a0   :  { %v3223_v56 = vadd.f32 1.0, %v4312_v16 }
 0x4a2   :  { %v4314_v35 = vpop.eup %4313  ;;  %4321 = vrcp.f32 %v3223_v56 }
 0x4a3   :  { %v4316_v63 = vpop.eup %4315  ;;  %3413 = vst.msk [vmem:[%s5905_s5 + $0x1d8] sm:$0xff] %vm3353_vm1, %v4314_v35 }
 0x4a4   :  { %v3224_v0 = vadd.f32 1.0, %v4316_v63 }
 0x4a6   :  { %4323 = vrcp.f32 %v3224_v0 }
 0x4a7   :  { %v4318_v53 = vpop.eup %4317 }
 0x4a8   :  { %3414 = vst.msk [vmem:[%s5905_s5 + $0x1e0] sm:$0xff] %vm3353_vm1, %v4318_v53 }
 0x4ab   :  { %v4320_v48 = vpop.eup %4319 }
 0x4ac   :  { %3415 = vst.msk [vmem:[%s5905_s5 + $0x1e8] sm:$0xff] %vm3353_vm1, %v4320_v48 }
 0x4af   :  { %v4322_v3 = vpop.eup %4321 }
 0x4b0   :  { %3416 = vst.msk [vmem:[%s5905_s5 + $0x1f0] sm:$0xff] %vm3353_vm1, %v4322_v3 }
 0x4b3   :  { %v4324_v21 = vpop.eup %4323 }
 0x4b4   :  { %3417 = vst.msk [vmem:[%s5905_s5 + $0x1f8] sm:$0xff] %vm3353_vm1, %v4324_v21 }
 0x4b5   :  { %3422 = vsyncpa [#allocation4], 1 }

</bundles_post_ra>
